<compile_context>
chip_gen: v7x
topology: tpu7x:2x2x1
jax: 0.10.0
libtpu: 0.0.40
codegen_flags: <defaults>
</compile_context>

<pallas_src>
import math
from functools import partial

import jax
import jax.numpy as jnp
from jax import lax
from jax.experimental import pallas as pl
from jax.experimental.pallas import tpu as pltpu


def _bilinear2x_matrix(n):
    """(2n, n) matrix M with M @ v == F.interpolate(v, 2x, bilinear, align_corners=False)
    along one axis (half-pixel centers, edge clamped)."""
    dst = jnp.arange(2 * n, dtype=jnp.float32)
    src = jnp.clip(dst * 0.5 - 0.25, 0.0, float(n - 1))
    i0 = jnp.floor(src).astype(jnp.int32)
    i1 = jnp.minimum(i0 + 1, n - 1)
    frac = (src - i0.astype(jnp.float32))[:, None]
    cols = jnp.arange(n, dtype=jnp.int32)[None, :]
    m = (jnp.where(cols == i0[:, None], 1.0 - frac, 0.0)
         + jnp.where(cols == i1[:, None], frac, 0.0))
    return m.astype(jnp.float32)


def _pad_rows(m, pad):
    """Prepend/append `pad` zero rows (the conv's zero padding folded into the matrix)."""
    if pad == 0:
        return m
    z = jnp.zeros((pad, m.shape[1]), m.dtype)
    return jnp.concatenate([z, m, z], axis=0)


def _conv_up_kernel(x_ref, a_ref, btk_ref, wtab_ref, b_ref, o_ref, up_ref, *,
                    k, stride, cin, activate, neg_slope):
    # x_ref:    (1, H, Cin*W)       channel-lane-packed input for one batch element (VMEM)
    # a_ref:    (Hp, H)             fused H bilinear-2x upsample + H zero-pad matrix (VMEM)
    # btk_ref:  (K, Cin*W, Cin*Wo)  block-diag fused W upsample + W pad + kw-tap matrices (VMEM)
    # wtab_ref: (Cout*K*K, Cin*Wo)  lane-broadcast scaled conv weights (VMEM)
    # b_ref:    (Cout,)             scaled bias (zeros when unused), SMEM scalars
    # o_ref:    (1, Cout, Ho, Wo)   output for one batch element (VMEM)
    # up_ref:   (K, Hp, Cin*Wo)     scratch: up_ref[kw, u, ci*Wo+ow] = up_pad[ci, u, ow*stride+kw]
    _, cout, ho, wo = o_ref.shape
    width = cin * wo

    # ---- upsample + pad build: 1 + K small MXU matmuls (one-time per batch element) ----
    xh = jnp.dot(a_ref[...], x_ref[0], preferred_element_type=jnp.float32)       # (Hp, Cin*W)
    for kw in range(k):
        up_ref[kw] = jnp.dot(xh, btk_ref[kw],
                             preferred_element_type=jnp.float32)                 # (Hp, Cin*Wo)

    # ---- direct conv on the VPU: lane-packed taps * lane-broadcast weight rows ----
    accs = [jnp.zeros((ho, width), jnp.float32) for _ in range(cout)]
    for kh in range(k):
        for kw in range(k):
            if stride == 1:
                tap = up_ref[kw, kh:kh + ho, :]                                   # (Ho, Cin*Wo)
            else:
                tap = up_ref[kw, pl.ds(kh, ho, stride), :]                        # stride>1 path
            for co in range(cout):
                accs[co] = accs[co] + tap * wtab_ref[(co * k + kh) * k + kw]

    # ---- Cin reduction across Wo-lane channel blocks (XLU rolls), bias, activation ----
    planes = []
    for co in range(cout):
        acc = accs[co]
        c = cin
        if width % 128 == 0:
            # power-of-two halving tree with full-width circular rolls (direction-invariant)
            while c > 1 and c % 2 == 0:
                half = (c // 2) * wo
                acc = acc + pltpu.roll(acc, shift=width - half, axis=1)
                c //= 2
        if c > 1:
            red = acc[:, :wo]
            for ci in range(1, c):
                red = red + acc[:, ci * wo:(ci + 1) * wo]
        else:
            red = acc[:, :wo]
        planes.append(red + b_ref[co])

    out = jnp.stack(planes, axis=0)                                               # (Cout, Ho, Wo)
    if activate:
        # sqrt(2) gain already folded into weights & bias on the host.
        out = jnp.where(out >= 0.0, out, neg_slope * out)
    o_ref[0] = out.astype(o_ref.dtype)                                            # single store


def conv_up_layer(x_nchw, weight, bias=None, *, stride=1, padding=0, use_bias=True,
                  activate=True, neg_slope=0.2):
    """ConvUpLayer forward. NCHW in -> NCHW out."""
    n, cin, h, w = x_nchw.shape
    cout, cin_w, k, k2 = weight.shape
    assert cin == cin_w and k == k2
    scale = 1.0 / math.sqrt(cin * k * k)
    act_scale = math.sqrt(2.0) if activate else 1.0

    hp, wp = 2 * h + 2 * padding, 2 * w + 2 * padding
    ho = (hp - k) // stride + 1
    wo = (wp - k) // stride + 1
    assert ho >= 1 and wo >= 1
    width = cin * wo

    # Tiny per-axis matrices fusing bilinear-2x upsample + conv zero-padding; along W the kw tap
    # selection and the Cin lane-packing (block-diagonal over channels) are folded in as well.
    a_mat = _pad_rows(_bilinear2x_matrix(h), padding)                             # (Hp, H)
    b_mat = _pad_rows(_bilinear2x_matrix(w), padding)                             # (Wp, W)
    eye_c = jnp.eye(cin, dtype=jnp.float32)
    btk = jnp.stack(
        [jnp.kron(eye_c, b_mat[kw: kw + (wo - 1) * stride + 1: stride, :].T)
         for kw in range(k)], axis=0)                                             # (K, Cin*W, Cin*Wo)

    # Lane-broadcast weight table: row (co*K+kh)*K+kw, lanes [ci*Wo,(ci+1)*Wo) hold
    # weight[co,ci,kh,kw] * scale * act_scale (activation gain folded in here).
    w_s = weight.astype(jnp.float32) * (scale * act_scale)
    w2d = jnp.transpose(w_s, (0, 2, 3, 1)).reshape(cout * k * k, cin)
    wtab = jnp.repeat(w2d, wo, axis=1)                                            # (Cout*K*K, Cin*Wo)

    if use_bias and bias is not None:
        b_vec = bias.astype(jnp.float32).reshape(cout) * act_scale
    else:
        b_vec = jnp.zeros((cout,), jnp.float32)

    # Channel-lane-packed input view (tiny wrapper-side layout plumbing, no compute):
    # x_wide[b, hh, ci*W + ww] = x[b, ci, hh, ww]
    x_wide = jnp.transpose(x_nchw.astype(jnp.float32), (0, 2, 1, 3)).reshape(n, h, cin * w)

    kernel = partial(_conv_up_kernel, k=k, stride=stride, cin=cin,
                     activate=activate, neg_slope=neg_slope)

    out = pl.pallas_call(
        kernel,
        out_shape=jax.ShapeDtypeStruct((n, cout, ho, wo), jnp.float32),
        grid_spec=pltpu.PrefetchScalarGridSpec(
            num_scalar_prefetch=0,
            grid=(n,),
            in_specs=[
                pl.BlockSpec((1, h, cin * w), lambda b: (b, 0, 0)),
                pl.BlockSpec((hp, h), lambda b: (0, 0)),
                pl.BlockSpec((k, cin * w, width), lambda b: (0, 0, 0)),
                pl.BlockSpec((cout * k * k, width), lambda b: (0, 0)),
                pl.BlockSpec(memory_space=pltpu.MemorySpace.SMEM),
            ],
            out_specs=pl.BlockSpec((1, cout, ho, wo), lambda b: (b, 0, 0, 0)),
            scratch_shapes=[pltpu.VMEM((k, hp, width), jnp.float32)],
        ),
        compiler_params=pltpu.CompilerParams(
            dimension_semantics=("parallel",),
            vmem_limit_bytes=32 * 1024 * 1024,
        ),
    )(x_wide, a_mat, btk, wtab, b_vec)
    return out


def _reference(x_nchw, weight, bias, *, stride, padding, use_bias, activate):
    """Independent pure-JAX reference: jax.image.resize bilinear (== F.interpolate
    align_corners=False for 2x) + XLA conv at HIGHEST precision."""
    n, cin, h, w = x_nchw.shape
    cout, _, k, _ = weight.shape
    scale = 1.0 / math.sqrt(cin * k * k)
    x_up = jax.image.resize(x_nchw.astype(jnp.float32), (n, cin, 2 * h, 2 * w),
                            method="bilinear")
    y = lax.conv_general_dilated(
        x_up, weight.astype(jnp.float32) * scale,
        window_strides=(stride, stride),
        padding=[(padding, padding), (padding, padding)],
        dimension_numbers=("NCHW", "OIHW", "NCHW"),
        precision=lax.Precision.HIGHEST)
    if use_bias and bias is not None:
        y = y + bias.reshape(1, cout, 1, 1).astype(jnp.float32)
    if activate:
        y = jnp.where(y >= 0, y, 0.2 * y) * math.sqrt(2.0)
    return y


if __name__ == "__main__":
    # ConvUpLayer(in_channels=4, out_channels=8, kernel_size=3, stride=1, padding=1,
    #             bias=True, activate=True) plus its bias / activation variants.
    N, Cin, H, W = 2, 4, 16, 16
    Cout, K = 8, 3
    stride, padding = 1, 1

    key = jax.random.PRNGKey(0)
    k_w, k_x, k_b = jax.random.split(key, 3)
    weight = jax.random.normal(k_w, (Cout, Cin, K, K), dtype=jnp.float32)   # ~ torch.randn init
    x = jax.random.normal(k_x, (N, Cin, H, W), dtype=jnp.float32)
    fused_bias = 0.1 * jax.random.normal(k_b, (Cout,), dtype=jnp.float32)

    configs = [
        dict(bias=fused_bias, use_bias=True, activate=True),    # conv -> FusedLeakyReLU
        dict(bias=fused_bias, use_bias=True, activate=False),   # conv + bias only
        dict(bias=None, use_bias=False, activate=True),         # conv -> ScaledLeakyReLU
    ]
    for cfg in configs:
        out = conv_up_layer(x, weight, cfg["bias"], stride=stride, padding=padding,
                            use_bias=cfg["use_bias"], activate=cfg["activate"])
        out = jax.block_until_ready(out)
        ref = _reference(x, weight, cfg["bias"], stride=stride, padding=padding,
                         use_bias=cfg["use_bias"], activate=cfg["activate"])
        ref = jax.block_until_ready(ref)
        assert out.shape == (N, Cout, 2 * H, 2 * W), out.shape
        max_err = float(jnp.max(jnp.abs(out - ref)))
        assert jnp.allclose(out, ref, rtol=5e-4, atol=5e-4), (cfg, max_err)

    print("KERNEL_OK")
</pallas_src>

<mosaic_0001>
module attributes {stable_mosaic.version = 11 : i64} {
  func.func @_conv_up_kernel(%arg0: i32, %arg1: memref<1x16x64xf32, #tpu.memory_space<vmem>>, %arg2: memref<34x16xf32, #tpu.memory_space<vmem>>, %arg3: memref<3x64x128xf32, #tpu.memory_space<vmem>>, %arg4: memref<72x128xf32, #tpu.memory_space<vmem>>, %arg5: memref<8xf32, #tpu.memory_space<smem>>, %arg6: memref<1x8x32x32xf32, #tpu.memory_space<vmem>>, %arg7: memref<3x34x128xf32, #tpu.memory_space<vmem>>) attributes {dimension_semantics = [#tpu.dimension_semantics<parallel>], iteration_bounds = array<i64: 2>, scalar_prefetch = 0 : i64, scratch_operands = 1 : i64, tpu.core_type = #tpu.core_type<tc>, window_params = [{transform_indices = @transform_0, window_bounds = array<i64: 1, 16, 64>}, {pipeline_mode = #tpu.pipeline_mode<synchronous>, transform_indices = @transform_1, window_bounds = array<i64: 34, 16>}, {pipeline_mode = #tpu.pipeline_mode<synchronous>, transform_indices = @transform_2, window_bounds = array<i64: 3, 64, 128>}, {pipeline_mode = #tpu.pipeline_mode<synchronous>, transform_indices = @transform_3, window_bounds = array<i64: 72, 128>}, {transform_indices = @transform_4, window_bounds = array<i64: 8>}, {transform_indices = @transform_5, window_bounds = array<i64: 1, 8, 32, 32>}]} {
    %c0 = arith.constant 0 : index
    %c0_0 = arith.constant 0 : index
    %0 = vector.load %arg2[%c0, %c0_0] : memref<34x16xf32, #tpu.memory_space<vmem>>, vector<34x16xf32>
    %c0_1 = arith.constant 0 : index
    %c0_2 = arith.constant 0 : index
    %c0_3 = arith.constant 0 : index
    %1 = vector.load %arg1[%c0_1, %c0_2, %c0_3] : memref<1x16x64xf32, #tpu.memory_space<vmem>>, vector<1x16x64xf32>
    %2 = vector.shape_cast %1 : vector<1x16x64xf32> to vector<16x64xf32>
    %cst = arith.constant dense<0.000000e+00> : vector<34x64xf32>
    %3 = tpu.matmul %0, %2, %cst {dimension_numbers = #tpu.dot_dimension_numbers<[1], [0], [0], [1], [0, 0, 1, 1], [], []>} : vector<34x16xf32>, vector<16x64xf32>, vector<34x64xf32> -> vector<34x64xf32>
    %c0_4 = arith.constant 0 : index
    %c0_5 = arith.constant 0 : index
    %c0_6 = arith.constant 0 : index
    %4 = vector.load %arg3[%c0_4, %c0_5, %c0_6] : memref<3x64x128xf32, #tpu.memory_space<vmem>>, vector<1x64x128xf32>
    %5 = vector.shape_cast %4 : vector<1x64x128xf32> to vector<64x128xf32>
    %cst_7 = arith.constant dense<0.000000e+00> : vector<34x128xf32>
    %6 = tpu.matmul %3, %5, %cst_7 {dimension_numbers = #tpu.dot_dimension_numbers<[1], [0], [0], [1], [0, 0, 1, 1], [], []>} : vector<34x64xf32>, vector<64x128xf32>, vector<34x128xf32> -> vector<34x128xf32>
    %c0_8 = arith.constant 0 : index
    %c0_9 = arith.constant 0 : index
    %c0_10 = arith.constant 0 : index
    %7 = vector.load %arg7[%c0_8, %c0_9, %c0_10] : memref<3x34x128xf32, #tpu.memory_space<vmem>>, vector<1x34x128xf32>
    %8 = vector.shape_cast %7 : vector<1x34x128xf32> to vector<34x128xf32>
    %9 = vector.shape_cast %6 : vector<34x128xf32> to vector<1x34x128xf32>
    tpu.vector_store %arg7[%c0_8, %c0_9, %c0_10], %9 {strides = array<i32>} : memref<3x34x128xf32, #tpu.memory_space<vmem>>, vector<1x34x128xf32>,
    %c1 = arith.constant 1 : index
    %c0_11 = arith.constant 0 : index
    %c0_12 = arith.constant 0 : index
    %10 = vector.load %arg3[%c1, %c0_11, %c0_12] : memref<3x64x128xf32, #tpu.memory_space<vmem>>, vector<1x64x128xf32>
    %11 = vector.shape_cast %10 : vector<1x64x128xf32> to vector<64x128xf32>
    %cst_13 = arith.constant dense<0.000000e+00> : vector<34x128xf32>
    %12 = tpu.matmul %3, %11, %cst_13 {dimension_numbers = #tpu.dot_dimension_numbers<[1], [0], [0], [1], [0, 0, 1, 1], [], []>} : vector<34x64xf32>, vector<64x128xf32>, vector<34x128xf32> -> vector<34x128xf32>
    %c1_14 = arith.constant 1 : index
    %c0_15 = arith.constant 0 : index
    %c0_16 = arith.constant 0 : index
    %13 = vector.load %arg7[%c1_14, %c0_15, %c0_16] : memref<3x34x128xf32, #tpu.memory_space<vmem>>, vector<1x34x128xf32>
    %14 = vector.shape_cast %13 : vector<1x34x128xf32> to vector<34x128xf32>
    %15 = vector.shape_cast %12 : vector<34x128xf32> to vector<1x34x128xf32>
    tpu.vector_store %arg7[%c1_14, %c0_15, %c0_16], %15 {strides = array<i32>} : memref<3x34x128xf32, #tpu.memory_space<vmem>>, vector<1x34x128xf32>,
    %c2 = arith.constant 2 : index
    %c0_17 = arith.constant 0 : index
    %c0_18 = arith.constant 0 : index
    %16 = vector.load %arg3[%c2, %c0_17, %c0_18] : memref<3x64x128xf32, #tpu.memory_space<vmem>>, vector<1x64x128xf32>
    %17 = vector.shape_cast %16 : vector<1x64x128xf32> to vector<64x128xf32>
    %cst_19 = arith.constant dense<0.000000e+00> : vector<34x128xf32>
    %18 = tpu.matmul %3, %17, %cst_19 {dimension_numbers = #tpu.dot_dimension_numbers<[1], [0], [0], [1], [0, 0, 1, 1], [], []>} : vector<34x64xf32>, vector<64x128xf32>, vector<34x128xf32> -> vector<34x128xf32>
    %c2_20 = arith.constant 2 : index
    %c0_21 = arith.constant 0 : index
    %c0_22 = arith.constant 0 : index
    %19 = vector.load %arg7[%c2_20, %c0_21, %c0_22] : memref<3x34x128xf32, #tpu.memory_space<vmem>>, vector<1x34x128xf32>
    %20 = vector.shape_cast %19 : vector<1x34x128xf32> to vector<34x128xf32>
    %21 = vector.shape_cast %18 : vector<34x128xf32> to vector<1x34x128xf32>
    tpu.vector_store %arg7[%c2_20, %c0_21, %c0_22], %21 {strides = array<i32>} : memref<3x34x128xf32, #tpu.memory_space<vmem>>, vector<1x34x128xf32>,
    %cst_23 = arith.constant 0.000000e+00 : f32
    %22 = vector.broadcast %cst_23 : f32 to vector<32x128xf32>
    %cst_24 = arith.constant 0.000000e+00 : f32
    %23 = vector.broadcast %cst_24 : f32 to vector<32x128xf32>
    %cst_25 = arith.constant 0.000000e+00 : f32
    %24 = vector.broadcast %cst_25 : f32 to vector<32x128xf32>
    %cst_26 = arith.constant 0.000000e+00 : f32
    %25 = vector.broadcast %cst_26 : f32 to vector<32x128xf32>
    %cst_27 = arith.constant 0.000000e+00 : f32
    %26 = vector.broadcast %cst_27 : f32 to vector<32x128xf32>
    %cst_28 = arith.constant 0.000000e+00 : f32
    %27 = vector.broadcast %cst_28 : f32 to vector<32x128xf32>
    %cst_29 = arith.constant 0.000000e+00 : f32
    %28 = vector.broadcast %cst_29 : f32 to vector<32x128xf32>
    %cst_30 = arith.constant 0.000000e+00 : f32
    %29 = vector.broadcast %cst_30 : f32 to vector<32x128xf32>
    %c0_31 = arith.constant 0 : index
    %c0_32 = arith.constant 0 : index
    %c0_33 = arith.constant 0 : index
    %30 = vector.load %arg7[%c0_31, %c0_32, %c0_33] : memref<3x34x128xf32, #tpu.memory_space<vmem>>, vector<1x32x128xf32>
    %31 = vector.shape_cast %30 : vector<1x32x128xf32> to vector<32x128xf32>
    %c0_34 = arith.constant 0 : index
    %c0_35 = arith.constant 0 : index
    %32 = vector.load %arg4[%c0_34, %c0_35] : memref<72x128xf32, #tpu.memory_space<vmem>>, vector<1x128xf32>
    %33 = vector.shape_cast %32 : vector<1x128xf32> to vector<128xf32>
    %34 = vector.shape_cast %33 : vector<128xf32> to vector<1x128xf32>
    %35 = vector.broadcast %34 : vector<1x128xf32> to vector<32x128xf32>
    %36 = arith.mulf %31, %35 : vector<32x128xf32>
    %37 = arith.addf %22, %36 : vector<32x128xf32>
    %c9 = arith.constant 9 : index
    %c0_36 = arith.constant 0 : index
    %38 = vector.load %arg4[%c9, %c0_36] : memref<72x128xf32, #tpu.memory_space<vmem>>, vector<1x128xf32>
    %39 = vector.shape_cast %38 : vector<1x128xf32> to vector<128xf32>
    %40 = vector.shape_cast %39 : vector<128xf32> to vector<1x128xf32>
    %41 = vector.broadcast %40 : vector<1x128xf32> to vector<32x128xf32>
    %42 = arith.mulf %31, %41 : vector<32x128xf32>
    %43 = arith.addf %23, %42 : vector<32x128xf32>
    %c18 = arith.constant 18 : index
    %c0_37 = arith.constant 0 : index
    %44 = vector.load %arg4[%c18, %c0_37] : memref<72x128xf32, #tpu.memory_space<vmem>>, vector<1x128xf32>
    %45 = vector.shape_cast %44 : vector<1x128xf32> to vector<128xf32>
    %46 = vector.shape_cast %45 : vector<128xf32> to vector<1x128xf32>
    %47 = vector.broadcast %46 : vector<1x128xf32> to vector<32x128xf32>
    %48 = arith.mulf %31, %47 : vector<32x128xf32>
    %49 = arith.addf %24, %48 : vector<32x128xf32>
    %c27 = arith.constant 27 : index
    %c0_38 = arith.constant 0 : index
    %50 = vector.load %arg4[%c27, %c0_38] : memref<72x128xf32, #tpu.memory_space<vmem>>, vector<1x128xf32>
    %51 = vector.shape_cast %50 : vector<1x128xf32> to vector<128xf32>
    %52 = vector.shape_cast %51 : vector<128xf32> to vector<1x128xf32>
    %53 = vector.broadcast %52 : vector<1x128xf32> to vector<32x128xf32>
    %54 = arith.mulf %31, %53 : vector<32x128xf32>
    %55 = arith.addf %25, %54 : vector<32x128xf32>
    %c36 = arith.constant 36 : index
    %c0_39 = arith.constant 0 : index
    %56 = vector.load %arg4[%c36, %c0_39] : memref<72x128xf32, #tpu.memory_space<vmem>>, vector<1x128xf32>
    %57 = vector.shape_cast %56 : vector<1x128xf32> to vector<128xf32>
    %58 = vector.shape_cast %57 : vector<128xf32> to vector<1x128xf32>
    %59 = vector.broadcast %58 : vector<1x128xf32> to vector<32x128xf32>
    %60 = arith.mulf %31, %59 : vector<32x128xf32>
    %61 = arith.addf %26, %60 : vector<32x128xf32>
    %c45 = arith.constant 45 : index
    %c0_40 = arith.constant 0 : index
    %62 = vector.load %arg4[%c45, %c0_40] : memref<72x128xf32, #tpu.memory_space<vmem>>, vector<1x128xf32>
    %63 = vector.shape_cast %62 : vector<1x128xf32> to vector<128xf32>
    %64 = vector.shape_cast %63 : vector<128xf32> to vector<1x128xf32>
    %65 = vector.broadcast %64 : vector<1x128xf32> to vector<32x128xf32>
    %66 = arith.mulf %31, %65 : vector<32x128xf32>
    %67 = arith.addf %27, %66 : vector<32x128xf32>
    %c54 = arith.constant 54 : index
    %c0_41 = arith.constant 0 : index
    %68 = vector.load %arg4[%c54, %c0_41] : memref<72x128xf32, #tpu.memory_space<vmem>>, vector<1x128xf32>
    %69 = vector.shape_cast %68 : vector<1x128xf32> to vector<128xf32>
    %70 = vector.shape_cast %69 : vector<128xf32> to vector<1x128xf32>
    %71 = vector.broadcast %70 : vector<1x128xf32> to vector<32x128xf32>
    %72 = arith.mulf %31, %71 : vector<32x128xf32>
    %73 = arith.addf %28, %72 : vector<32x128xf32>
    %c63 = arith.constant 63 : index
    %c0_42 = arith.constant 0 : index
    %74 = vector.load %arg4[%c63, %c0_42] : memref<72x128xf32, #tpu.memory_space<vmem>>, vector<1x128xf32>
    %75 = vector.shape_cast %74 : vector<1x128xf32> to vector<128xf32>
    %76 = vector.shape_cast %75 : vector<128xf32> to vector<1x128xf32>
    %77 = vector.broadcast %76 : vector<1x128xf32> to vector<32x128xf32>
    %78 = arith.mulf %31, %77 : vector<32x128xf32>
    %79 = arith.addf %29, %78 : vector<32x128xf32>
    %c1_43 = arith.constant 1 : index
    %c0_44 = arith.constant 0 : index
    %c0_45 = arith.constant 0 : index
    %80 = vector.load %arg7[%c1_43, %c0_44, %c0_45] : memref<3x34x128xf32, #tpu.memory_space<vmem>>, vector<1x32x128xf32>
    %81 = vector.shape_cast %80 : vector<1x32x128xf32> to vector<32x128xf32>
    %c1_46 = arith.constant 1 : index
    %c0_47 = arith.constant 0 : index
    %82 = vector.load %arg4[%c1_46, %c0_47] : memref<72x128xf32, #tpu.memory_space<vmem>>, vector<1x128xf32>
    %83 = vector.shape_cast %82 : vector<1x128xf32> to vector<128xf32>
    %84 = vector.shape_cast %83 : vector<128xf32> to vector<1x128xf32>
    %85 = vector.broadcast %84 : vector<1x128xf32> to vector<32x128xf32>
    %86 = arith.mulf %81, %85 : vector<32x128xf32>
    %87 = arith.addf %37, %86 : vector<32x128xf32>
    %c10 = arith.constant 10 : index
    %c0_48 = arith.constant 0 : index
    %88 = vector.load %arg4[%c10, %c0_48] : memref<72x128xf32, #tpu.memory_space<vmem>>, vector<1x128xf32>
    %89 = vector.shape_cast %88 : vector<1x128xf32> to vector<128xf32>
    %90 = vector.shape_cast %89 : vector<128xf32> to vector<1x128xf32>
    %91 = vector.broadcast %90 : vector<1x128xf32> to vector<32x128xf32>
    %92 = arith.mulf %81, %91 : vector<32x128xf32>
    %93 = arith.addf %43, %92 : vector<32x128xf32>
    %c19 = arith.constant 19 : index
    %c0_49 = arith.constant 0 : index
    %94 = vector.load %arg4[%c19, %c0_49] : memref<72x128xf32, #tpu.memory_space<vmem>>, vector<1x128xf32>
    %95 = vector.shape_cast %94 : vector<1x128xf32> to vector<128xf32>
    %96 = vector.shape_cast %95 : vector<128xf32> to vector<1x128xf32>
    %97 = vector.broadcast %96 : vector<1x128xf32> to vector<32x128xf32>
    %98 = arith.mulf %81, %97 : vector<32x128xf32>
    %99 = arith.addf %49, %98 : vector<32x128xf32>
    %c28 = arith.constant 28 : index
    %c0_50 = arith.constant 0 : index
    %100 = vector.load %arg4[%c28, %c0_50] : memref<72x128xf32, #tpu.memory_space<vmem>>, vector<1x128xf32>
    %101 = vector.shape_cast %100 : vector<1x128xf32> to vector<128xf32>
    %102 = vector.shape_cast %101 : vector<128xf32> to vector<1x128xf32>
    %103 = vector.broadcast %102 : vector<1x128xf32> to vector<32x128xf32>
    %104 = arith.mulf %81, %103 : vector<32x128xf32>
    %105 = arith.addf %55, %104 : vector<32x128xf32>
    %c37 = arith.constant 37 : index
    %c0_51 = arith.constant 0 : index
    %106 = vector.load %arg4[%c37, %c0_51] : memref<72x128xf32, #tpu.memory_space<vmem>>, vector<1x128xf32>
    %107 = vector.shape_cast %106 : vector<1x128xf32> to vector<128xf32>
    %108 = vector.shape_cast %107 : vector<128xf32> to vector<1x128xf32>
    %109 = vector.broadcast %108 : vector<1x128xf32> to vector<32x128xf32>
    %110 = arith.mulf %81, %109 : vector<32x128xf32>
    %111 = arith.addf %61, %110 : vector<32x128xf32>
    %c46 = arith.constant 46 : index
    %c0_52 = arith.constant 0 : index
    %112 = vector.load %arg4[%c46, %c0_52] : memref<72x128xf32, #tpu.memory_space<vmem>>, vector<1x128xf32>
    %113 = vector.shape_cast %112 : vector<1x128xf32> to vector<128xf32>
    %114 = vector.shape_cast %113 : vector<128xf32> to vector<1x128xf32>
    %115 = vector.broadcast %114 : vector<1x128xf32> to vector<32x128xf32>
    %116 = arith.mulf %81, %115 : vector<32x128xf32>
    %117 = arith.addf %67, %116 : vector<32x128xf32>
    %c55 = arith.constant 55 : index
    %c0_53 = arith.constant 0 : index
    %118 = vector.load %arg4[%c55, %c0_53] : memref<72x128xf32, #tpu.memory_space<vmem>>, vector<1x128xf32>
    %119 = vector.shape_cast %118 : vector<1x128xf32> to vector<128xf32>
    %120 = vector.shape_cast %119 : vector<128xf32> to vector<1x128xf32>
    %121 = vector.broadcast %120 : vector<1x128xf32> to vector<32x128xf32>
    %122 = arith.mulf %81, %121 : vector<32x128xf32>
    %123 = arith.addf %73, %122 : vector<32x128xf32>
    %c64 = arith.constant 64 : index
    %c0_54 = arith.constant 0 : index
    %124 = vector.load %arg4[%c64, %c0_54] : memref<72x128xf32, #tpu.memory_space<vmem>>, vector<1x128xf32>
    %125 = vector.shape_cast %124 : vector<1x128xf32> to vector<128xf32>
    %126 = vector.shape_cast %125 : vector<128xf32> to vector<1x128xf32>
    %127 = vector.broadcast %126 : vector<1x128xf32> to vector<32x128xf32>
    %128 = arith.mulf %81, %127 : vector<32x128xf32>
    %129 = arith.addf %79, %128 : vector<32x128xf32>
    %c2_55 = arith.constant 2 : index
    %c0_56 = arith.constant 0 : index
    %c0_57 = arith.constant 0 : index
    %130 = vector.load %arg7[%c2_55, %c0_56, %c0_57] : memref<3x34x128xf32, #tpu.memory_space<vmem>>, vector<1x32x128xf32>
    %131 = vector.shape_cast %130 : vector<1x32x128xf32> to vector<32x128xf32>
    %c2_58 = arith.constant 2 : index
    %c0_59 = arith.constant 0 : index
    %132 = vector.load %arg4[%c2_58, %c0_59] : memref<72x128xf32, #tpu.memory_space<vmem>>, vector<1x128xf32>
    %133 = vector.shape_cast %132 : vector<1x128xf32> to vector<128xf32>
    %134 = vector.shape_cast %133 : vector<128xf32> to vector<1x128xf32>
    %135 = vector.broadcast %134 : vector<1x128xf32> to vector<32x128xf32>
    %136 = arith.mulf %131, %135 : vector<32x128xf32>
    %137 = arith.addf %87, %136 : vector<32x128xf32>
    %c11 = arith.constant 11 : index
    %c0_60 = arith.constant 0 : index
    %138 = vector.load %arg4[%c11, %c0_60] : memref<72x128xf32, #tpu.memory_space<vmem>>, vector<1x128xf32>
    %139 = vector.shape_cast %138 : vector<1x128xf32> to vector<128xf32>
    %140 = vector.shape_cast %139 : vector<128xf32> to vector<1x128xf32>
    %141 = vector.broadcast %140 : vector<1x128xf32> to vector<32x128xf32>
    %142 = arith.mulf %131, %141 : vector<32x128xf32>
    %143 = arith.addf %93, %142 : vector<32x128xf32>
    %c20 = arith.constant 20 : index
    %c0_61 = arith.constant 0 : index
    %144 = vector.load %arg4[%c20, %c0_61] : memref<72x128xf32, #tpu.memory_space<vmem>>, vector<1x128xf32>
    %145 = vector.shape_cast %144 : vector<1x128xf32> to vector<128xf32>
    %146 = vector.shape_cast %145 : vector<128xf32> to vector<1x128xf32>
    %147 = vector.broadcast %146 : vector<1x128xf32> to vector<32x128xf32>
    %148 = arith.mulf %131, %147 : vector<32x128xf32>
    %149 = arith.addf %99, %148 : vector<32x128xf32>
    %c29 = arith.constant 29 : index
    %c0_62 = arith.constant 0 : index
    %150 = vector.load %arg4[%c29, %c0_62] : memref<72x128xf32, #tpu.memory_space<vmem>>, vector<1x128xf32>
    %151 = vector.shape_cast %150 : vector<1x128xf32> to vector<128xf32>
    %152 = vector.shape_cast %151 : vector<128xf32> to vector<1x128xf32>
    %153 = vector.broadcast %152 : vector<1x128xf32> to vector<32x128xf32>
    %154 = arith.mulf %131, %153 : vector<32x128xf32>
    %155 = arith.addf %105, %154 : vector<32x128xf32>
    %c38 = arith.constant 38 : index
    %c0_63 = arith.constant 0 : index
    %156 = vector.load %arg4[%c38, %c0_63] : memref<72x128xf32, #tpu.memory_space<vmem>>, vector<1x128xf32>
    %157 = vector.shape_cast %156 : vector<1x128xf32> to vector<128xf32>
    %158 = vector.shape_cast %157 : vector<128xf32> to vector<1x128xf32>
    %159 = vector.broadcast %158 : vector<1x128xf32> to vector<32x128xf32>
    %160 = arith.mulf %131, %159 : vector<32x128xf32>
    %161 = arith.addf %111, %160 : vector<32x128xf32>
    %c47 = arith.constant 47 : index
    %c0_64 = arith.constant 0 : index
    %162 = vector.load %arg4[%c47, %c0_64] : memref<72x128xf32, #tpu.memory_space<vmem>>, vector<1x128xf32>
    %163 = vector.shape_cast %162 : vector<1x128xf32> to vector<128xf32>
    %164 = vector.shape_cast %163 : vector<128xf32> to vector<1x128xf32>
    %165 = vector.broadcast %164 : vector<1x128xf32> to vector<32x128xf32>
    %166 = arith.mulf %131, %165 : vector<32x128xf32>
    %167 = arith.addf %117, %166 : vector<32x128xf32>
    %c56 = arith.constant 56 : index
    %c0_65 = arith.constant 0 : index
    %168 = vector.load %arg4[%c56, %c0_65] : memref<72x128xf32, #tpu.memory_space<vmem>>, vector<1x128xf32>
    %169 = vector.shape_cast %168 : vector<1x128xf32> to vector<128xf32>
    %170 = vector.shape_cast %169 : vector<128xf32> to vector<1x128xf32>
    %171 = vector.broadcast %170 : vector<1x128xf32> to vector<32x128xf32>
    %172 = arith.mulf %131, %171 : vector<32x128xf32>
    %173 = arith.addf %123, %172 : vector<32x128xf32>
    %c65 = arith.constant 65 : index
    %c0_66 = arith.constant 0 : index
    %174 = vector.load %arg4[%c65, %c0_66] : memref<72x128xf32, #tpu.memory_space<vmem>>, vector<1x128xf32>
    %175 = vector.shape_cast %174 : vector<1x128xf32> to vector<128xf32>
    %176 = vector.shape_cast %175 : vector<128xf32> to vector<1x128xf32>
    %177 = vector.broadcast %176 : vector<1x128xf32> to vector<32x128xf32>
    %178 = arith.mulf %131, %177 : vector<32x128xf32>
    %179 = arith.addf %129, %178 : vector<32x128xf32>
    %c0_67 = arith.constant 0 : index
    %c1_68 = arith.constant 1 : index
    %c0_69 = arith.constant 0 : index
    %180 = vector.load %arg7[%c0_67, %c1_68, %c0_69] : memref<3x34x128xf32, #tpu.memory_space<vmem>>, vector<1x32x128xf32>
    %181 = vector.shape_cast %180 : vector<1x32x128xf32> to vector<32x128xf32>
    %c3 = arith.constant 3 : index
    %c0_70 = arith.constant 0 : index
    %182 = vector.load %arg4[%c3, %c0_70] : memref<72x128xf32, #tpu.memory_space<vmem>>, vector<1x128xf32>
    %183 = vector.shape_cast %182 : vector<1x128xf32> to vector<128xf32>
    %184 = vector.shape_cast %183 : vector<128xf32> to vector<1x128xf32>
    %185 = vector.broadcast %184 : vector<1x128xf32> to vector<32x128xf32>
    %186 = arith.mulf %181, %185 : vector<32x128xf32>
    %187 = arith.addf %137, %186 : vector<32x128xf32>
    %c12 = arith.constant 12 : index
    %c0_71 = arith.constant 0 : index
    %188 = vector.load %arg4[%c12, %c0_71] : memref<72x128xf32, #tpu.memory_space<vmem>>, vector<1x128xf32>
    %189 = vector.shape_cast %188 : vector<1x128xf32> to vector<128xf32>
    %190 = vector.shape_cast %189 : vector<128xf32> to vector<1x128xf32>
    %191 = vector.broadcast %190 : vector<1x128xf32> to vector<32x128xf32>
    %192 = arith.mulf %181, %191 : vector<32x128xf32>
    %193 = arith.addf %143, %192 : vector<32x128xf32>
    %c21 = arith.constant 21 : index
    %c0_72 = arith.constant 0 : index
    %194 = vector.load %arg4[%c21, %c0_72] : memref<72x128xf32, #tpu.memory_space<vmem>>, vector<1x128xf32>
    %195 = vector.shape_cast %194 : vector<1x128xf32> to vector<128xf32>
    %196 = vector.shape_cast %195 : vector<128xf32> to vector<1x128xf32>
    %197 = vector.broadcast %196 : vector<1x128xf32> to vector<32x128xf32>
    %198 = arith.mulf %181, %197 : vector<32x128xf32>
    %199 = arith.addf %149, %198 : vector<32x128xf32>
    %c30 = arith.constant 30 : index
    %c0_73 = arith.constant 0 : index
    %200 = vector.load %arg4[%c30, %c0_73] : memref<72x128xf32, #tpu.memory_space<vmem>>, vector<1x128xf32>
    %201 = vector.shape_cast %200 : vector<1x128xf32> to vector<128xf32>
    %202 = vector.shape_cast %201 : vector<128xf32> to vector<1x128xf32>
    %203 = vector.broadcast %202 : vector<1x128xf32> to vector<32x128xf32>
    %204 = arith.mulf %181, %203 : vector<32x128xf32>
    %205 = arith.addf %155, %204 : vector<32x128xf32>
    %c39 = arith.constant 39 : index
    %c0_74 = arith.constant 0 : index
    %206 = vector.load %arg4[%c39, %c0_74] : memref<72x128xf32, #tpu.memory_space<vmem>>, vector<1x128xf32>
    %207 = vector.shape_cast %206 : vector<1x128xf32> to vector<128xf32>
    %208 = vector.shape_cast %207 : vector<128xf32> to vector<1x128xf32>
    %209 = vector.broadcast %208 : vector<1x128xf32> to vector<32x128xf32>
    %210 = arith.mulf %181, %209 : vector<32x128xf32>
    %211 = arith.addf %161, %210 : vector<32x128xf32>
    %c48 = arith.constant 48 : index
    %c0_75 = arith.constant 0 : index
    %212 = vector.load %arg4[%c48, %c0_75] : memref<72x128xf32, #tpu.memory_space<vmem>>, vector<1x128xf32>
    %213 = vector.shape_cast %212 : vector<1x128xf32> to vector<128xf32>
    %214 = vector.shape_cast %213 : vector<128xf32> to vector<1x128xf32>
    %215 = vector.broadcast %214 : vector<1x128xf32> to vector<32x128xf32>
    %216 = arith.mulf %181, %215 : vector<32x128xf32>
    %217 = arith.addf %167, %216 : vector<32x128xf32>
    %c57 = arith.constant 57 : index
    %c0_76 = arith.constant 0 : index
    %218 = vector.load %arg4[%c57, %c0_76] : memref<72x128xf32, #tpu.memory_space<vmem>>, vector<1x128xf32>
    %219 = vector.shape_cast %218 : vector<1x128xf32> to vector<128xf32>
    %220 = vector.shape_cast %219 : vector<128xf32> to vector<1x128xf32>
    %221 = vector.broadcast %220 : vector<1x128xf32> to vector<32x128xf32>
    %222 = arith.mulf %181, %221 : vector<32x128xf32>
    %223 = arith.addf %173, %222 : vector<32x128xf32>
    %c66 = arith.constant 66 : index
    %c0_77 = arith.constant 0 : index
    %224 = vector.load %arg4[%c66, %c0_77] : memref<72x128xf32, #tpu.memory_space<vmem>>, vector<1x128xf32>
    %225 = vector.shape_cast %224 : vector<1x128xf32> to vector<128xf32>
    %226 = vector.shape_cast %225 : vector<128xf32> to vector<1x128xf32>
    %227 = vector.broadcast %226 : vector<1x128xf32> to vector<32x128xf32>
    %228 = arith.mulf %181, %227 : vector<32x128xf32>
    %229 = arith.addf %179, %228 : vector<32x128xf32>
    %c1_78 = arith.constant 1 : index
    %c1_79 = arith.constant 1 : index
    %c0_80 = arith.constant 0 : index
    %230 = vector.load %arg7[%c1_78, %c1_79, %c0_80] : memref<3x34x128xf32, #tpu.memory_space<vmem>>, vector<1x32x128xf32>
    %231 = vector.shape_cast %230 : vector<1x32x128xf32> to vector<32x128xf32>
    %c4 = arith.constant 4 : index
    %c0_81 = arith.constant 0 : index
    %232 = vector.load %arg4[%c4, %c0_81] : memref<72x128xf32, #tpu.memory_space<vmem>>, vector<1x128xf32>
    %233 = vector.shape_cast %232 : vector<1x128xf32> to vector<128xf32>
    %234 = vector.shape_cast %233 : vector<128xf32> to vector<1x128xf32>
    %235 = vector.broadcast %234 : vector<1x128xf32> to vector<32x128xf32>
    %236 = arith.mulf %231, %235 : vector<32x128xf32>
    %237 = arith.addf %187, %236 : vector<32x128xf32>
    %c13 = arith.constant 13 : index
    %c0_82 = arith.constant 0 : index
    %238 = vector.load %arg4[%c13, %c0_82] : memref<72x128xf32, #tpu.memory_space<vmem>>, vector<1x128xf32>
    %239 = vector.shape_cast %238 : vector<1x128xf32> to vector<128xf32>
    %240 = vector.shape_cast %239 : vector<128xf32> to vector<1x128xf32>
    %241 = vector.broadcast %240 : vector<1x128xf32> to vector<32x128xf32>
    %242 = arith.mulf %231, %241 : vector<32x128xf32>
    %243 = arith.addf %193, %242 : vector<32x128xf32>
    %c22 = arith.constant 22 : index
    %c0_83 = arith.constant 0 : index
    %244 = vector.load %arg4[%c22, %c0_83] : memref<72x128xf32, #tpu.memory_space<vmem>>, vector<1x128xf32>
    %245 = vector.shape_cast %244 : vector<1x128xf32> to vector<128xf32>
    %246 = vector.shape_cast %245 : vector<128xf32> to vector<1x128xf32>
    %247 = vector.broadcast %246 : vector<1x128xf32> to vector<32x128xf32>
    %248 = arith.mulf %231, %247 : vector<32x128xf32>
    %249 = arith.addf %199, %248 : vector<32x128xf32>
    %c31 = arith.constant 31 : index
    %c0_84 = arith.constant 0 : index
    %250 = vector.load %arg4[%c31, %c0_84] : memref<72x128xf32, #tpu.memory_space<vmem>>, vector<1x128xf32>
    %251 = vector.shape_cast %250 : vector<1x128xf32> to vector<128xf32>
    %252 = vector.shape_cast %251 : vector<128xf32> to vector<1x128xf32>
    %253 = vector.broadcast %252 : vector<1x128xf32> to vector<32x128xf32>
    %254 = arith.mulf %231, %253 : vector<32x128xf32>
    %255 = arith.addf %205, %254 : vector<32x128xf32>
    %c40 = arith.constant 40 : index
    %c0_85 = arith.constant 0 : index
    %256 = vector.load %arg4[%c40, %c0_85] : memref<72x128xf32, #tpu.memory_space<vmem>>, vector<1x128xf32>
    %257 = vector.shape_cast %256 : vector<1x128xf32> to vector<128xf32>
    %258 = vector.shape_cast %257 : vector<128xf32> to vector<1x128xf32>
    %259 = vector.broadcast %258 : vector<1x128xf32> to vector<32x128xf32>
    %260 = arith.mulf %231, %259 : vector<32x128xf32>
    %261 = arith.addf %211, %260 : vector<32x128xf32>
    %c49 = arith.constant 49 : index
    %c0_86 = arith.constant 0 : index
    %262 = vector.load %arg4[%c49, %c0_86] : memref<72x128xf32, #tpu.memory_space<vmem>>, vector<1x128xf32>
    %263 = vector.shape_cast %262 : vector<1x128xf32> to vector<128xf32>
    %264 = vector.shape_cast %263 : vector<128xf32> to vector<1x128xf32>
    %265 = vector.broadcast %264 : vector<1x128xf32> to vector<32x128xf32>
    %266 = arith.mulf %231, %265 : vector<32x128xf32>
    %267 = arith.addf %217, %266 : vector<32x128xf32>
    %c58 = arith.constant 58 : index
    %c0_87 = arith.constant 0 : index
    %268 = vector.load %arg4[%c58, %c0_87] : memref<72x128xf32, #tpu.memory_space<vmem>>, vector<1x128xf32>
    %269 = vector.shape_cast %268 : vector<1x128xf32> to vector<128xf32>
    %270 = vector.shape_cast %269 : vector<128xf32> to vector<1x128xf32>
    %271 = vector.broadcast %270 : vector<1x128xf32> to vector<32x128xf32>
    %272 = arith.mulf %231, %271 : vector<32x128xf32>
    %273 = arith.addf %223, %272 : vector<32x128xf32>
    %c67 = arith.constant 67 : index
    %c0_88 = arith.constant 0 : index
    %274 = vector.load %arg4[%c67, %c0_88] : memref<72x128xf32, #tpu.memory_space<vmem>>, vector<1x128xf32>
    %275 = vector.shape_cast %274 : vector<1x128xf32> to vector<128xf32>
    %276 = vector.shape_cast %275 : vector<128xf32> to vector<1x128xf32>
    %277 = vector.broadcast %276 : vector<1x128xf32> to vector<32x128xf32>
    %278 = arith.mulf %231, %277 : vector<32x128xf32>
    %279 = arith.addf %229, %278 : vector<32x128xf32>
    %c2_89 = arith.constant 2 : index
    %c1_90 = arith.constant 1 : index
    %c0_91 = arith.constant 0 : index
    %280 = vector.load %arg7[%c2_89, %c1_90, %c0_91] : memref<3x34x128xf32, #tpu.memory_space<vmem>>, vector<1x32x128xf32>
    %281 = vector.shape_cast %280 : vector<1x32x128xf32> to vector<32x128xf32>
    %c5 = arith.constant 5 : index
    %c0_92 = arith.constant 0 : index
    %282 = vector.load %arg4[%c5, %c0_92] : memref<72x128xf32, #tpu.memory_space<vmem>>, vector<1x128xf32>
    %283 = vector.shape_cast %282 : vector<1x128xf32> to vector<128xf32>
    %284 = vector.shape_cast %283 : vector<128xf32> to vector<1x128xf32>
    %285 = vector.broadcast %284 : vector<1x128xf32> to vector<32x128xf32>
    %286 = arith.mulf %281, %285 : vector<32x128xf32>
    %287 = arith.addf %237, %286 : vector<32x128xf32>
    %c14 = arith.constant 14 : index
    %c0_93 = arith.constant 0 : index
    %288 = vector.load %arg4[%c14, %c0_93] : memref<72x128xf32, #tpu.memory_space<vmem>>, vector<1x128xf32>
    %289 = vector.shape_cast %288 : vector<1x128xf32> to vector<128xf32>
    %290 = vector.shape_cast %289 : vector<128xf32> to vector<1x128xf32>
    %291 = vector.broadcast %290 : vector<1x128xf32> to vector<32x128xf32>
    %292 = arith.mulf %281, %291 : vector<32x128xf32>
    %293 = arith.addf %243, %292 : vector<32x128xf32>
    %c23 = arith.constant 23 : index
    %c0_94 = arith.constant 0 : index
    %294 = vector.load %arg4[%c23, %c0_94] : memref<72x128xf32, #tpu.memory_space<vmem>>, vector<1x128xf32>
    %295 = vector.shape_cast %294 : vector<1x128xf32> to vector<128xf32>
    %296 = vector.shape_cast %295 : vector<128xf32> to vector<1x128xf32>
    %297 = vector.broadcast %296 : vector<1x128xf32> to vector<32x128xf32>
    %298 = arith.mulf %281, %297 : vector<32x128xf32>
    %299 = arith.addf %249, %298 : vector<32x128xf32>
    %c32 = arith.constant 32 : index
    %c0_95 = arith.constant 0 : index
    %300 = vector.load %arg4[%c32, %c0_95] : memref<72x128xf32, #tpu.memory_space<vmem>>, vector<1x128xf32>
    %301 = vector.shape_cast %300 : vector<1x128xf32> to vector<128xf32>
    %302 = vector.shape_cast %301 : vector<128xf32> to vector<1x128xf32>
    %303 = vector.broadcast %302 : vector<1x128xf32> to vector<32x128xf32>
    %304 = arith.mulf %281, %303 : vector<32x128xf32>
    %305 = arith.addf %255, %304 : vector<32x128xf32>
    %c41 = arith.constant 41 : index
    %c0_96 = arith.constant 0 : index
    %306 = vector.load %arg4[%c41, %c0_96] : memref<72x128xf32, #tpu.memory_space<vmem>>, vector<1x128xf32>
    %307 = vector.shape_cast %306 : vector<1x128xf32> to vector<128xf32>
    %308 = vector.shape_cast %307 : vector<128xf32> to vector<1x128xf32>
    %309 = vector.broadcast %308 : vector<1x128xf32> to vector<32x128xf32>
    %310 = arith.mulf %281, %309 : vector<32x128xf32>
    %311 = arith.addf %261, %310 : vector<32x128xf32>
    %c50 = arith.constant 50 : index
    %c0_97 = arith.constant 0 : index
    %312 = vector.load %arg4[%c50, %c0_97] : memref<72x128xf32, #tpu.memory_space<vmem>>, vector<1x128xf32>
    %313 = vector.shape_cast %312 : vector<1x128xf32> to vector<128xf32>
    %314 = vector.shape_cast %313 : vector<128xf32> to vector<1x128xf32>
    %315 = vector.broadcast %314 : vector<1x128xf32> to vector<32x128xf32>
    %316 = arith.mulf %281, %315 : vector<32x128xf32>
    %317 = arith.addf %267, %316 : vector<32x128xf32>
    %c59 = arith.constant 59 : index
    %c0_98 = arith.constant 0 : index
    %318 = vector.load %arg4[%c59, %c0_98] : memref<72x128xf32, #tpu.memory_space<vmem>>, vector<1x128xf32>
    %319 = vector.shape_cast %318 : vector<1x128xf32> to vector<128xf32>
    %320 = vector.shape_cast %319 : vector<128xf32> to vector<1x128xf32>
    %321 = vector.broadcast %320 : vector<1x128xf32> to vector<32x128xf32>
    %322 = arith.mulf %281, %321 : vector<32x128xf32>
    %323 = arith.addf %273, %322 : vector<32x128xf32>
    %c68 = arith.constant 68 : index
    %c0_99 = arith.constant 0 : index
    %324 = vector.load %arg4[%c68, %c0_99] : memref<72x128xf32, #tpu.memory_space<vmem>>, vector<1x128xf32>
    %325 = vector.shape_cast %324 : vector<1x128xf32> to vector<128xf32>
    %326 = vector.shape_cast %325 : vector<128xf32> to vector<1x128xf32>
    %327 = vector.broadcast %326 : vector<1x128xf32> to vector<32x128xf32>
    %328 = arith.mulf %281, %327 : vector<32x128xf32>
    %329 = arith.addf %279, %328 : vector<32x128xf32>
    %c0_100 = arith.constant 0 : index
    %c2_101 = arith.constant 2 : index
    %c0_102 = arith.constant 0 : index
    %330 = vector.load %arg7[%c0_100, %c2_101, %c0_102] : memref<3x34x128xf32, #tpu.memory_space<vmem>>, vector<1x32x128xf32>
    %331 = vector.shape_cast %330 : vector<1x32x128xf32> to vector<32x128xf32>
    %c6 = arith.constant 6 : index
    %c0_103 = arith.constant 0 : index
    %332 = vector.load %arg4[%c6, %c0_103] : memref<72x128xf32, #tpu.memory_space<vmem>>, vector<1x128xf32>
    %333 = vector.shape_cast %332 : vector<1x128xf32> to vector<128xf32>
    %334 = vector.shape_cast %333 : vector<128xf32> to vector<1x128xf32>
    %335 = vector.broadcast %334 : vector<1x128xf32> to vector<32x128xf32>
    %336 = arith.mulf %331, %335 : vector<32x128xf32>
    %337 = arith.addf %287, %336 : vector<32x128xf32>
    %c15 = arith.constant 15 : index
    %c0_104 = arith.constant 0 : index
    %338 = vector.load %arg4[%c15, %c0_104] : memref<72x128xf32, #tpu.memory_space<vmem>>, vector<1x128xf32>
    %339 = vector.shape_cast %338 : vector<1x128xf32> to vector<128xf32>
    %340 = vector.shape_cast %339 : vector<128xf32> to vector<1x128xf32>
    %341 = vector.broadcast %340 : vector<1x128xf32> to vector<32x128xf32>
    %342 = arith.mulf %331, %341 : vector<32x128xf32>
    %343 = arith.addf %293, %342 : vector<32x128xf32>
    %c24 = arith.constant 24 : index
    %c0_105 = arith.constant 0 : index
    %344 = vector.load %arg4[%c24, %c0_105] : memref<72x128xf32, #tpu.memory_space<vmem>>, vector<1x128xf32>
    %345 = vector.shape_cast %344 : vector<1x128xf32> to vector<128xf32>
    %346 = vector.shape_cast %345 : vector<128xf32> to vector<1x128xf32>
    %347 = vector.broadcast %346 : vector<1x128xf32> to vector<32x128xf32>
    %348 = arith.mulf %331, %347 : vector<32x128xf32>
    %349 = arith.addf %299, %348 : vector<32x128xf32>
    %c33 = arith.constant 33 : index
    %c0_106 = arith.constant 0 : index
    %350 = vector.load %arg4[%c33, %c0_106] : memref<72x128xf32, #tpu.memory_space<vmem>>, vector<1x128xf32>
    %351 = vector.shape_cast %350 : vector<1x128xf32> to vector<128xf32>
    %352 = vector.shape_cast %351 : vector<128xf32> to vector<1x128xf32>
    %353 = vector.broadcast %352 : vector<1x128xf32> to vector<32x128xf32>
    %354 = arith.mulf %331, %353 : vector<32x128xf32>
    %355 = arith.addf %305, %354 : vector<32x128xf32>
    %c42 = arith.constant 42 : index
    %c0_107 = arith.constant 0 : index
    %356 = vector.load %arg4[%c42, %c0_107] : memref<72x128xf32, #tpu.memory_space<vmem>>, vector<1x128xf32>
    %357 = vector.shape_cast %356 : vector<1x128xf32> to vector<128xf32>
    %358 = vector.shape_cast %357 : vector<128xf32> to vector<1x128xf32>
    %359 = vector.broadcast %358 : vector<1x128xf32> to vector<32x128xf32>
    %360 = arith.mulf %331, %359 : vector<32x128xf32>
    %361 = arith.addf %311, %360 : vector<32x128xf32>
    %c51 = arith.constant 51 : index
    %c0_108 = arith.constant 0 : index
    %362 = vector.load %arg4[%c51, %c0_108] : memref<72x128xf32, #tpu.memory_space<vmem>>, vector<1x128xf32>
    %363 = vector.shape_cast %362 : vector<1x128xf32> to vector<128xf32>
    %364 = vector.shape_cast %363 : vector<128xf32> to vector<1x128xf32>
    %365 = vector.broadcast %364 : vector<1x128xf32> to vector<32x128xf32>
    %366 = arith.mulf %331, %365 : vector<32x128xf32>
    %367 = arith.addf %317, %366 : vector<32x128xf32>
    %c60 = arith.constant 60 : index
    %c0_109 = arith.constant 0 : index
    %368 = vector.load %arg4[%c60, %c0_109] : memref<72x128xf32, #tpu.memory_space<vmem>>, vector<1x128xf32>
    %369 = vector.shape_cast %368 : vector<1x128xf32> to vector<128xf32>
    %370 = vector.shape_cast %369 : vector<128xf32> to vector<1x128xf32>
    %371 = vector.broadcast %370 : vector<1x128xf32> to vector<32x128xf32>
    %372 = arith.mulf %331, %371 : vector<32x128xf32>
    %373 = arith.addf %323, %372 : vector<32x128xf32>
    %c69 = arith.constant 69 : index
    %c0_110 = arith.constant 0 : index
    %374 = vector.load %arg4[%c69, %c0_110] : memref<72x128xf32, #tpu.memory_space<vmem>>, vector<1x128xf32>
    %375 = vector.shape_cast %374 : vector<1x128xf32> to vector<128xf32>
    %376 = vector.shape_cast %375 : vector<128xf32> to vector<1x128xf32>
    %377 = vector.broadcast %376 : vector<1x128xf32> to vector<32x128xf32>
    %378 = arith.mulf %331, %377 : vector<32x128xf32>
    %379 = arith.addf %329, %378 : vector<32x128xf32>
    %c1_111 = arith.constant 1 : index
    %c2_112 = arith.constant 2 : index
    %c0_113 = arith.constant 0 : index
    %380 = vector.load %arg7[%c1_111, %c2_112, %c0_113] : memref<3x34x128xf32, #tpu.memory_space<vmem>>, vector<1x32x128xf32>
    %381 = vector.shape_cast %380 : vector<1x32x128xf32> to vector<32x128xf32>
    %c7 = arith.constant 7 : index
    %c0_114 = arith.constant 0 : index
    %382 = vector.load %arg4[%c7, %c0_114] : memref<72x128xf32, #tpu.memory_space<vmem>>, vector<1x128xf32>
    %383 = vector.shape_cast %382 : vector<1x128xf32> to vector<128xf32>
    %384 = vector.shape_cast %383 : vector<128xf32> to vector<1x128xf32>
    %385 = vector.broadcast %384 : vector<1x128xf32> to vector<32x128xf32>
    %386 = arith.mulf %381, %385 : vector<32x128xf32>
    %387 = arith.addf %337, %386 : vector<32x128xf32>
    %c16 = arith.constant 16 : index
    %c0_115 = arith.constant 0 : index
    %388 = vector.load %arg4[%c16, %c0_115] : memref<72x128xf32, #tpu.memory_space<vmem>>, vector<1x128xf32>
    %389 = vector.shape_cast %388 : vector<1x128xf32> to vector<128xf32>
    %390 = vector.shape_cast %389 : vector<128xf32> to vector<1x128xf32>
    %391 = vector.broadcast %390 : vector<1x128xf32> to vector<32x128xf32>
    %392 = arith.mulf %381, %391 : vector<32x128xf32>
    %393 = arith.addf %343, %392 : vector<32x128xf32>
    %c25 = arith.constant 25 : index
    %c0_116 = arith.constant 0 : index
    %394 = vector.load %arg4[%c25, %c0_116] : memref<72x128xf32, #tpu.memory_space<vmem>>, vector<1x128xf32>
    %395 = vector.shape_cast %394 : vector<1x128xf32> to vector<128xf32>
    %396 = vector.shape_cast %395 : vector<128xf32> to vector<1x128xf32>
    %397 = vector.broadcast %396 : vector<1x128xf32> to vector<32x128xf32>
    %398 = arith.mulf %381, %397 : vector<32x128xf32>
    %399 = arith.addf %349, %398 : vector<32x128xf32>
    %c34 = arith.constant 34 : index
    %c0_117 = arith.constant 0 : index
    %400 = vector.load %arg4[%c34, %c0_117] : memref<72x128xf32, #tpu.memory_space<vmem>>, vector<1x128xf32>
    %401 = vector.shape_cast %400 : vector<1x128xf32> to vector<128xf32>
    %402 = vector.shape_cast %401 : vector<128xf32> to vector<1x128xf32>
    %403 = vector.broadcast %402 : vector<1x128xf32> to vector<32x128xf32>
    %404 = arith.mulf %381, %403 : vector<32x128xf32>
    %405 = arith.addf %355, %404 : vector<32x128xf32>
    %c43 = arith.constant 43 : index
    %c0_118 = arith.constant 0 : index
    %406 = vector.load %arg4[%c43, %c0_118] : memref<72x128xf32, #tpu.memory_space<vmem>>, vector<1x128xf32>
    %407 = vector.shape_cast %406 : vector<1x128xf32> to vector<128xf32>
    %408 = vector.shape_cast %407 : vector<128xf32> to vector<1x128xf32>
    %409 = vector.broadcast %408 : vector<1x128xf32> to vector<32x128xf32>
    %410 = arith.mulf %381, %409 : vector<32x128xf32>
    %411 = arith.addf %361, %410 : vector<32x128xf32>
    %c52 = arith.constant 52 : index
    %c0_119 = arith.constant 0 : index
    %412 = vector.load %arg4[%c52, %c0_119] : memref<72x128xf32, #tpu.memory_space<vmem>>, vector<1x128xf32>
    %413 = vector.shape_cast %412 : vector<1x128xf32> to vector<128xf32>
    %414 = vector.shape_cast %413 : vector<128xf32> to vector<1x128xf32>
    %415 = vector.broadcast %414 : vector<1x128xf32> to vector<32x128xf32>
    %416 = arith.mulf %381, %415 : vector<32x128xf32>
    %417 = arith.addf %367, %416 : vector<32x128xf32>
    %c61 = arith.constant 61 : index
    %c0_120 = arith.constant 0 : index
    %418 = vector.load %arg4[%c61, %c0_120] : memref<72x128xf32, #tpu.memory_space<vmem>>, vector<1x128xf32>
    %419 = vector.shape_cast %418 : vector<1x128xf32> to vector<128xf32>
    %420 = vector.shape_cast %419 : vector<128xf32> to vector<1x128xf32>
    %421 = vector.broadcast %420 : vector<1x128xf32> to vector<32x128xf32>
    %422 = arith.mulf %381, %421 : vector<32x128xf32>
    %423 = arith.addf %373, %422 : vector<32x128xf32>
    %c70 = arith.constant 70 : index
    %c0_121 = arith.constant 0 : index
    %424 = vector.load %arg4[%c70, %c0_121] : memref<72x128xf32, #tpu.memory_space<vmem>>, vector<1x128xf32>
    %425 = vector.shape_cast %424 : vector<1x128xf32> to vector<128xf32>
    %426 = vector.shape_cast %425 : vector<128xf32> to vector<1x128xf32>
    %427 = vector.broadcast %426 : vector<1x128xf32> to vector<32x128xf32>
    %428 = arith.mulf %381, %427 : vector<32x128xf32>
    %429 = arith.addf %379, %428 : vector<32x128xf32>
    %c2_122 = arith.constant 2 : index
    %c2_123 = arith.constant 2 : index
    %c0_124 = arith.constant 0 : index
    %430 = vector.load %arg7[%c2_122, %c2_123, %c0_124] : memref<3x34x128xf32, #tpu.memory_space<vmem>>, vector<1x32x128xf32>
    %431 = vector.shape_cast %430 : vector<1x32x128xf32> to vector<32x128xf32>
    %c8 = arith.constant 8 : index
    %c0_125 = arith.constant 0 : index
    %432 = vector.load %arg4[%c8, %c0_125] : memref<72x128xf32, #tpu.memory_space<vmem>>, vector<1x128xf32>
    %433 = vector.shape_cast %432 : vector<1x128xf32> to vector<128xf32>
    %434 = vector.shape_cast %433 : vector<128xf32> to vector<1x128xf32>
    %435 = vector.broadcast %434 : vector<1x128xf32> to vector<32x128xf32>
    %436 = arith.mulf %431, %435 : vector<32x128xf32>
    %437 = arith.addf %387, %436 : vector<32x128xf32>
    %c17 = arith.constant 17 : index
    %c0_126 = arith.constant 0 : index
    %438 = vector.load %arg4[%c17, %c0_126] : memref<72x128xf32, #tpu.memory_space<vmem>>, vector<1x128xf32>
    %439 = vector.shape_cast %438 : vector<1x128xf32> to vector<128xf32>
    %440 = vector.shape_cast %439 : vector<128xf32> to vector<1x128xf32>
    %441 = vector.broadcast %440 : vector<1x128xf32> to vector<32x128xf32>
    %442 = arith.mulf %431, %441 : vector<32x128xf32>
    %443 = arith.addf %393, %442 : vector<32x128xf32>
    %c26 = arith.constant 26 : index
    %c0_127 = arith.constant 0 : index
    %444 = vector.load %arg4[%c26, %c0_127] : memref<72x128xf32, #tpu.memory_space<vmem>>, vector<1x128xf32>
    %445 = vector.shape_cast %444 : vector<1x128xf32> to vector<128xf32>
    %446 = vector.shape_cast %445 : vector<128xf32> to vector<1x128xf32>
    %447 = vector.broadcast %446 : vector<1x128xf32> to vector<32x128xf32>
    %448 = arith.mulf %431, %447 : vector<32x128xf32>
    %449 = arith.addf %399, %448 : vector<32x128xf32>
    %c35 = arith.constant 35 : index
    %c0_128 = arith.constant 0 : index
    %450 = vector.load %arg4[%c35, %c0_128] : memref<72x128xf32, #tpu.memory_space<vmem>>, vector<1x128xf32>
    %451 = vector.shape_cast %450 : vector<1x128xf32> to vector<128xf32>
    %452 = vector.shape_cast %451 : vector<128xf32> to vector<1x128xf32>
    %453 = vector.broadcast %452 : vector<1x128xf32> to vector<32x128xf32>
    %454 = arith.mulf %431, %453 : vector<32x128xf32>
    %455 = arith.addf %405, %454 : vector<32x128xf32>
    %c44 = arith.constant 44 : index
    %c0_129 = arith.constant 0 : index
    %456 = vector.load %arg4[%c44, %c0_129] : memref<72x128xf32, #tpu.memory_space<vmem>>, vector<1x128xf32>
    %457 = vector.shape_cast %456 : vector<1x128xf32> to vector<128xf32>
    %458 = vector.shape_cast %457 : vector<128xf32> to vector<1x128xf32>
    %459 = vector.broadcast %458 : vector<1x128xf32> to vector<32x128xf32>
    %460 = arith.mulf %431, %459 : vector<32x128xf32>
    %461 = arith.addf %411, %460 : vector<32x128xf32>
    %c53 = arith.constant 53 : index
    %c0_130 = arith.constant 0 : index
    %462 = vector.load %arg4[%c53, %c0_130] : memref<72x128xf32, #tpu.memory_space<vmem>>, vector<1x128xf32>
    %463 = vector.shape_cast %462 : vector<1x128xf32> to vector<128xf32>
    %464 = vector.shape_cast %463 : vector<128xf32> to vector<1x128xf32>
    %465 = vector.broadcast %464 : vector<1x128xf32> to vector<32x128xf32>
    %466 = arith.mulf %431, %465 : vector<32x128xf32>
    %467 = arith.addf %417, %466 : vector<32x128xf32>
    %c62 = arith.constant 62 : index
    %c0_131 = arith.constant 0 : index
    %468 = vector.load %arg4[%c62, %c0_131] : memref<72x128xf32, #tpu.memory_space<vmem>>, vector<1x128xf32>
    %469 = vector.shape_cast %468 : vector<1x128xf32> to vector<128xf32>
    %470 = vector.shape_cast %469 : vector<128xf32> to vector<1x128xf32>
    %471 = vector.broadcast %470 : vector<1x128xf32> to vector<32x128xf32>
    %472 = arith.mulf %431, %471 : vector<32x128xf32>
    %473 = arith.addf %423, %472 : vector<32x128xf32>
    %c71 = arith.constant 71 : index
    %c0_132 = arith.constant 0 : index
    %474 = vector.load %arg4[%c71, %c0_132] : memref<72x128xf32, #tpu.memory_space<vmem>>, vector<1x128xf32>
    %475 = vector.shape_cast %474 : vector<1x128xf32> to vector<128xf32>
    %476 = vector.shape_cast %475 : vector<128xf32> to vector<1x128xf32>
    %477 = vector.broadcast %476 : vector<1x128xf32> to vector<32x128xf32>
    %478 = arith.mulf %431, %477 : vector<32x128xf32>
    %479 = arith.addf %429, %478 : vector<32x128xf32>
    %c64_i32 = arith.constant 64 : i32
    %480 = tpu.dynamic_rotate %437 by %c64_i32 dim 1 : vector<32x128xf32>, i32 -> vector<32x128xf32>
    %481 = arith.addf %437, %480 : vector<32x128xf32>
    %c96_i32 = arith.constant 96 : i32
    %482 = tpu.dynamic_rotate %481 by %c96_i32 dim 1 : vector<32x128xf32>, i32 -> vector<32x128xf32>
    %483 = arith.addf %481, %482 : vector<32x128xf32>
    %484 = vector.extract_strided_slice %483 {offsets = [0, 0], sizes = [32, 32], strides = [1, 1]} : vector<32x128xf32> to vector<32x32xf32>
    %c0_133 = arith.constant 0 : index
    %485 = memref.load %arg5[%c0_133] : memref<8xf32, #tpu.memory_space<smem>>
    %486 = vector.broadcast %485 : f32 to vector<32x32xf32>
    %487 = arith.addf %484, %486 : vector<32x32xf32>
    %c64_i32_134 = arith.constant 64 : i32
    %488 = tpu.dynamic_rotate %443 by %c64_i32_134 dim 1 : vector<32x128xf32>, i32 -> vector<32x128xf32>
    %489 = arith.addf %443, %488 : vector<32x128xf32>
    %c96_i32_135 = arith.constant 96 : i32
    %490 = tpu.dynamic_rotate %489 by %c96_i32_135 dim 1 : vector<32x128xf32>, i32 -> vector<32x128xf32>
    %491 = arith.addf %489, %490 : vector<32x128xf32>
    %492 = vector.extract_strided_slice %491 {offsets = [0, 0], sizes = [32, 32], strides = [1, 1]} : vector<32x128xf32> to vector<32x32xf32>
    %c1_136 = arith.constant 1 : index
    %493 = memref.load %arg5[%c1_136] : memref<8xf32, #tpu.memory_space<smem>>
    %494 = vector.broadcast %493 : f32 to vector<32x32xf32>
    %495 = arith.addf %492, %494 : vector<32x32xf32>
    %c64_i32_137 = arith.constant 64 : i32
    %496 = tpu.dynamic_rotate %449 by %c64_i32_137 dim 1 : vector<32x128xf32>, i32 -> vector<32x128xf32>
    %497 = arith.addf %449, %496 : vector<32x128xf32>
    %c96_i32_138 = arith.constant 96 : i32
    %498 = tpu.dynamic_rotate %497 by %c96_i32_138 dim 1 : vector<32x128xf32>, i32 -> vector<32x128xf32>
    %499 = arith.addf %497, %498 : vector<32x128xf32>
    %500 = vector.extract_strided_slice %499 {offsets = [0, 0], sizes = [32, 32], strides = [1, 1]} : vector<32x128xf32> to vector<32x32xf32>
    %c2_139 = arith.constant 2 : index
    %501 = memref.load %arg5[%c2_139] : memref<8xf32, #tpu.memory_space<smem>>
    %502 = vector.broadcast %501 : f32 to vector<32x32xf32>
    %503 = arith.addf %500, %502 : vector<32x32xf32>
    %c64_i32_140 = arith.constant 64 : i32
    %504 = tpu.dynamic_rotate %455 by %c64_i32_140 dim 1 : vector<32x128xf32>, i32 -> vector<32x128xf32>
    %505 = arith.addf %455, %504 : vector<32x128xf32>
    %c96_i32_141 = arith.constant 96 : i32
    %506 = tpu.dynamic_rotate %505 by %c96_i32_141 dim 1 : vector<32x128xf32>, i32 -> vector<32x128xf32>
    %507 = arith.addf %505, %506 : vector<32x128xf32>
    %508 = vector.extract_strided_slice %507 {offsets = [0, 0], sizes = [32, 32], strides = [1, 1]} : vector<32x128xf32> to vector<32x32xf32>
    %c3_142 = arith.constant 3 : index
    %509 = memref.load %arg5[%c3_142] : memref<8xf32, #tpu.memory_space<smem>>
    %510 = vector.broadcast %509 : f32 to vector<32x32xf32>
    %511 = arith.addf %508, %510 : vector<32x32xf32>
    %c64_i32_143 = arith.constant 64 : i32
    %512 = tpu.dynamic_rotate %461 by %c64_i32_143 dim 1 : vector<32x128xf32>, i32 -> vector<32x128xf32>
    %513 = arith.addf %461, %512 : vector<32x128xf32>
    %c96_i32_144 = arith.constant 96 : i32
    %514 = tpu.dynamic_rotate %513 by %c96_i32_144 dim 1 : vector<32x128xf32>, i32 -> vector<32x128xf32>
    %515 = arith.addf %513, %514 : vector<32x128xf32>
    %516 = vector.extract_strided_slice %515 {offsets = [0, 0], sizes = [32, 32], strides = [1, 1]} : vector<32x128xf32> to vector<32x32xf32>
    %c4_145 = arith.constant 4 : index
    %517 = memref.load %arg5[%c4_145] : memref<8xf32, #tpu.memory_space<smem>>
    %518 = vector.broadcast %517 : f32 to vector<32x32xf32>
    %519 = arith.addf %516, %518 : vector<32x32xf32>
    %c64_i32_146 = arith.constant 64 : i32
    %520 = tpu.dynamic_rotate %467 by %c64_i32_146 dim 1 : vector<32x128xf32>, i32 -> vector<32x128xf32>
    %521 = arith.addf %467, %520 : vector<32x128xf32>
    %c96_i32_147 = arith.constant 96 : i32
    %522 = tpu.dynamic_rotate %521 by %c96_i32_147 dim 1 : vector<32x128xf32>, i32 -> vector<32x128xf32>
    %523 = arith.addf %521, %522 : vector<32x128xf32>
    %524 = vector.extract_strided_slice %523 {offsets = [0, 0], sizes = [32, 32], strides = [1, 1]} : vector<32x128xf32> to vector<32x32xf32>
    %c5_148 = arith.constant 5 : index
    %525 = memref.load %arg5[%c5_148] : memref<8xf32, #tpu.memory_space<smem>>
    %526 = vector.broadcast %525 : f32 to vector<32x32xf32>
    %527 = arith.addf %524, %526 : vector<32x32xf32>
    %c64_i32_149 = arith.constant 64 : i32
    %528 = tpu.dynamic_rotate %473 by %c64_i32_149 dim 1 : vector<32x128xf32>, i32 -> vector<32x128xf32>
    %529 = arith.addf %473, %528 : vector<32x128xf32>
    %c96_i32_150 = arith.constant 96 : i32
    %530 = tpu.dynamic_rotate %529 by %c96_i32_150 dim 1 : vector<32x128xf32>, i32 -> vector<32x128xf32>
    %531 = arith.addf %529, %530 : vector<32x128xf32>
    %532 = vector.extract_strided_slice %531 {offsets = [0, 0], sizes = [32, 32], strides = [1, 1]} : vector<32x128xf32> to vector<32x32xf32>
    %c6_151 = arith.constant 6 : index
    %533 = memref.load %arg5[%c6_151] : memref<8xf32, #tpu.memory_space<smem>>
    %534 = vector.broadcast %533 : f32 to vector<32x32xf32>
    %535 = arith.addf %532, %534 : vector<32x32xf32>
    %c64_i32_152 = arith.constant 64 : i32
    %536 = tpu.dynamic_rotate %479 by %c64_i32_152 dim 1 : vector<32x128xf32>, i32 -> vector<32x128xf32>
    %537 = arith.addf %479, %536 : vector<32x128xf32>
    %c96_i32_153 = arith.constant 96 : i32
    %538 = tpu.dynamic_rotate %537 by %c96_i32_153 dim 1 : vector<32x128xf32>, i32 -> vector<32x128xf32>
    %539 = arith.addf %537, %538 : vector<32x128xf32>
    %540 = vector.extract_strided_slice %539 {offsets = [0, 0], sizes = [32, 32], strides = [1, 1]} : vector<32x128xf32> to vector<32x32xf32>
    %c7_154 = arith.constant 7 : index
    %541 = memref.load %arg5[%c7_154] : memref<8xf32, #tpu.memory_space<smem>>
    %542 = vector.broadcast %541 : f32 to vector<32x32xf32>
    %543 = arith.addf %540, %542 : vector<32x32xf32>
    %544 = vector.shape_cast %487 : vector<32x32xf32> to vector<1x32x32xf32>
    %545 = vector.shape_cast %495 : vector<32x32xf32> to vector<1x32x32xf32>
    %546 = vector.shape_cast %503 : vector<32x32xf32> to vector<1x32x32xf32>
    %547 = vector.shape_cast %511 : vector<32x32xf32> to vector<1x32x32xf32>
    %548 = vector.shape_cast %519 : vector<32x32xf32> to vector<1x32x32xf32>
    %549 = vector.shape_cast %527 : vector<32x32xf32> to vector<1x32x32xf32>
    %550 = vector.shape_cast %535 : vector<32x32xf32> to vector<1x32x32xf32>
    %551 = vector.shape_cast %543 : vector<32x32xf32> to vector<1x32x32xf32>
    %552 = tpu.concatenate %544, %545, %546, %547, %548, %549, %550, %551 in 0 : vector<1x32x32xf32>, vector<1x32x32xf32>, vector<1x32x32xf32>, vector<1x32x32xf32>, vector<1x32x32xf32>, vector<1x32x32xf32>, vector<1x32x32xf32>, vector<1x32x32xf32> -> vector<8x32x32xf32>
    %cst_155 = arith.constant 0.000000e+00 : f32
    %553 = vector.broadcast %cst_155 : f32 to vector<8x32x32xf32>
    %554 = arith.cmpf oge, %552, %553 : vector<8x32x32xf32>
    %cst_156 = arith.constant 2.000000e-01 : f32
    %555 = vector.broadcast %cst_156 : f32 to vector<8x32x32xf32>
    %556 = arith.mulf %555, %552 : vector<8x32x32xf32>
    %557 = arith.select %554, %552, %556 : vector<8x32x32xi1>, vector<8x32x32xf32>
    %c0_157 = arith.constant 0 : index
    %c0_158 = arith.constant 0 : index
    %c0_159 = arith.constant 0 : index
    %c0_160 = arith.constant 0 : index
    %558 = vector.load %arg6[%c0_157, %c0_158, %c0_159, %c0_160] : memref<1x8x32x32xf32, #tpu.memory_space<vmem>>, vector<1x8x32x32xf32>
    %559 = vector.shape_cast %558 : vector<1x8x32x32xf32> to vector<8x32x32xf32>
    %560 = vector.shape_cast %557 : vector<8x32x32xf32> to vector<1x8x32x32xf32>
    tpu.vector_store %arg6[%c0_157, %c0_158, %c0_159, %c0_160], %560 {strides = array<i32>} : memref<1x8x32x32xf32, #tpu.memory_space<vmem>>, vector<1x8x32x32xf32>,
    return
  }
  func.func @transform_0(%arg0: i32) -> (i32, i32, i32) {
    %c0_i32 = arith.constant 0 : i32
    %c0_i32_0 = arith.constant 0 : i32
    %c0_i32_1 = arith.constant 0 : i32
    return %arg0, %c0_i32, %c0_i32_0 : i32, i32, i32
  }
  func.func @transform_1(%arg0: i32) -> (i32, i32) {
    %c0_i32 = arith.constant 0 : i32
    %c0_i32_0 = arith.constant 0 : i32
    %c0_i32_1 = arith.constant 0 : i32
    return %c0_i32, %c0_i32_0 : i32, i32
  }
  func.func @transform_2(%arg0: i32) -> (i32, i32, i32) {
    %c0_i32 = arith.constant 0 : i32
    %c0_i32_0 = arith.constant 0 : i32
    %c0_i32_1 = arith.constant 0 : i32
    %c0_i32_2 = arith.constant 0 : i32
    return %c0_i32, %c0_i32_0, %c0_i32_1 : i32, i32, i32
  }
  func.func @transform_3(%arg0: i32) -> (i32, i32) {
    %c0_i32 = arith.constant 0 : i32
    %c0_i32_0 = arith.constant 0 : i32
    %c0_i32_1 = arith.constant 0 : i32
    return %c0_i32, %c0_i32_0 : i32, i32
  }
  func.func @transform_4(%arg0: i32) -> i32 {
    %c0_i32 = arith.constant 0 : i32
    %c0_i32_0 = arith.constant 0 : i32
    return %c0_i32 : i32
  }
  func.func @transform_5(%arg0: i32) -> (i32, i32, i32, i32) {
    %c0_i32 = arith.constant 0 : i32
    %c0_i32_0 = arith.constant 0 : i32
    %c0_i32_1 = arith.constant 0 : i32
    %c0_i32_2 = arith.constant 0 : i32
    return %arg0, %c0_i32, %c0_i32_0, %c0_i32_1 : i32, i32, i32, i32
  }
}

</mosaic_0001>

<bundles_post_ra>
// kernel: tpu_custom_call.1
= control target key start
LH: loop header
LB: loop body
LE: loop exit
PB: predicated region body
PF: predicated region fallthrough
CT: control target
= control target key end

     0   :  { %s4374_s0 = inlined_call_operand.vmem [shape: f32[2,16,64], index: 0, kind: input, shape index: {}]   ;;  %s4375_s1 = inlined_call_operand.vmem [shape: f32[34,16], index: 1, kind: input, shape index: {}]   ;;  %s4376_s2 = inlined_call_operand.hbm [shape: f32[3,64,128], index: 2, kind: input, shape index: {}]   ;;  %s4377_s3 = inlined_call_operand.hbm [shape: f32[72,128], index: 3, kind: input, shape index: {}]   ;;  %s4378_s4 = inlined_call_operand.vmem [shape: f32[8], index: 4, kind: input, shape index: {}]   ;;  %s4379_s5 = inlined_call_operand.hbm [shape: f32[2,8,32,32], index: 5, kind: output, shape index: {}]  }
   0x1   :  { %4512 = sst [smem:[#allocation91_spill]] %s4378_s4 }
   0x2   :  { %10 = vsyncpa [#allocation4], 0 }
   0x3   :  { %11 = vsyncpa [#allocation8], 0 }
   0x4   :  { %12 = vsyncpa [#allocation6], 0 }
   0x5   :  { %13 = vsyncpa [#allocation5], 0 }
   0x6   :  { %15 = vsyncpa [#allocation5 + $0x1], 0  ;;  %s2767_s18 = smov 0   ;;  %s2769_s19 = smov 0  }
   0x7   :  { %s2771_s20 = smov 0   ;;  %s2773_s21 = smov 0  }
   0x8 LB: > { %s2788_s22 = sadd.s32 4294967295, %s2722_s21   ;;  %s2160_s23 = sadd.s32 4294967294, %s2722_s21   ;;  %s2722_s21 = sphi %s2773_s21, %s4716_s21   ;;  %s2718_s20 = sphi %s2771_s20, %s4715_s20   ;;  %s2714_s19 = sphi %s2769_s19, %s4714_s19   ;;  %s2710_s18 = sphi %s2767_s18, %s4713_s18  }
   0x9   : > { %s2792_s24 = sadd.s32 1, %s2722_s21   ;;  %s138_s25 = sadd.s32 1, %s2718_s20 }
   0xa   : > { %s135_s26 = ssub.s32 %s2722_s21, %s2792_s24  ;;  %p148_p0 = scmp.ne.s32.totalorder %s2718_s20, %s2714_s19 }
   0xb   : > { %p136_p1 = scmp.eq.s32.totalorder %s135_s26, 0  ;;  %p149_p2 = scmp.eq.s32.totalorder %s2788_s22, 1 }
   0xc   : > { %p154_p3 = scmp.ne.s32.totalorder %s2714_s19, %s2710_s18  ;;  %p155_p4 = scmp.eq.s32.totalorder %s2160_s23, 1 }
   0xd   : > { %s2803_s27 = scalar_select %p136_p1, %s2718_s20, %s138_s25  }
   0xe   : > { %p2805_p5 = por %p149_p2, %p148_p0  ;;  %p2809_p6 = por %p155_p4, %p154_p3 }
   0xf   : > { %p2161_p7 = scmp.ge.s32.totalorder %s2722_s21, 1  ;;  %p162_p8 = scmp.lt.s32.totalorder %s2722_s21, 3 }
  0x10   : > { %s4514_s29 = scalar_select %p2809_p6, 1, 0 }
  0x11   : > { %p4380_p9 = scmp.eq.s32.totalorder %s2788_s22, 0  ;;  %p2816_p10 = pnand %p2161_p7, %p162_p8 }
  0x12   : > { %s2724_s6 = smov [#allocation3]   ;;  %s2725_s9 = smov [#allocation7]  }
  0x13   : > { %s177_s7 = sshll.u32 %s2724_s6, 4  ;;  %p2498_p11 = pneg %p2816_p10  ;;  %s2822_s7 = int_to_ptr.vmem [resolvable:$true] %s177_s7 }
  0x14   : > { %s190_s10 = sshll.u32 %s2725_s9, 4  ;;  %s4517_s4 = sld [smem:[#allocation91_spill]]  ;;  %s2830_s10 = int_to_ptr.vmem [resolvable:$true] %s190_s10 }
  0x15   : > { %p2826_p12 = pnand %p4380_p9, %p2498_p11  ;;  %s2577_s16 = scalar_lea.hbm %s4376_s2, 3072 }
  0x16   : > { %p2578_p13 = scmp.ne.s32.totalorder %s4376_s2, %s2577_s16  ;;  %p2584_p3 = scmp.lt.u32.totalorder %s2577_s16, %s4376_s2 }
  0x17   : > { %p2845_p0 = pneg %p2826_p12 }
  0x19   : > { %p2580_p1 = pnand %p2845_p0, %p2578_p13 }
  0x1a   : > { %s204_s13 = sshll.u32 %s4517_s4, 4  ;;  %s2835_s13 = int_to_ptr.vmem [resolvable:$true] %s204_s13 }
  0x1b   : > { %p2581_p2 = pneg %p2580_p1 }
  0x1d   : > { %p2586_p4 = pnand %p2584_p3, %p2581_p2 }
  0x1f   : > { %2589 = shalt.err (!%p2586_p4)
}
  0x20   : > { %s2590_s9 = scalar_lea.vmem %s2822_s7, 3072  ;;  %p2598_p9 = scmp.lt.s32.totalorder %s2822_s7, %s2822_s7 }
  0x21   : > { %p2591_p7 = scmp.ne.s32.totalorder %s2822_s7, %s2590_s9  ;;  %p2599_p6 = scmp.lt.s32.totalorder %s2590_s9, %s2590_s9 }
  0x23   : > { %p2593_p8 = pnand %p2591_p7, %p2845_p0  ;;  %p2600_p13 = por %p2599_p6, %p2598_p9 }
  0x25   : > { %p2594_p11 = pneg %p2593_p8 }
  0x27   : > { %p2601_p1 = pnand %p2600_p13, %p2594_p11 }
  0x29   : > { %2604 = shalt.err (!%p2601_p1)
}
  0x2a   : > { %s2726_s11 = smov 128   ;;  %s2727_s12 = smov 8  }
  0x2b   : > { %2501 = dma.hbm_to_vmem [thread:$0]  (!%p2826_p12), %s4376_s2, 3072, %s2822_s7, [#allocation4], %s2726_s11, %s2726_s11, %s2727_s12  }
  0x2c   : > { %s2605_s23 = scalar_lea.hbm %s4377_s3, 1152 }
  0x2d   : > { %p2606_p6 = scmp.ne.s32.totalorder %s4377_s3, %s2605_s23  ;;  %p2612_p3 = scmp.lt.u32.totalorder %s2605_s23, %s4377_s3 }
  0x2f   : > { %p2608_p9 = pnand %p2606_p6, %p2845_p0 }
  0x31   : > { %p2609_p2 = pneg %p2608_p9 }
  0x33   : > { %p2614_p4 = pnand %p2612_p3, %p2609_p2 }
  0x35   : > { %2617 = shalt.err (!%p2614_p4)
}
  0x36   : > { %s2618_s7 = scalar_lea.vmem %s2830_s10, 1152  ;;  %p2626_p13 = scmp.lt.s32.totalorder %s2830_s10, %s2830_s10 }
  0x37   : > { %p2619_p7 = scmp.ne.s32.totalorder %s2830_s10, %s2618_s7  ;;  %p2627_p1 = scmp.lt.s32.totalorder %s2618_s7, %s2618_s7 }
  0x39   : > { %p2621_p8 = pnand %p2619_p7, %p2845_p0  ;;  %p2628_p6 = por %p2627_p1, %p2626_p13 }
  0x3b   : > { %p2622_p11 = pneg %p2621_p8 }
  0x3d   : > { %p2629_p9 = pnand %p2628_p6, %p2622_p11 }
  0x3f   : > { %2632 = shalt.err (!%p2629_p9)
}
  0x40   : > { %2504 = dma.hbm_to_vmem [thread:$0]  (!%p2826_p12), %s4377_s3, 1152, %s2830_s10, [#allocation8], %s2726_s11, %s2726_s11, %s2727_s12  }
  0x41   : > { %s2633_s15 = scalar_lea.vmem %s2835_s13, 16  ;;  %p2641_p7 = scmp.lt.s32.totalorder %s2835_s13, %s2835_s13 }
  0x42   : > { %p2634_p2 = scmp.ne.s32.totalorder %s2835_s13, %s2633_s15  ;;  %p2642_p8 = scmp.lt.s32.totalorder %s2633_s15, %s2633_s15 }
  0x44   : > { %p2636_p3 = pnand %p2634_p2, %p2845_p0  ;;  %p2643_p11 = por %p2642_p8, %p2641_p7 }
  0x46   : > { %p2637_p4 = pneg %p2636_p3 }
  0x48   : > { %p2644_p13 = pnand %p2643_p11, %p2637_p4 }
  0x4a   : > { %2647 = shalt.err (!%p2644_p13)
}
  0x4b   : > { %s2728_s16 = smov [#allocation9]   ;;  %225 = sbr.rel (%p2816_p10) target bundleno = 943 (0x3af), region = 40 }
  0x4c   : > { %2507 = dma.vmem_to_smem (!%p2826_p12), %s2835_s13, 16, %s2728_s16, [#allocation6]  }
  0x52   : > { %p4519_p1 = scmp.eq.s32.totalorder %s2788_s22, 0 }
  0x54   : > { %2693 = dma.done.wait (%p4519_p1), [#allocation4], 3072   ;;  %p4520_p0 = pmov %p4519_p1 }
  0x56   : > { %2695 = vsyncadd (%p4520_p0), [#allocation4], 4294964224  ;;  %p4521_p6 = pmov %p4520_p0 }
  0x57   : > { %p4522_p9 = pmov %p4520_p0 }
  0x58   : > { %2697 = dma.done.wait (%p4521_p6), [#allocation8], 1152  }
  0x59   : > { %2699 = vsyncadd (%p4522_p9), [#allocation8], 4294966144  ;;  %p4523_p2 = pmov %p4520_p0 }
  0x5a   : > { %p4524_p12 = pmov %p4520_p0 }
  0x5b   : > { %2701 = dma.done.wait (%p4523_p2), [#allocation6], 16  }
  0x5c   : > { %2703 = vsyncadd (%p4524_p12), [#allocation6], 4294967280 }
  0x5d   : > { %239 = sfence }
  0x5e   : > { %p262_p10 = scmp.lt.s32.totalorder %s2788_s22, 1  ;;  %v2729_v0 = vmov 0.0|0.0   ;;  %vm2730_vm0 = vmmov 0   ;;  %v2731_v1 = vmov 0.0   ;;  %v380_v2 = vld [vmem:[#allocation3] sm:$0xff]  ;;  %v381_v3 = vld [vmem:[#allocation3 + $0x8] sm:$0xff] }
  0x5f   : > { %2437 = vmatprep.subr.bf16.mxu0 %v2729_v0  ;;  %2329 = vmatprep.mubr.msk.f32.mxu0 %vm2730_vm0, %v2731_v1  ;;  %v2441_v4 = vpack.c.bf16 %v381_v3, %v380_v2  ;;  %v382_v5 = vld [vmem:[#allocation3 + $0x10] sm:$0xff]  ;;  %v383_v6 = vld [vmem:[#allocation3 + $0x18] sm:$0xff]  ;;  %v500_v7 = vld [vmem:[#allocation3 + $0x40] sm:$0xff]  ;;  %vm274_vm1 = vcmask 130048   ;;  %vm388_vm2 = vcmask 523264   ;;  %s2732_s15 = smov 64  }
  0x60   : > { %s263_s30 = scalar_select %p262_p10, %s2788_s22, 1  ;;  %2440 = vmatprep.subr.bf16.mxu1 %v2729_v0  ;;  %2360 = vmatprep.mubr.msk.f32.mxu1 %vm2730_vm0, %v2731_v1  ;;  %v501_v10 = vld [vmem:[#allocation3 + $0x48] sm:$0xff]  ;;  %v2444_v11 = vpack.c.bf16 %v383_v6, %v382_v5  ;;  %v384_v13 = vld [vmem:[#allocation3 + $0x20] sm:$0xff]  ;;  %v502_v17 = vld [vmem:[#allocation3 + $0x50] sm:$0xff]  ;;  %vm2017_vm3 = vcmask 261120  }
  0x61   : > { %2442 = vmatpush3.bf16.msra.mxu1 %v2441_v4  ;;  %v385_v14 = vld [vmem:[#allocation3 + $0x28] sm:$0xff]  ;;  %v2453_v16 = vpack.c.bf16 %v501_v10, %v500_v7  ;;  %v503_v18 = vld [vmem:[#allocation3 + $0x58] sm:$0xff]  ;;  %v386_v20 = vld [vmem:[#allocation3 + $0x30] sm:$0xff]  ;;  %s2733_s16 = smov 96   ;;  %s2265_s10 = sld [smem:[#allocation9 + $0x1]] }
  0x62   : > { %s2277_s8 = sshll.u32 %s263_s30, 4  ;;  %2443 = vmatprep.subr.bf16.mxu1 %v2729_v0  ;;  %v267_v15 = vld [vmem:[%s4375_s1] sm:$0xff]  ;;  %v2447_v19 = vpack.c.bf16 %v385_v14, %v384_v13  ;;  %v387_v21 = vld [vmem:[#allocation3 + $0x38] sm:$0xff]  ;;  %v268_v22 = vld [vmem:[%s4375_s1 + $0x8] sm:$0xff]  ;;  %v2456_v23 = vpack.c.bf16 %v503_v18, %v502_v17  ;;  %s1705_s30 = sld [smem:[#allocation9]] }
  0x63   : > { %s266_s25 = scalar_lea.vmem %s4374_s0, %s2277_s8  ;;  %v504_v24 = vld [vmem:[#allocation3 + $0x60] sm:$0xff]  ;;  %v505_v25 = vld [vmem:[#allocation3 + $0x68] sm:$0xff]  ;;  %v2450_v26 = vpack.c.bf16 %v387_v21, %v386_v20  ;;  %v269_v27 = vld [vmem:[%s4375_s1 + $0x10] sm:$0xff]  ;;  %s259_s8 = sand.u32 1, %s2714_s19  }
  0x64   : > { %v272_v8 = vld [vmem:[%s266_s25] sm:$0xff]  ;;  %v273_v9 = vld [vmem:[%s266_s25 + $0x8] sm:$0xff]  ;;  %v2459_v28 = vpack.c.bf16 %v505_v25, %v504_v24  ;;  %v507_v30 = vld [vmem:[#allocation3 + $0x78] sm:$0xff]  ;;  %s2170_s13 = sshll.u32 %s259_s8, 8  ;;  %s2266_s25 = sld [smem:[#allocation9 + $0x2]] }
  0x65   : > { %v2438_v12 = vpack.c.bf16 %v273_v9, %v272_v8  ;;  %2445 = vmatpush3.bf16.msra.mxu1 %v2444_v11  ;;  %v506_v29 = vld [vmem:[#allocation3 + $0x70] sm:$0xff]  ;;  %v270_v31 = vld [vmem:[%s4375_s1 + $0x18] sm:$0xff]  ;;  %v271_v33 = vld [vmem:[%s4375_s1 + $0x20] sm:$0x3]  ;;  %s4181_s11 = scalar_lea.vmem [#allocation10], %s2170_s13  ;;  %s2267_s12 = sld [smem:[#allocation9 + $0x3]] }
  0x66   : > { %2446 = vmatprep.subr.bf16.mxu1 %v2729_v0  ;;  %v2462_v32 = vpack.c.bf16 %v507_v30, %v506_v29  ;;  %v605_v34 = vld [vmem:[#allocation3 + $0x80] sm:$0xff]  ;;  %v606_v35 = vld [vmem:[#allocation3 + $0x88] sm:$0xff]  ;;  %v607_v37 = vld [vmem:[#allocation3 + $0x90] sm:$0xff]  ;;  %s2268_s17 = sld [smem:[#allocation9 + $0x4]]  ;;  %s2269_s23 = sld [smem:[#allocation9 + $0x5]] }
  0x67   : > { %2439 = vmatpush3.bf16.msra.mxu0 %v2438_v12  ;;  %v2465_v36 = vpack.c.bf16 %v606_v35, %v605_v34  ;;  %v608_v38 = vld [vmem:[#allocation3 + $0x98] sm:$0xff]  ;;  %v609_v42 = vld [vmem:[#allocation3 + $0xa0] sm:$0xff]  ;;  %v610_v43 = vld [vmem:[#allocation3 + $0xa8] sm:$0xff]  ;;  %s2270_s26 = sld [smem:[#allocation9 + $0x6]]  ;;  %s2271_s6 = sld [smem:[#allocation9 + $0x7]] }
  0x68   : > { %2452 = vmatprep.subr.bf16.mxu0 %v2729_v0  ;;  %v2468_v41 = vpack.c.bf16 %v608_v38, %v607_v37  ;;  %v2471_v46 = vpack.c.bf16 %v610_v43, %v609_v42  ;;  %v611_v48 = vld [vmem:[#allocation3 + $0xb0] sm:$0xff]  ;;  %v612_v49 = vld [vmem:[#allocation3 + $0xb8] sm:$0xff]  ;;  %v3009_v56 = vld [vmem:[#allocation7 + $0x9] ss:$0 sm:$0xff]  ;;  %s2278_s9 = sshll.u32 %s2788_s22, 12  ;;  %s2064_s7 = sshll.u32 %s4181_s11, 4  ;;  %s4327_s7 = int_to_ptr.vmem [resolvable:$true] %s2064_s7 }
  0x69   : > { %2448 = vmatpush3.bf16.msra.mxu1 %v2447_v19  ;;  %v2474_v51 = vpack.c.bf16 %v612_v49, %v611_v48  ;;  %4525 = vst [vmem:[#allocation15_spill] sm:$0xff] %v3009_v56  ;;  %v3011_v57 = vld [vmem:[#allocation7 + $0xa] ss:$0 sm:$0xff]  ;;  %v3013_v58 = vld [vmem:[#allocation7] ss:$0 sm:$0xff]  ;;  %s4333_s22 = scalar_lea.sflag [#allocation5], %s259_s8 }
  0x6a   : > { %2330 = vmatmul.mubr.msk.f32.vlgmr.msra.gmra.mrb[0].mxu0 %vm274_vm1, %v267_v15  ;;  %2449 = vmatprep.subr.bf16.mxu1 %v2729_v0  ;;  %4526 = vst [vmem:[#allocation16_spill] sm:$0xff] %v3011_v57  ;;  %4527 = vst [vmem:[#allocation17_spill] sm:$0xff] %v3013_v58  ;;  %v3015_v59 = vld [vmem:[#allocation7 + $0x1] ss:$0 sm:$0xff]  ;;  %v3017_v60 = vld [vmem:[#allocation7 + $0x12] ss:$0 sm:$0xff] }
  0x6b   : > { %2332 = vmatprep.mubr.msk.f32.mxu0 %vm2730_vm0, %v2731_v1  ;;  %2454 = vmatpush3.bf16.msra.mxu0 %v2453_v16  ;;  %4528 = vst [vmem:[#allocation18_spill] sm:$0xff] %v3015_v59  ;;  %4529 = vst [vmem:[#allocation19_spill] sm:$0xff] %v3017_v60  ;;  %v3019_v61 = vld [vmem:[#allocation7 + $0x13] ss:$0 sm:$0xff]  ;;  %v3021_v62 = vld [vmem:[#allocation7 + $0x1b] ss:$0 sm:$0xff] }
  0x6c   : > { %2455 = vmatprep.subr.bf16.mxu0 %v2729_v0  ;;  %4530 = vst [vmem:[#allocation20_spill] sm:$0xff] %v3019_v61  ;;  %4531 = vst [vmem:[#allocation21_spill] sm:$0xff] %v3021_v62  ;;  %v3023_v63 = vld [vmem:[#allocation7 + $0x1c] ss:$0 sm:$0xff]  ;;  %v2197_v2 = vld [vmem:[#allocation7 + $0x24] ss:$0 sm:$0xff] }
  0x6d   : > { %2451 = vmatpush3.bf16.msra.mxu1 %v2450_v26  ;;  %4532 = vst [vmem:[#allocation22_spill] sm:$0xff] %v3023_v63  ;;  %v2205_v3 = vld [vmem:[#allocation7 + $0x25] ss:$0 sm:$0xff]  ;;  %v2198_v10 = vld [vmem:[#allocation7 + $0x2d] ss:$0 sm:$0xff] }
  0x6e   : > { %2333 = vmatmul.mubr.msk.f32.gmra.mrb[2].mxu0 %vm274_vm1, %v268_v22  ;;  %2476 = vmatprep.subr.bf16.mxu1 %v2729_v0  ;;  %v2206_v11 = vld [vmem:[#allocation7 + $0x2e] ss:$0 sm:$0xff] }
  0x6f   : > { %2335 = vmatprep.mubr.msk.f32.mxu0 %vm2730_vm0, %v2731_v1  ;;  %2457 = vmatpush3.bf16.msra.mxu0 %v2456_v23 }
  0x70   : > { %2458 = vmatprep.subr.bf16.mxu0 %v2729_v0 }
  0x72   : > { %2336 = vmatmul.mubr.msk.f32.gmra.mrb[4].mxu0 %vm274_vm1, %v269_v27 }
  0x73   : > { %2338 = vmatprep.mubr.msk.f32.mxu0 %vm2730_vm0, %v2731_v1  ;;  %2460 = vmatpush3.bf16.msra.mxu0 %v2459_v28 }
  0x74   : > { %2461 = vmatprep.subr.bf16.mxu0 %v2729_v0 }
  0x76   : > { %2339 = vmatmul.mubr.msk.f32.gmra.mrb[6].mxu0 %vm274_vm1, %v270_v31 }
  0x77   : > { %2341 = vmatprep.mubr.msk.f32.mxu0 %vm2730_vm0, %v2731_v1  ;;  %2463 = vmatpush3.bf16.msra.mxu0 %v2462_v32 }
  0x78   : > { %2464 = vmatprep.subr.bf16.mxu0 %v2729_v0 }
  0x7a   : > { %2342 = vmatmul.mubr.msk.f32.gmra.mrb[8].mxu0 %vm274_vm1, %v271_v33 }
  0x7b   : > { %2391 = vmatprep.mubr.msk.f32.mxu0 %vm2730_vm0, %v2731_v1 }
 0x13d   : > { %v356_v39 = vpop.f32.mrb[0].mxu0 }
 0x13e   : > { %v2331_v40 = vpop.f32.mrb[1].mxu0  ;;  %2361 = vmatmul.mubr.msk.f32.vlgmr.msra.gmra.mrb[0].mxu1 %vm388_vm2, %v356_v39  ;;  %2392 = vmatmul.mubr.msk.f32.vlgmr.msra.gmra.mrb[10].mxu0 %vm388_vm2, %v356_v39 }
 0x13f   : > { %2466 = vmatpush3.bf16.msra.mxu0 %v2465_v36  ;;  %2363 = vmatprep.mubr.msk.f32.mxu1 %vm2730_vm0, %v2731_v1 }
 0x140   : > { %2394 = vmatprep.mubr.msk.f32.mxu0 %vm2730_vm0, %v2731_v1  ;;  %2480 = vmatpush3.bf16.msra.mxu1 %v2465_v36 }
 0x141   : > { %v361_v44 = vpop.f32.mrb[2].mxu0  ;;  %2467 = vmatprep.subr.bf16.mxu0 %v2729_v0  ;;  %2477 = vmatprep.subr.bf16.mxu1 %v2729_v0 }
 0x142   : > { %v2334_v45 = vpop.f32.mrb[3].mxu0  ;;  %2364 = vmatmul.mubr.msk.f32.gmra.mrb[2].mxu1 %vm388_vm2, %v361_v44  ;;  %2395 = vmatmul.mubr.msk.f32.gmra.mrb[12].mxu0 %vm388_vm2, %v361_v44 }
 0x143   : > { %2469 = vmatpush3.bf16.msra.mxu0 %v2468_v41  ;;  %2366 = vmatprep.mubr.msk.f32.mxu1 %vm2730_vm0, %v2731_v1 }
 0x144   : > { %2397 = vmatprep.mubr.msk.f32.mxu0 %vm2730_vm0, %v2731_v1  ;;  %2481 = vmatpush3.bf16.msra.mxu1 %v2468_v41 }
 0x145   : > { %v366_v47 = vpop.f32.mrb[4].mxu0  ;;  %2470 = vmatprep.subr.bf16.mxu0 %v2729_v0  ;;  %2478 = vmatprep.subr.bf16.mxu1 %v2729_v0 }
 0x146   : > { %v2337_v50 = vpop.f32.mrb[5].mxu0  ;;  %2367 = vmatmul.mubr.msk.f32.gmra.mrb[4].mxu1 %vm388_vm2, %v366_v47  ;;  %2398 = vmatmul.mubr.msk.f32.gmra.mrb[14].mxu0 %vm388_vm2, %v366_v47 }
 0x147   : > { %2472 = vmatpush3.bf16.msra.mxu0 %v2471_v46  ;;  %2369 = vmatprep.mubr.msk.f32.mxu1 %vm2730_vm0, %v2731_v1 }
 0x148   : > { %2400 = vmatprep.mubr.msk.f32.mxu0 %vm2730_vm0, %v2731_v1  ;;  %2482 = vmatpush3.bf16.msra.mxu1 %v2471_v46  ;;  %v2199_v46 = vld [vmem:[#allocation7 + $0x36] ss:$0 sm:$0xff] }
 0x149   : > { %v371_v52 = vpop.f32.mrb[6].mxu0  ;;  %2473 = vmatprep.subr.bf16.mxu0 %v2729_v0  ;;  %2479 = vmatprep.subr.bf16.mxu1 %v2729_v0 }
 0x14a   : > { %v2340_v53 = vpop.f32.mrb[7].mxu0  ;;  %2370 = vmatmul.mubr.msk.f32.gmra.mrb[6].mxu1 %vm388_vm2, %v371_v52  ;;  %2401 = vmatmul.mubr.msk.f32.gmra.mrb[16].mxu0 %vm388_vm2, %v371_v52 }
 0x14b   : > { %2372 = vmatprep.mubr.msk.f32.mxu1 %vm2730_vm0, %v2731_v1  ;;  %2403 = vmatprep.mubr.msk.f32.mxu0 %vm2730_vm0, %v2731_v1 }
 0x14c   : > { %2475 = vmatpush3.bf16.msra.mxu0 %v2474_v51  ;;  %2483 = vmatpush3.bf16.msra.mxu1 %v2474_v51 }
 0x14d   : > { %v376_v54 = vpop.f32.mrb[8].mxu0 }
 0x14e   : > { %v2343_v55 = vpop.f32.mrb[9].mxu0  ;;  %2373 = vmatmul.mubr.msk.f32.gmra.mrb[8].mxu1 %vm388_vm2, %v376_v54  ;;  %2404 = vmatmul.mubr.msk.f32.gmra.mrb[18].mxu0 %vm388_vm2, %v376_v54 }
 0x14f   : > { %2422 = vmatprep.mubr.msk.f32.mxu0 %vm2730_vm0, %v2731_v1  ;;  %2425 = vmatprep.mubr.msk.f32.mxu1 %vm2730_vm0, %v2731_v1  ;;  %v2208_v55 = vld [vmem:[#allocation7 + $0x40] ss:$0 sm:$0xff] }
 0x152   : > { %2423 = vmatmul.mubr.msk.f32.vlgmr.msra.gmra.mrb[20].mxu0 %vm388_vm2, %v356_v39  ;;  %2426 = vmatmul.mubr.msk.f32.vlgmr.msra.gmra.mrb[10].mxu1 %vm388_vm2, %v361_v44 }
 0x153   : > { %2428 = vmatprep.mubr.msk.f32.mxu1 %vm2730_vm0, %v2731_v1 }
 0x156   : > { %2429 = vmatmul.mubr.msk.f32.gmra.mrb[12].mxu1 %vm388_vm2, %v366_v47  ;;  %v2207_v47 = vld [vmem:[#allocation7 + $0x37] ss:$0 sm:$0xff] }
 0x157   : > { %2431 = vmatprep.mubr.msk.f32.mxu1 %vm2730_vm0, %v2731_v1 }
 0x15a   : > { %2432 = vmatmul.mubr.msk.f32.gmra.mrb[14].mxu1 %vm388_vm2, %v371_v52 }
 0x15b   : > { %2434 = vmatprep.mubr.msk.f32.mxu1 %vm2730_vm0, %v2731_v1 }
 0x15e   : > { %2435 = vmatmul.mubr.msk.f32.gmra.mrb[16].mxu1 %vm388_vm2, %v376_v54  ;;  %v2200_v54 = vld [vmem:[#allocation7 + $0x3f] ss:$0 sm:$0xff] }
 0x211   : > { %v3025_v0 = vpop.f32.mrb[0].mxu1  ;;  %v3027_v1 = vpop.f32.mrb[10].mxu0 }
 0x212   : > { %494 = vst [vmem:[#allocation2] sm:$0xff] %v3025_v0  ;;  %599 = vst [vmem:[#allocation2 + $0x28] sm:$0xff] %v3027_v1  ;;  %v2362_v4 = vpop.f32.mrb[1].mxu1  ;;  %v2393_v5 = vpop.f32.mrb[11].mxu0  ;;  %v718_v6 = vmul.f32 %v3013_v58, %v3025_v0  ;;  %v826_v7 = vmul.f32 %v3015_v59, %v3027_v1  ;;  %v731_v8 = vmul.f32 %v3009_v56, %v3025_v0 }
 0x213   : > { %v839_v9 = vmul.f32 %v3011_v57, %v3027_v1  ;;  %v744_v12 = vmul.f32 %v3017_v60, %v3025_v0  ;;  %v852_v13 = vmul.f32 %v3019_v61, %v3027_v1  ;;  %v757_v14 = vmul.f32 %v3021_v62, %v3025_v0  ;;  %v3089_v4 = vld [vmem:[#allocation7 + $0x3] ss:$0 sm:$0xff]  ;;  %v3091_v5 = vld [vmem:[#allocation7 + $0x4] ss:$0 sm:$0xff] }
 0x214   : > { %v865_v15 = vmul.f32 %v3023_v63, %v3027_v1  ;;  %v3047_v16 = vadd.f32 %v826_v7, %v718_v6  ;;  %v770_v18 = vmul.f32 %v2197_v2, %v3025_v0  ;;  %v878_v19 = vmul.f32 %v2205_v3, %v3027_v1  ;;  %4538 = vst [vmem:[#allocation28_spill] sm:$0xff] %v3089_v4  ;;  %v3093_v6 = vld [vmem:[#allocation7 + $0x6] ss:$0 sm:$0xff] }
 0x215   : > { %v3049_v17 = vadd.f32 %v839_v9, %v731_v8  ;;  %v475_v20 = vpop.f32.mrb[2].mxu1  ;;  %v579_v21 = vpop.f32.mrb[12].mxu0  ;;  %v3053_v22 = vadd.f32 %v852_v13, %v744_v12  ;;  %v783_v24 = vmul.f32 %v2198_v10, %v3025_v0  ;;  %v891_v25 = vmul.f32 %v2206_v11, %v3027_v1  ;;  %4539 = vst [vmem:[#allocation29_spill] sm:$0xff] %v3091_v5  ;;  %v3101_v12 = vld [vmem:[#allocation7 + $0x10] ss:$0 sm:$0xff] }
 0x216   : > { %v3055_v23 = vadd.f32 %v865_v15, %v757_v14  ;;  %495 = vst [vmem:[#allocation2 + $0x8] sm:$0xff] %v475_v20  ;;  %600 = vst [vmem:[#allocation2 + $0x30] sm:$0xff] %v579_v21  ;;  %v2365_v26 = vpop.f32.mrb[3].mxu1  ;;  %v2396_v27 = vpop.f32.mrb[13].mxu0  ;;  %v732_v28 = vmul.f32 %v3009_v56, %v475_v20  ;;  %v840_v29 = vmul.f32 %v3011_v57, %v579_v21  ;;  %v3103_v13 = vld [vmem:[#allocation7 + $0x7] ss:$0 sm:$0xff] }
 0x217   : > { %v745_v30 = vmul.f32 %v3017_v60, %v475_v20  ;;  %v853_v31 = vmul.f32 %v3019_v61, %v579_v21  ;;  %v719_v32 = vmul.f32 %v3013_v58, %v475_v20  ;;  %v827_v33 = vmul.f32 %v3015_v59, %v579_v21  ;;  %4540 = vst [vmem:[#allocation30_spill] sm:$0xff] %v3093_v6  ;;  %v3105_v14 = vld [vmem:[#allocation7 + $0x15] ss:$0 sm:$0xff]  ;;  %v3107_v15 = vld [vmem:[#allocation7 + $0x16] ss:$0 sm:$0xff] }
 0x218   : > { %v758_v34 = vmul.f32 %v3021_v62, %v475_v20  ;;  %v866_v35 = vmul.f32 %v3023_v63, %v579_v21  ;;  %v3067_v36 = vadd.f32 %v840_v29, %v732_v28  ;;  %v771_v38 = vmul.f32 %v2197_v2, %v475_v20  ;;  %v3085_v2 = vld [vmem:[#allocation7 + $0xc] ss:$0 sm:$0xff]  ;;  %4543 = vst [vmem:[#allocation33_spill] sm:$0xff] %v3101_v12 }
 0x219   : > { %v3069_v37 = vadd.f32 %v853_v31, %v745_v30  ;;  %v879_v39 = vmul.f32 %v2205_v3, %v579_v21  ;;  %v3071_v40 = vpop.f32.mrb[4].mxu1  ;;  %v3073_v41 = vpop.f32.mrb[14].mxu0  ;;  %v3075_v42 = vadd.f32 %v827_v33, %v719_v32  ;;  %v784_v44 = vmul.f32 %v2198_v10, %v475_v20  ;;  %4536 = vst [vmem:[#allocation26_spill] sm:$0xff] %v3085_v2  ;;  %v3087_v3 = vld [vmem:[#allocation7 + $0xd] ss:$0 sm:$0xff] }
 0x21a   : > { %4533 = vst [vmem:[#allocation23_spill] sm:$0xff] %v3071_v40  ;;  %4534 = vst [vmem:[#allocation24_spill] sm:$0xff] %v3073_v41  ;;  %v3077_v43 = vadd.f32 %v866_v35, %v758_v34  ;;  %v892_v45 = vmul.f32 %v2206_v11, %v579_v21  ;;  %v2368_v48 = vpop.f32.mrb[5].mxu1  ;;  %v2399_v49 = vpop.f32.mrb[15].mxu0  ;;  %v797_v51 = vmul.f32 %v2199_v46, %v475_v20  ;;  %v3099_v11 = vld [vmem:[#allocation7 + $0xf] ss:$0 sm:$0xff] }
 0x21b   : > { %496 = vst [vmem:[#allocation2 + $0x10] sm:$0xff] %v3071_v40  ;;  %601 = vst [vmem:[#allocation2 + $0x38] sm:$0xff] %v3073_v41  ;;  %v3081_v50 = vadd.f32 %v879_v39, %v771_v38  ;;  %v905_v52 = vmul.f32 %v2207_v47, %v579_v21  ;;  %v3083_v53 = vadd.f32 %v878_v19, %v770_v18  ;;  %v3127_v30 = vld [vmem:[#allocation7 + $0x18] ss:$0 sm:$0xff]  ;;  %v3151_v39 = vld [vmem:[#allocation7 + $0x19] ss:$0 sm:$0xff] }
 0x21c   : > { %4537 = vst [vmem:[#allocation27_spill] sm:$0xff] %v3087_v3  ;;  %v3095_v7 = vadd.f32 %v892_v45, %v784_v44  ;;  %v810_v8 = vmul.f32 %v2200_v54, %v475_v20  ;;  %v918_v9 = vmul.f32 %v2208_v55, %v579_v21  ;;  %v3097_v10 = vadd.f32 %v891_v25, %v783_v24  ;;  %v3153_v44 = vld [vmem:[#allocation7 + $0x1e] ss:$0 sm:$0xff]  ;;  %v3155_v45 = vld [vmem:[#allocation7 + $0x1f] ss:$0 sm:$0xff] }
 0x21d   : > { %4535 = vst [vmem:[#allocation25_spill] sm:$0xff] %v3083_v53  ;;  %4542 = vst [vmem:[#allocation32_spill] sm:$0xff] %v3099_v11  ;;  %v3109_v18 = vadd.f32 %v905_v52, %v797_v51  ;;  %v3111_v19 = vpop.f32.mrb[6].mxu1  ;;  %v3113_v26 = vpop.f32.mrb[16].mxu0  ;;  %v3115_v20 = vld [vmem:[#allocation2 + $0x1] sm:$0xff]  ;;  %v3117_v21 = vld [vmem:[#allocation2 + $0x29] sm:$0xff]  ;;  %v3131_v31 = vmul.f32 %v3013_v58, %v3071_v40  ;;  %v3135_v32 = vmul.f32 %v3015_v59, %v3073_v41 }
 0x21e   : > { %4541 = vst [vmem:[#allocation31_spill] sm:$0xff] %v3097_v10  ;;  %4544 = vst [vmem:[#allocation34_spill] sm:$0xff] %v3103_v13  ;;  %v3119_v24 = vld [vmem:[#allocation2 + $0x2] sm:$0xff]  ;;  %v3121_v25 = vadd.f32 %v918_v9, %v810_v8  ;;  %v2371_v27 = vpop.f32.mrb[7].mxu1  ;;  %v2402_v28 = vpop.f32.mrb[17].mxu0  ;;  %v3125_v29 = vld [vmem:[#allocation2 + $0x2a] sm:$0xff]  ;;  %v3138_v33 = vmul.f32 %v2199_v46, %v3025_v0  ;;  %v3141_v34 = vmul.f32 %v2207_v47, %v3027_v1 }
 0x21f   : > { %4545 = vst [vmem:[#allocation35_spill] sm:$0xff] %v3105_v14  ;;  %4546 = vst [vmem:[#allocation36_spill] sm:$0xff] %v3107_v15  ;;  %v3145_v35 = vmul.f32 %v3089_v4, %v3115_v20  ;;  %v3149_v38 = vmul.f32 %v3091_v5, %v3117_v21  ;;  %v3158_v46 = vmul.f32 %v2200_v54, %v3025_v0  ;;  %v3171_v51 = vld [vmem:[#allocation7 + $0x21] ss:$0 sm:$0xff]  ;;  %v3173_v52 = vld [vmem:[#allocation7 + $0x22] ss:$0 sm:$0xff] }
 0x220   : > { %4547 = vst [vmem:[#allocation37_spill] sm:$0xff] %v3111_v19  ;;  %4548 = vst [vmem:[#allocation38_spill] sm:$0xff] %v3113_v26  ;;  %v3161_v47 = vmul.f32 %v2208_v55, %v3027_v1  ;;  %v3165_v48 = vmul.f32 %v3093_v6, %v3119_v24  ;;  %v3169_v49 = vmul.f32 %v3103_v13, %v3125_v29  ;;  %v3231_v59 = vld [vmem:[#allocation7 + $0x14] ss:$0 sm:$0xff]  ;;  %v3295_v53 = vld [vmem:[#allocation7 + $0x27] ss:$0 sm:$0xff] }
 0x221   : > { %4549 = vst [vmem:[#allocation39_spill] sm:$0xff] %v3115_v20  ;;  %4550 = vst [vmem:[#allocation40_spill] sm:$0xff] %v3117_v21  ;;  %v3177_v8 = vmul.f32 %v3085_v2, %v3115_v20  ;;  %v3181_v0 = vmul.f32 %v3087_v3, %v3117_v21  ;;  %v490_v1 = vpop.f32.mrb[8].mxu1  ;;  %v594_v54 = vpop.f32.mrb[18].mxu0  ;;  %v3191_v28 = vmul.f32 %v3099_v11, %v3119_v24 }
 0x222   : > { %4551 = vst [vmem:[#allocation41_spill] sm:$0xff] %v3119_v24  ;;  %4552 = vst [vmem:[#allocation42_spill] sm:$0xff] %v3121_v25  ;;  %v3183_v55 = vld [vmem:[#allocation2 + $0x9] sm:$0xff]  ;;  %v3185_v9 = vld [vmem:[#allocation2 + $0x31] sm:$0xff]  ;;  %v3195_v63 = vmul.f32 %v3101_v12, %v3125_v29  ;;  %v3199_v62 = vmul.f32 %v3105_v14, %v3115_v20  ;;  %v3203_v61 = vmul.f32 %v3107_v15, %v3117_v21  ;;  %v2374_v60 = vpop.f32.mrb[9].mxu1  ;;  %v2405_v41 = vpop.f32.mrb[19].mxu0 }
 0x223   : > { %497 = vst [vmem:[#allocation2 + $0x18] sm:$0xff] %v3111_v19  ;;  %602 = vst [vmem:[#allocation2 + $0x40] sm:$0xff] %v3113_v26  ;;  %v3187_v27 = vld [vmem:[#allocation2 + $0xa] sm:$0xff]  ;;  %v3205_v40 = vld [vmem:[#allocation2 + $0x32] sm:$0xff]  ;;  %v3209_v57 = vmul.f32 %v3127_v30, %v3119_v24  ;;  %v3213_v56 = vmul.f32 %v3151_v39, %v3125_v29  ;;  %v1056_v41 = vmul.f32 %v3085_v2, %v3183_v55 }
 0x224   : > { %4553 = vst [vmem:[#allocation43_spill] sm:$0xff] %v3125_v29  ;;  %4554 = vst [vmem:[#allocation44_spill] sm:$0xff] %v3127_v30  ;;  %v3223_v60 = vld [vmem:[#allocation7 + $0xb] ss:$0 sm:$0xff]  ;;  %v3235_v26 = vmul.f32 %v3171_v51, %v3119_v24  ;;  %v3239_v58 = vmul.f32 %v3173_v52, %v3125_v29  ;;  %v3243_v19 = vmul.f32 %v3099_v11, %v3187_v27 }
 0x225   : > { %4555 = vst [vmem:[#allocation45_spill] sm:$0xff] %v3131_v31  ;;  %4556 = vst [vmem:[#allocation46_spill] sm:$0xff] %v3135_v32  ;;  %v3247_v2 = vmul.f32 %v3101_v12, %v3205_v40  ;;  %v3255_v32 = vld [vmem:[#allocation7 + $0x26] ss:$0 sm:$0xff]  ;;  %v3257_v31 = vpop.f32.mrb[20].mxu0  ;;  %v3259_v10 = vpop.f32.mrb[10].mxu1  ;;  %v3263_v11 = vmul.f32 %v3127_v30, %v3187_v27  ;;  %v3267_v12 = vmul.f32 %v3151_v39, %v3205_v40 }
 0x226   : > { %4557 = vst [vmem:[#allocation47_spill] sm:$0xff] %v3138_v33  ;;  %4558 = vst [vmem:[#allocation48_spill] sm:$0xff] %v3141_v34  ;;  %v1177_v34 = vmul.f32 %v3107_v15, %v3185_v9  ;;  %v3253_v33 = vld [vmem:[#allocation7 + $0x1d] ss:$0 sm:$0xff]  ;;  %v1151_v15 = vmul.f32 %v3091_v5, %v3185_v9  ;;  %v2424_v29 = vpop.f32.mrb[21].mxu0  ;;  %v948_v30 = vmul.f32 %v3223_v60, %v3259_v10 }
 0x227   : > { %4559 = vst [vmem:[#allocation49_spill] sm:$0xff] %v3151_v39  ;;  %4560 = vst [vmem:[#allocation50_spill] sm:$0xff] %v3153_v44  ;;  %v961_v39 = vmul.f32 %v3231_v59, %v3259_v10  ;;  %v974_v5 = vmul.f32 %v3253_v33, %v3259_v10  ;;  %v1082_v25 = vmul.f32 %v3153_v44, %v3183_v55 }
 0x228   : > { %4561 = vst [vmem:[#allocation51_spill] sm:$0xff] %v3155_v45  ;;  %4562 = vst [vmem:[#allocation52_spill] sm:$0xff] %v3158_v46  ;;  %v3229_v46 = vld [vmem:[#allocation7 + $0x2] ss:$0 sm:$0xff]  ;;  %v987_v29 = vmul.f32 %v3255_v32, %v3259_v10 }
 0x229   : > { %4563 = vst [vmem:[#allocation53_spill] sm:$0xff] %v3161_v47  ;;  %4564 = vst [vmem:[#allocation54_spill] sm:$0xff] %v3171_v51  ;;  %v3217_v47 = vmul.f32 %v3153_v44, %v3115_v20  ;;  %v934_v24 = vmul.f32 %v3229_v46, %v3257_v31  ;;  %v965_v20 = vadd.f32 %v961_v39, %v3069_v37  ;;  %v3333_v39 = vld [vmem:[#allocation7 + $0x2f] ss:$0 sm:$0xff] }
 0x22a   : > { %4565 = vst [vmem:[#allocation55_spill] sm:$0xff] %v3173_v52  ;;  %498 = vst [vmem:[#allocation2 + $0x20] sm:$0x3] %v490_v1  ;;  %v3221_v1 = vmul.f32 %v3155_v45, %v3117_v21  ;;  %v978_v44 = vadd.f32 %v974_v5, %v3077_v43  ;;  %v3316_v43 = vmul.f32 %v3103_v13, %v3205_v40 }
 0x22b   : > { %603 = vst [vmem:[#allocation2 + $0x48] sm:$0x3] %v594_v54  ;;  %4566 = vst [vmem:[#allocation56_spill] sm:$0xff] %v3217_v47  ;;  %v1164_v54 = vmul.f32 %v3087_v3, %v3185_v9  ;;  %v1069_v3 = vmul.f32 %v3105_v14, %v3183_v55  ;;  %v1043_v14 = vmul.f32 %v3089_v4, %v3183_v55 }
 0x22c   : > { %4567 = vst [vmem:[#allocation57_spill] sm:$0xff] %v3221_v1  ;;  %4568 = vst [vmem:[#allocation58_spill] sm:$0xff] %v3223_v60  ;;  %v935_v4 = vmul.f32 %v3229_v46, %v3259_v10  ;;  %v938_v21 = vadd.f32 %v934_v24, %v3047_v16  ;;  %v3306_v24 = vld [vmem:[#allocation7 + $0xe] ss:$0 sm:$0xff]  ;;  %v1000_v13 = vmul.f32 %v3333_v39, %v3259_v10 }
 0x22d   : > { %4569 = vst [vmem:[#allocation59_spill] sm:$0xff] %v3229_v46  ;;  %4570 = vst [vmem:[#allocation60_spill] sm:$0xff] %v3231_v59 }
 0x22e   : > { %4571 = vst [vmem:[#allocation61_spill] sm:$0xff] %v3235_v26  ;;  %4572 = vst [vmem:[#allocation62_spill] sm:$0xff] %v3239_v58  ;;  %v2427_v58 = vpop.f32.mrb[11].mxu1  ;;  %v952_v26 = vadd.f32 %v948_v30, %v3067_v36  ;;  %v939_v46 = vadd.f32 %v935_v4, %v3075_v42  ;;  %v1046_v37 = vadd.f32 %v3145_v35, %v938_v21  ;;  %v3308_v30 = vld [vmem:[#allocation7 + $0x5] ss:$0 sm:$0xff] }
 0x22f   : > { %4573 = vst [vmem:[#allocation63_spill] sm:$0xff] %v3255_v32  ;;  %704 = vst [vmem:[#allocation2 + $0x50] sm:$0xff] %v3257_v31  ;;  %v947_v58 = vmul.f32 %v3223_v60, %v3257_v31  ;;  %v3297_v1 = vpop.f32.mrb[12].mxu1  ;;  %v991_v60 = vadd.f32 %v987_v29, %v3081_v50  ;;  %v1095_v32 = vmul.f32 %v3295_v53, %v3183_v55  ;;  %v3329_v21 = vld [vmem:[#allocation7 + $0x28] ss:$0 sm:$0xff] }
 0x230   : > { %705 = vst [vmem:[#allocation2 + $0x58] sm:$0xff] %v3259_v10  ;;  %4574 = vst [vmem:[#allocation64_spill] sm:$0xff] %v3297_v1  ;;  %v2430_v16 = vpop.f32.mrb[13].mxu1  ;;  %v1060_v36 = vadd.f32 %v1056_v41, %v952_v26  ;;  %v1073_v42 = vadd.f32 %v1069_v3, %v965_v20  ;;  %v1047_v4 = vadd.f32 %v1043_v14, %v939_v46  ;;  %v3331_v35 = vld [vmem:[#allocation7 + $0x2a] ss:$0 sm:$0xff] }
 0x231   : > { %v951_v47 = vadd.f32 %v947_v58, %v3049_v17  ;;  %706 = vst [vmem:[#allocation2 + $0x60] sm:$0xff] %v3297_v1  ;;  %4575 = vst [vmem:[#allocation65_spill] sm:$0xff] %v3306_v24  ;;  %v3312_v17 = vmul.f32 %v3093_v6, %v3187_v27  ;;  %v1086_v50 = vadd.f32 %v1082_v25, %v978_v44  ;;  %v3335_v25 = vpop.f32.mrb[14].mxu1  ;;  %v3342_v41 = vld [vmem:[#allocation7 + $0x8] ss:$0 sm:$0xff] }
 0x232   : > { %4576 = vst [vmem:[#allocation66_spill] sm:$0xff] %v3308_v30  ;;  %v1190_v26 = vmul.f32 %v3155_v45, %v3185_v9  ;;  %v3323_v3 = vmul.f32 %v3171_v51, %v3187_v27  ;;  %v3327_v14 = vmul.f32 %v3173_v52, %v3205_v40  ;;  %v1099_v20 = vadd.f32 %v1095_v32, %v991_v60  ;;  %v2433_v58 = vpop.f32.mrb[15].mxu1  ;;  %v3351_v29 = vld [vmem:[#allocation7 + $0x11] ss:$0 sm:$0xff]  ;;  %v3360_v45 = vld [vmem:[#allocation7 + $0x2b] ss:$0 sm:$0xff] }
 0x233   : > { %v1059_v5 = vadd.f32 %v3177_v8, %v951_v47  ;;  %4577 = vst [vmem:[#allocation67_spill] sm:$0xff] %v3329_v21  ;;  %4578 = vst [vmem:[#allocation68_spill] sm:$0xff] %v3331_v35  ;;  %v1168_v44 = vadd.f32 %v1164_v54, %v1060_v36  ;;  %v1154_v46 = vadd.f32 %v3149_v38, %v1046_v37  ;;  %v3357_v37 = vld [vmem:[#allocation7 + $0x17] ss:$0 sm:$0xff]  ;;  %v3387_v1 = vld [vmem:[#allocation7 + $0x20] ss:$0 sm:$0xff] }
 0x234   : > { %4579 = vst [vmem:[#allocation69_spill] sm:$0xff] %v3333_v39  ;;  %4580 = vst [vmem:[#allocation70_spill] sm:$0xff] %v3335_v25  ;;  %v1203_v32 = vmul.f32 %v3329_v21, %v3185_v9  ;;  %v3348_v60 = vmul.f32 %v3331_v35, %v3187_v27  ;;  %v1181_v54 = vadd.f32 %v1177_v34, %v1073_v42  ;;  %v3368_v34 = vld [vmem:[#allocation7 + $0x1a] ss:$0 sm:$0xff]  ;;  %v3415_v21 = vld [vmem:[#allocation7 + $0x33] ss:$0 sm:$0xff] }
 0x235   : > { %707 = vst [vmem:[#allocation2 + $0x68] sm:$0xff] %v3335_v25  ;;  %v1155_v16 = vadd.f32 %v1151_v15, %v1047_v4  ;;  %4581 = vst [vmem:[#allocation71_spill] sm:$0xff] %v3357_v37  ;;  %v1194_v52 = vadd.f32 %v1190_v26, %v1086_v50  ;;  %v1167_v51 = vadd.f32 %v3181_v0, %v1059_v5  ;;  %v699_v0 = vpop.f32.mrb[16].mxu1 }
 0x236   : > { %4582 = vst [vmem:[#allocation72_spill] sm:$0xff] %v3360_v45  ;;  %v960_v58 = vmul.f32 %v3231_v59, %v3257_v31  ;;  %v1207_v42 = vadd.f32 %v1203_v32, %v1099_v20  ;;  %v3372_v4 = vmul.f32 %v3360_v45, %v3205_v40  ;;  %708 = vst [vmem:[#allocation2 + $0x70] sm:$0x3] %v699_v0  ;;  %v2436_v59 = vpop.f32.mrb[17].mxu1 }
 0x237   : > { %v3338_v47 = vld [vmem:[#allocation2 + $0x51] sm:$0xff]  ;;  %4586 = vst [vmem:[#allocation76_spill] sm:$0xff] %v3415_v21 }
 0x238   : > { %v3340_v8 = vld [vmem:[#allocation2 + $0x52] sm:$0xff]  ;;  %v1258_v38 = vmul.f32 %v3308_v30, %v3338_v47  ;;  %v1271_v36 = vmul.f32 %v3306_v24, %v3338_v47 }
 0x239   : > { %v1582_v15 = vmul.f32 %v3342_v41, %v3340_v8  ;;  %v3374_v50 = vld [vmem:[#allocation2 + $0x59] sm:$0xff]  ;;  %v3378_v26 = vmul.f32 %v3351_v29, %v3340_v8 }
 0x23a   : > { %v1262_v6 = vadd.f32 %v1258_v38, %v1154_v46  ;;  %v1275_v5 = vadd.f32 %v1271_v36, %v1167_v51  ;;  %v964_v46 = vadd.f32 %v960_v58, %v3053_v22  ;;  %v1004_v38 = vadd.f32 %v1000_v13, %v3095_v7  ;;  %v3391_v36 = vld [vmem:[#allocation7 + $0x30] ss:$0 sm:$0xff]  ;;  %v3403_v13 = vld [vmem:[#allocation7 + $0x31] ss:$0 sm:$0xff] }
 0x23b   : > { %v1272_v20 = vmul.f32 %v3306_v24, %v3374_v50  ;;  %v1285_v25 = vmul.f32 %v3357_v37, %v3374_v50  ;;  %v1284_v51 = vmul.f32 %v3357_v37, %v3338_v47  ;;  %4583 = vst [vmem:[#allocation73_spill] sm:$0xff] %v3391_v36  ;;  %v1259_v22 = vmul.f32 %v3308_v30, %v3374_v50  ;;  %v3406_v37 = vld [vmem:[#allocation7 + $0x29] ss:$0 sm:$0xff] }
 0x23c   : > { %v1370_v32 = vadd.f32 %v3165_v48, %v1262_v6  ;;  %v1298_v59 = vmul.f32 %v3387_v1, %v3374_v50  ;;  %v3399_v7 = vmul.f32 %v3368_v34, %v3340_v8  ;;  %v1108_v6 = vmul.f32 %v3391_v36, %v3183_v55  ;;  %4584 = vst [vmem:[#allocation74_spill] sm:$0xff] %v3403_v13  ;;  %v3410_v30 = vld [vmem:[#allocation2 + $0x5a] sm:$0xff] }
 0x23d   : > { %v1276_v48 = vadd.f32 %v1272_v20, %v1168_v44  ;;  %v1289_v0 = vadd.f32 %v1285_v25, %v1181_v54  ;;  %4585 = vst [vmem:[#allocation75_spill] sm:$0xff] %v3406_v37  ;;  %v1216_v24 = vmul.f32 %v3403_v13, %v3185_v9  ;;  %v1263_v45 = vadd.f32 %v1259_v22, %v1155_v16  ;;  %v3423_v20 = vld [vmem:[#allocation7 + $0x34] ss:$0 sm:$0xff] }
 0x23e   : > { %v1478_v58 = vadd.f32 %v3169_v49, %v1370_v32  ;;  %v1302_v39 = vadd.f32 %v1298_v59, %v1194_v52  ;;  %v1383_v35 = vadd.f32 %v3191_v28, %v1275_v5  ;;  %v1311_v36 = vmul.f32 %v3406_v37, %v3374_v50  ;;  %4588 = vst [vmem:[#allocation78_spill] sm:$0xff] %v3423_v20  ;;  %v3445_v59 = vld [vmem:[#allocation7 + $0x32] ss:$0 sm:$0xff] }
 0x23f   : > { %v1384_v44 = vadd.f32 %v3243_v19, %v1276_v48  ;;  %v1397_v25 = vadd.f32 %v3263_v11, %v1289_v0  ;;  %v1432_v54 = vmul.f32 %v3415_v21, %v3187_v27  ;;  %v1371_v52 = vadd.f32 %v3312_v17, %v1263_v45  ;;  %4590 = vst [vmem:[#allocation80_spill] sm:$0xff] %v3445_v59 }
 0x240   : > { %v3418_v49 = vadd.f32 %v1582_v15, %v1478_v58  ;;  %v1410_v28 = vadd.f32 %v3323_v3, %v1302_v39  ;;  %v1315_v16 = vadd.f32 %v1311_v36, %v1207_v42  ;;  %v1540_v5 = vmul.f32 %v3423_v20, %v3205_v40 }
 0x241   : > { %v1492_v32 = vadd.f32 %v3247_v2, %v1384_v44  ;;  %v1596_v19 = vmul.f32 %v3351_v29, %v3410_v30  ;;  %v1072_v11 = vadd.f32 %v3199_v62, %v964_v46  ;;  %v1112_v15 = vadd.f32 %v1108_v6, %v1004_v38  ;;  %v3447_v62 = vld [vmem:[#allocation7 + $0x38] ss:$0 sm:$0xff] }
 0x242   : > { %4587 = vst [vmem:[#allocation77_spill] sm:$0xff] %v3418_v49  ;;  %1681 = vrot.lane.b32.xlu0 %v3418_v49, %s2732_s15  ;;  %v1479_v45 = vadd.f32 %v3316_v43, %v1371_v52  ;;  %v1583_v17 = vmul.f32 %v3342_v41, %v3410_v30  ;;  %v1491_v3 = vadd.f32 %v3195_v63, %v1383_v35  ;;  %4591 = vst [vmem:[#allocation81_spill] sm:$0xff] %v3447_v62  ;;  %v3453_v63 = vld [vmem:[#allocation7 + $0x23] ss:$0 sm:$0xff] }
 0x243   : > { %v1423_v39 = vadd.f32 %v3348_v60, %v1315_v16  ;;  %v3440_v2 = vadd.f32 %v1596_v19, %v1492_v32  ;;  %v1505_v42 = vadd.f32 %v3267_v12, %v1397_v25  ;;  %v1518_v36 = vadd.f32 %v3327_v14, %v1410_v28  ;;  %v3462_v14 = vld [vmem:[#allocation7 + $0x2c] ss:$0 sm:$0xff]  ;;  %v3480_v25 = vld [vmem:[#allocation7 + $0x35] ss:$0 sm:$0xff]  ;;  %v3483_v28 = vld [vmem:[#allocation7 + $0x39] ss:$0 sm:$0xff] }
 0x244   : > { %v1180_v22 = vadd.f32 %v3203_v61, %v1072_v11  ;;  %v1609_v43 = vmul.f32 %v3368_v34, %v3410_v30  ;;  %v3451_v46 = vadd.f32 %v1583_v17, %v1479_v45  ;;  %v1220_v35 = vadd.f32 %v1216_v24, %v1112_v15  ;;  %4593 = vst [vmem:[#allocation83_spill] sm:$0xff] %v3462_v14  ;;  %v4600_v15 = vld [vmem:[#allocation56_spill] sm:$0xff]  ;;  %v3498_v45 = vld [vmem:[#allocation7 + $0x3a] ss:$0 sm:$0xff]  ;;  %v3500_v17 = vld [vmem:[#allocation7 + $0x3b] ss:$0 sm:$0xff] }
 0x245   : > { %4589 = vst [vmem:[#allocation79_spill] sm:$0xff] %v3440_v2  ;;  %v1324_v60 = vmul.f32 %v3445_v59, %v3374_v50  ;;  %1713 = vrot.lane.b32.xlu1 %v3440_v2, %s2732_s15  ;;  %v1622_v61 = vmul.f32 %v3453_v63, %v3410_v30  ;;  %v1531_v12 = vadd.f32 %v3372_v4, %v1423_v39  ;;  %4597 = vst [vmem:[#allocation87_spill] sm:$0xff] %v3480_v25 }
 0x246   : > { %4592 = vst [vmem:[#allocation82_spill] sm:$0xff] %v3451_v46  ;;  %v1288_v38 = vadd.f32 %v1284_v51, %v1180_v22  ;;  %v973_v6 = vmul.f32 %v3253_v33, %v3257_v31  ;;  %1683 = vrot.lane.b32.xlu0 %v3451_v46, %s2732_s15  ;;  %v3469_v24 = vadd.f32 %v3378_v26, %v1491_v3  ;;  %4598 = vst [vmem:[#allocation88_spill] sm:$0xff] %v3483_v28  ;;  %v3512_v22 = vld [vmem:[#allocation7 + $0x41] ss:$0 sm:$0xff]  ;;  %v3557_v46 = vld [vmem:[#allocation7 + $0x44] ss:$0 sm:$0xff] }
 0x247   : > { %v1635_v48 = vmul.f32 %v3462_v14, %v3410_v30  ;;  %v1328_v58 = vadd.f32 %v1324_v60, %v1220_v35  ;;  %v1013_v0 = vmul.f32 %v3447_v62, %v3259_v10  ;;  %v3475_v4 = vadd.f32 %v1609_v43, %v1505_v42  ;;  %4601 = vst [vmem:[#allocation56_spill] sm:$0xff] %v3498_v45  ;;  %v4603_v42 = vld [vmem:[#allocation63_spill] sm:$0xff]  ;;  %v4604_v35 = vld [vmem:[#allocation57_spill] sm:$0xff] }
 0x248   : > { %4594 = vst [vmem:[#allocation84_spill] sm:$0xff] %v3469_v24  ;;  %v3477_v44 = vadd.f32 %v1622_v61, %v1518_v36  ;;  %v1396_v51 = vadd.f32 %v3209_v57, %v1288_v38  ;;  %v977_v52 = vadd.f32 %v973_v6, %v3055_v23  ;;  %v1648_v16 = vmul.f32 %v3480_v25, %v3410_v30 }
 0x249   : > { %4595 = vst [vmem:[#allocation85_spill] sm:$0xff] %v3475_v4  ;;  %v1436_v26 = vadd.f32 %v1432_v54, %v1328_v58  ;;  %v1017_v32 = vadd.f32 %v1013_v0, %v3109_v18  ;;  %v1121_v19 = vmul.f32 %v3483_v28, %v3183_v55  ;;  %1743 = vrot.lane.b32.xlu1 %v3475_v4, %s2732_s15  ;;  %4602 = vst [vmem:[#allocation90_spill] sm:$0xff] %v3500_v17  ;;  %v3524_v58 = vld [vmem:[#allocation7 + $0x3e] ss:$0 sm:$0xff] }
 0x24a   : > { %4596 = vst [vmem:[#allocation86_spill] sm:$0xff] %v3477_v44  ;;  %v3492_v11 = vadd.f32 %v1635_v48, %v1531_v12  ;;  %v1504_v57 = vadd.f32 %v3213_v56, %v1396_v51  ;;  %v1085_v23 = vadd.f32 %v4600_v15, %v977_v52  ;;  %v1297_v54 = vmul.f32 %v3387_v1, %v3338_v47  ;;  %v3508_v56 = vld [vmem:[#allocation7 + $0x3c] ss:$0 sm:$0xff]  ;;  %v3522_v48 = vld [vmem:[#allocation7 + $0x3d] ss:$0 sm:$0xff]  ;;  %v4607_v52 = vld [vmem:[#allocation39_spill] sm:$0xff] }
 0x24b   : > { %1711 = vrot.lane.b32.xlu0 %v3469_v24, %s2732_s15  ;;  %v1125_v18 = vadd.f32 %v1121_v19, %v1017_v32  ;;  %v1229_v3 = vmul.f32 %v3498_v45, %v3185_v9  ;;  %v1337_v39 = vmul.f32 %v3500_v17, %v3374_v50  ;;  %v986_v36 = vmul.f32 %v4603_v42, %v3257_v31  ;;  %v4606_v0 = vld [vmem:[#allocation25_spill] sm:$0xff] }
 0x24c   : > { %4599 = vst [vmem:[#allocation89_spill] sm:$0xff] %v3492_v11  ;;  %v1544_v43 = vadd.f32 %v1540_v5, %v1436_v26  ;;  %v1193_v60 = vadd.f32 %v4604_v35, %v1085_v23  ;;  %v1621_v61 = vmul.f32 %v3453_v63, %v3340_v8  ;;  %v1445_v12 = vmul.f32 %v3508_v56, %v3187_v27  ;;  %v4608_v23 = vld [vmem:[#allocation40_spill] sm:$0xff] }
 0x24d   : > { %v3520_v38 = vadd.f32 %v3399_v7, %v1504_v57  ;;  %v1233_v6 = vadd.f32 %v1229_v3, %v1125_v18  ;;  %v990_v51 = vadd.f32 %v986_v36, %v4606_v0  ;;  %v1094_v5 = vmul.f32 %v3295_v53, %v4607_v52  ;;  %1773 = vrot.lane.b32.xlu1 %v3477_v44, %s2732_s15  ;;  %v4609_v18 = vld [vmem:[#allocation67_spill] sm:$0xff]  ;;  %v3543_v36 = vld [vmem:[#allocation7 + $0x42] ss:$0 sm:$0xff] }
 0x24e   : > { %v1301_v26 = vadd.f32 %v1297_v54, %v1193_v60  ;;  %v1553_v32 = vmul.f32 %v3522_v48, %v3205_v40  ;;  %v1661_v7 = vmul.f32 %v3524_v58, %v3410_v30  ;;  %v1026_v19 = vmul.f32 %v3512_v22, %v3259_v10  ;;  %v4611_v60 = vld [vmem:[#allocation61_spill] sm:$0xff]  ;;  %v4612_v44 = vld [vmem:[#allocation42_spill] sm:$0xff] }
 0x24f   : > { %4605 = vst [vmem:[#allocation63_spill] sm:$0xff] %v3520_v38  ;;  %1741 = vrot.lane.b32.xlu0 %v3520_v38, %s2732_s15  ;;  %v1341_v57 = vadd.f32 %v1337_v39, %v1233_v6  ;;  %v1098_v15 = vadd.f32 %v1094_v5, %v990_v51  ;;  %v1202_v3 = vmul.f32 %v4609_v18, %v4608_v23  ;;  %v3551_v38 = vld [vmem:[#allocation7 + $0x43] ss:$0 sm:$0xff]  ;;  %v4613_v51 = vld [vmem:[#allocation41_spill] sm:$0xff]  ;;  %v4614_v5 = vld [vmem:[#allocation68_spill] sm:$0xff] }
 0x250   : > { %v1310_v54 = vmul.f32 %v3406_v37, %v3338_v47  ;;  %v3545_v35 = vadd.f32 %v1648_v16, %v1544_v43  ;;  %v1409_v0 = vadd.f32 %v4611_v60, %v1301_v26  ;;  %v1030_v4 = vadd.f32 %v1026_v19, %v4612_v44  ;;  %v4615_v16 = vld [vmem:[#allocation62_spill] sm:$0xff]  ;;  %v4619_v60 = vld [vmem:[#allocation73_spill] sm:$0xff]  ;;  %v4642_v37 = vld [vmem:[#allocation52_spill] sm:$0xff] }
 0x251   : > { %v1134_v10 = vmul.f32 %v3543_v36, %v3183_v55  ;;  %v1449_v39 = vadd.f32 %v1445_v12, %v1341_v57  ;;  %v1206_v6 = vadd.f32 %v1202_v3, %v1098_v15  ;;  %v1418_v24 = vmul.f32 %v4614_v5, %v4613_v51  ;;  %1803 = vrot.lane.b32.xlu1 %v3492_v11, %s2732_s15  ;;  %v4616_v12 = vld [vmem:[#allocation69_spill] sm:$0xff]  ;;  %v4617_v57 = vld [vmem:[#allocation43_spill] sm:$0xff]  ;;  %v4618_v15 = vld [vmem:[#allocation72_spill] sm:$0xff] }
 0x252   : > { %4610 = vst [vmem:[#allocation57_spill] sm:$0xff] %v3545_v35  ;;  %v1242_v2 = vmul.f32 %v3551_v38, %v3185_v9  ;;  %v1517_v44 = vadd.f32 %v4615_v16, %v1409_v0  ;;  %v1350_v55 = vmul.f32 %v3557_v46, %v3374_v50  ;;  %v999_v26 = vmul.f32 %v4616_v12, %v3257_v31  ;;  %v4621_v50 = vld [vmem:[#allocation31_spill] sm:$0xff]  ;;  %v4643_v18 = vld [vmem:[#allocation53_spill] sm:$0xff] }
 0x253   : > { %v1138_v43 = vadd.f32 %v1134_v10, %v1030_v4  ;;  %v1314_v19 = vadd.f32 %v1310_v54, %v1206_v6  ;;  %v1526_v3 = vmul.f32 %v4618_v15, %v4617_v57  ;;  %v1634_v9 = vmul.f32 %v3462_v14, %v3340_v8  ;;  %v3574_v10 = vld [vmem:[#allocation7 + $0x45] ss:$0 sm:$0xff] }
 0x254   : > { %v1107_v49 = vmul.f32 %v4619_v60, %v4607_v52  ;;  %v3572_v11 = vadd.f32 %v1621_v61, %v1517_v44  ;;  %v1557_v0 = vadd.f32 %v1553_v32, %v1449_v39  ;;  %v1003_v16 = vadd.f32 %v999_v26, %v4621_v50  ;;  %v3587_v61 = vld [vmem:[#allocation7 + $0x46] ss:$0 sm:$0xff]  ;;  %v3589_v32 = vld [vmem:[#allocation7 + $0x47] ss:$0 sm:$0xff]  ;;  %v4622_v39 = vld [vmem:[#allocation45_spill] sm:$0xff] }
 0x255   : > { %v1246_v4 = vadd.f32 %v1242_v2, %v1138_v43  ;;  %v1422_v5 = vadd.f32 %v1418_v24, %v1314_v19  ;;  %v1458_v54 = vmul.f32 %v3574_v10, %v3187_v27  ;;  %v1215_v6 = vmul.f32 %v3403_v13, %v4608_v23  ;;  %1833 = vrot.lane.b32.xlu1 %v3545_v35, %s2732_s15  ;;  %v4623_v27 = vld [vmem:[#allocation46_spill] sm:$0xff]  ;;  %v4624_v35 = vld [vmem:[#allocation64_spill] sm:$0xff] }
 0x256   : > { %4620 = vst [vmem:[#allocation25_spill] sm:$0xff] %v3572_v11  ;;  %v1323_v14 = vmul.f32 %v3445_v59, %v3338_v47  ;;  %1771 = vrot.lane.b32.xlu0 %v3572_v11, %s2732_s15  ;;  %v1111_v24 = vadd.f32 %v1107_v49, %v1003_v16  ;;  %v832_v44 = vadd.f32 %v4623_v27, %v4622_v39  ;;  %v3593_v43 = vld [vmem:[#allocation2 + $0x11] sm:$0xff]  ;;  %v4625_v11 = vld [vmem:[#allocation59_spill] sm:$0xff] }
 0x257   : > { %v1354_v2 = vadd.f32 %v1350_v55, %v1246_v4  ;;  %v1530_v26 = vadd.f32 %v1526_v3, %v1422_v5  ;;  %v1566_v19 = vmul.f32 %v3587_v61, %v3205_v40  ;;  %v1674_v50 = vmul.f32 %v3589_v32, %v3410_v30  ;;  %v3605_v16 = vld [vmem:[#allocation2 + $0x39] sm:$0xff]  ;;  %v3607_v39 = vld [vmem:[#allocation2 + $0x61] sm:$0xff] }
 0x258   : > { %v936_v55 = vmul.f32 %v4625_v11, %v4624_v35  ;;  %v3601_v4 = vadd.f32 %v1661_v7, %v1557_v0  ;;  %v1219_v13 = vadd.f32 %v1215_v6, %v1111_v24  ;;  %v1431_v49 = vmul.f32 %v3415_v21, %v4613_v51  ;;  %v4628_v3 = vld [vmem:[#allocation28_spill] sm:$0xff]  ;;  %v4638_v60 = vld [vmem:[#allocation70_spill] sm:$0xff] }
 0x259   : > { %v1462_v59 = vadd.f32 %v1458_v54, %v1354_v2  ;;  %v3609_v5 = vadd.f32 %v1634_v9, %v1530_v26  ;;  %v1539_v40 = vmul.f32 %v3423_v20, %v4617_v57  ;;  %v1044_v27 = vmul.f32 %v4628_v3, %v3593_v43  ;;  %v4629_v54 = vld [vmem:[#allocation47_spill] sm:$0xff]  ;;  %v4630_v6 = vld [vmem:[#allocation48_spill] sm:$0xff]  ;;  %v4631_v26 = vld [vmem:[#allocation29_spill] sm:$0xff] }
 0x25a   : > { %4626 = vst [vmem:[#allocation39_spill] sm:$0xff] %v3601_v4  ;;  %v940_v30 = vadd.f32 %v936_v55, %v832_v44  ;;  %1863 = vrot.lane.b32.xlu1 %v3601_v4, %s2732_s15  ;;  %v1327_v0 = vadd.f32 %v1323_v14, %v1219_v13  ;;  %v908_v2 = vadd.f32 %v4630_v6, %v4629_v54  ;;  %v4632_v4 = vld [vmem:[#allocation66_spill] sm:$0xff]  ;;  %v3635_v6 = vld [vmem:[#allocation2 + $0x62] sm:$0xff] }
 0x25b   : > { %4627 = vst [vmem:[#allocation40_spill] sm:$0xff] %v3609_v5  ;;  %v1570_v7 = vadd.f32 %v1566_v19, %v1462_v59  ;;  %v1012_v24 = vmul.f32 %v3447_v62, %v3257_v31  ;;  %1801 = vrot.lane.b32.xlu0 %v3609_v5, %s2732_s15  ;;  %v1647_v9 = vmul.f32 %v3480_v25, %v3340_v8  ;;  %v3631_v19 = vld [vmem:[#allocation2 + $0x12] sm:$0xff]  ;;  %v3633_v54 = vld [vmem:[#allocation2 + $0x3a] sm:$0xff] }
 0x25c   : > { %v1048_v44 = vadd.f32 %v1044_v27, %v940_v30  ;;  %v1152_v55 = vmul.f32 %v4631_v26, %v3605_v16  ;;  %v1260_v59 = vmul.f32 %v4632_v4, %v3607_v39  ;;  %v1435_v14 = vadd.f32 %v1431_v49, %v1327_v0  ;;  %v4636_v62 = vld [vmem:[#allocation38_spill] sm:$0xff] }
 0x25d   : > { %v3629_v13 = vadd.f32 %v1674_v50, %v1570_v7  ;;  %v1016_v5 = vadd.f32 %v1012_v24, %v908_v2  ;;  %v1120_v25 = vmul.f32 %v3483_v28, %v4607_v52  ;;  %v1228_v27 = vmul.f32 %v3498_v45, %v4608_v23  ;;  %v4634_v50 = vld [vmem:[#allocation37_spill] sm:$0xff]  ;;  %v4637_v2 = vld [vmem:[#allocation18_spill] sm:$0xff] }
 0x25e   : > { %v1156_v30 = vadd.f32 %v1152_v55, %v1048_v44  ;;  %v1336_v20 = vmul.f32 %v3500_v17, %v3338_v47  ;;  %v4635_v7 = vld [vmem:[#allocation17_spill] sm:$0xff]  ;;  %v1543_v0 = vadd.f32 %v1539_v40, %v1435_v14  ;;  %v829_v24 = vmul.f32 %v4637_v2, %v4636_v62  ;;  %v4639_v45 = vld [vmem:[#allocation30_spill] sm:$0xff] }
 0x25f   : > { %4633 = vst [vmem:[#allocation61_spill] sm:$0xff] %v3629_v13  ;;  %v721_v49 = vmul.f32 %v4635_v7, %v4634_v50  ;;  %1893 = vrot.lane.b32.xlu1 %v3629_v13, %s2732_s15  ;;  %v1124_v21 = vadd.f32 %v1120_v25, %v1016_v5  ;;  %v937_v44 = vmul.f32 %v4625_v11, %v4638_v60  ;;  %v4640_v17 = vld [vmem:[#allocation34_spill] sm:$0xff]  ;;  %v3663_v11 = vld [vmem:[#allocation2 + $0x41] sm:$0xff] }
 0x260   : > { %v1264_v55 = vadd.f32 %v1260_v59, %v1156_v30  ;;  %v1368_v28 = vmul.f32 %v4639_v45, %v3631_v19  ;;  %v1476_v15 = vmul.f32 %v4640_v17, %v3633_v54  ;;  %v1584_v7 = vmul.f32 %v3342_v41, %v3635_v6  ;;  %v3657_v12 = vld [vmem:[#allocation2 + $0x19] sm:$0xff]  ;;  %v3665_v59 = vld [vmem:[#allocation2 + $0x69] sm:$0xff] }
 0x261   : > { %v3659_v40 = vadd.f32 %v1647_v9, %v1543_v0  ;;  %v1232_v25 = vadd.f32 %v1228_v27, %v1124_v21  ;;  %v1444_v5 = vmul.f32 %v3508_v56, %v4613_v51  ;;  %v833_v14 = vadd.f32 %v829_v24, %v721_v49 }
 0x262   : > { %v1372_v30 = vadd.f32 %v1368_v28, %v1264_v55  ;;  %v1552_v2 = vmul.f32 %v3522_v48, %v4617_v57  ;;  %v1660_v13 = vmul.f32 %v3524_v58, %v3340_v8  ;;  %v921_v9 = vadd.f32 %v4643_v18, %v4642_v37 }
 0x263   : > { %4641 = vst [vmem:[#allocation42_spill] sm:$0xff] %v3659_v40  ;;  %1831 = vrot.lane.b32.xlu0 %v3659_v40, %s2732_s15  ;;  %v1340_v21 = vadd.f32 %v1336_v20, %v1232_v25  ;;  %v941_v27 = vadd.f32 %v937_v44, %v833_v14  ;;  %v1045_v49 = vmul.f32 %v4628_v3, %v3657_v12  ;;  %v3685_v20 = vld [vmem:[#allocation2 + $0x1a] sm:$0xff] }
 0x264   : > { %v1025_v28 = vmul.f32 %v3512_v22, %v3257_v31  ;;  %v1480_v0 = vadd.f32 %v1476_v15, %v1372_v30  ;;  %v1153_v24 = vmul.f32 %v4631_v26, %v3663_v11  ;;  %v1261_v55 = vmul.f32 %v4632_v4, %v3665_v59  ;;  %v3691_v31 = vld [vmem:[#allocation2 + $0x42] sm:$0xff] }
 0x265   : > { %v1133_v37 = vmul.f32 %v3543_v36, %v4607_v52  ;;  %v1448_v18 = vadd.f32 %v1444_v5, %v1340_v21  ;;  %v1049_v40 = vadd.f32 %v1045_v49, %v941_v27  ;;  %v1241_v3 = vmul.f32 %v3551_v38, %v4608_v23  ;;  %v4645_v4 = vld [vmem:[#allocation15_spill] sm:$0xff]  ;;  %v4646_v52 = vld [vmem:[#allocation16_spill] sm:$0xff] }
 0x266   : > { %v1029_v44 = vadd.f32 %v1025_v28, %v921_v9  ;;  %v3689_v25 = vadd.f32 %v1584_v7, %v1480_v0  ;;  %v1349_v15 = vmul.f32 %v3557_v46, %v3338_v47  ;;  %v734_v26 = vmul.f32 %v4645_v4, %v4634_v50  ;;  %v4647_v9 = vld [vmem:[#allocation58_spill] sm:$0xff]  ;;  %v3709_v0 = vld [vmem:[#allocation2 + $0x6a] sm:$0xff] }
 0x267   : > { %v842_v5 = vmul.f32 %v4646_v52, %v4636_v62  ;;  %v1556_v14 = vadd.f32 %v1552_v2, %v1448_v18  ;;  %v1157_v30 = vadd.f32 %v1153_v24, %v1049_v40  ;;  %v950_v27 = vmul.f32 %v4647_v9, %v4638_v60 }
 0x268   : > { %4644 = vst [vmem:[#allocation41_spill] sm:$0xff] %v3689_v25  ;;  %v1137_v21 = vadd.f32 %v1133_v37, %v1029_v44  ;;  %1685 = vrot.lane.b32.xlu1 %v3689_v25, %s2732_s15  ;;  %v1369_v23 = vmul.f32 %v4639_v45, %v3685_v20  ;;  %v1477_v28 = vmul.f32 %v4640_v17, %v3691_v31  ;;  %v4648_v37 = vld [vmem:[#allocation26_spill] sm:$0xff]  ;;  %v4649_v44 = vld [vmem:[#allocation23_spill] sm:$0xff] }
 0x269   : > { %v846_v7 = vadd.f32 %v842_v5, %v734_v26  ;;  %v3705_v47 = vadd.f32 %v1660_v13, %v1556_v14  ;;  %v1265_v49 = vadd.f32 %v1261_v55, %v1157_v30  ;;  %v1457_v2 = vmul.f32 %v3574_v10, %v4613_v51  ;;  %v4650_v26 = vld [vmem:[#allocation24_spill] sm:$0xff]  ;;  %v4651_v14 = vld [vmem:[#allocation27_spill] sm:$0xff] }
 0x26a   : > { %v1245_v40 = vadd.f32 %v1241_v3, %v1137_v21  ;;  %v1058_v18 = vmul.f32 %v4648_v37, %v3657_v12  ;;  %v733_v45 = vmul.f32 %v4645_v4, %v4649_v44  ;;  %v841_v17 = vmul.f32 %v4646_v52, %v4650_v26  ;;  %v4652_v4 = vld [vmem:[#allocation65_spill] sm:$0xff] }
 0x26b   : > { %v954_v24 = vadd.f32 %v950_v27, %v846_v7  ;;  %1861 = vrot.lane.b32.xlu0 %v3705_v47, %s2732_s15  ;;  %v1373_v13 = vadd.f32 %v1369_v23, %v1265_v49  ;;  %v949_v3 = vmul.f32 %v4647_v9, %v4624_v35  ;;  %v1585_v51 = vmul.f32 %v3342_v41, %v3709_v0  ;;  %v4653_v49 = vld [vmem:[#allocation19_spill] sm:$0xff] }
 0x26c   : > { %v1353_v55 = vadd.f32 %v1349_v15, %v1245_v40  ;;  %v1166_v30 = vmul.f32 %v4651_v14, %v3663_v11  ;;  %v1274_v21 = vmul.f32 %v4652_v4, %v3665_v59  ;;  %v1565_v15 = vmul.f32 %v3587_v61, %v4617_v57  ;;  %v4655_v57 = vld [vmem:[#allocation32_spill] sm:$0xff] }
 0x26d   : > { %v1062_v5 = vadd.f32 %v1058_v18, %v954_v24  ;;  %v1481_v27 = vadd.f32 %v1477_v28, %v1373_v13  ;;  %v845_v23 = vadd.f32 %v841_v17, %v733_v45  ;;  %v1673_v52 = vmul.f32 %v3589_v32, %v3340_v8  ;;  %v4654_v28 = vld [vmem:[#allocation20_spill] sm:$0xff] }
 0x26e   : > { %v1461_v7 = vadd.f32 %v1457_v2, %v1353_v55  ;;  %v1057_v41 = vmul.f32 %v4648_v37, %v3593_v43  ;;  %v747_v40 = vmul.f32 %v4653_v49, %v4634_v50  ;;  %v855_v2 = vmul.f32 %v4654_v28, %v4636_v62  ;;  %v4656_v55 = vld [vmem:[#allocation60_spill] sm:$0xff] }
 0x26f   : > { %v1170_v9 = vadd.f32 %v1166_v30, %v1062_v5  ;;  %v3737_v24 = vadd.f32 %v1585_v51, %v1481_v27  ;;  %v953_v25 = vadd.f32 %v949_v3, %v845_v23  ;;  %v1382_v45 = vmul.f32 %v4655_v57, %v3685_v20 }
 0x270   : > { %v1569_v18 = vadd.f32 %v1565_v15, %v1461_v7  ;;  %v1165_v8 = vmul.f32 %v4651_v14, %v3605_v16  ;;  %v963_v37 = vmul.f32 %v4656_v55, %v4638_v60  ;;  %v1273_v3 = vmul.f32 %v4652_v4, %v3607_v39  ;;  %v4658_v7 = vld [vmem:[#allocation35_spill] sm:$0xff] }
 0x271   : > { %v1278_v13 = vadd.f32 %v1274_v21, %v1170_v9  ;;  %1687 = vrot.lane.b32.xlu1 %v3737_v24, %s2732_s15  ;;  %v1061_v51 = vadd.f32 %v1057_v41, %v953_v25  ;;  %v859_v5 = vadd.f32 %v855_v2, %v747_v40  ;;  %v4657_v21 = vld [vmem:[#allocation33_spill] sm:$0xff]  ;;  %v1598_v14 = vmul.f32 %v3351_v29, %v3709_v0  ;;  %v4659_v40 = vld [vmem:[#allocation36_spill] sm:$0xff] }
 0x272   : > { %v3749_v17 = vadd.f32 %v1673_v52, %v1569_v18  ;;  %v1490_v27 = vmul.f32 %v4657_v21, %v3691_v31  ;;  %v1071_v15 = vmul.f32 %v4658_v7, %v3657_v12  ;;  %v746_v25 = vmul.f32 %v4653_v49, %v4649_v44 }
 0x273   : > { %v1386_v30 = vadd.f32 %v1382_v45, %v1278_v13  ;;  %v1169_v23 = vadd.f32 %v1165_v8, %v1061_v51  ;;  %v967_v52 = vadd.f32 %v963_v37, %v859_v5  ;;  %v854_v4 = vmul.f32 %v4654_v28, %v4650_v26  ;;  %v4660_v8 = vld [vmem:[#allocation71_spill] sm:$0xff] }
 0x274   : > { %1891 = vrot.lane.b32.xlu0 %v3749_v17, %s2732_s15  ;;  %v1381_v41 = vmul.f32 %v4655_v57, %v3631_v19  ;;  %v1179_v18 = vmul.f32 %v4659_v40, %v3663_v11  ;;  %v962_v2 = vmul.f32 %v4656_v55, %v4624_v35  ;;  %v1287_v37 = vmul.f32 %v4660_v8, %v3665_v59 }
 0x275   : > { %v1494_v9 = vadd.f32 %v1490_v27, %v1386_v30  ;;  %v1277_v13 = vadd.f32 %v1273_v3, %v1169_v23  ;;  %v1075_v45 = vadd.f32 %v1071_v15, %v967_v52  ;;  %v858_v51 = vadd.f32 %v854_v4, %v746_v25  ;;  %v4662_v3 = vld [vmem:[#allocation21_spill] sm:$0xff] }
 0x276   : > { %v1489_v28 = vmul.f32 %v4657_v21, %v3633_v54  ;;  %v1597_v57 = vmul.f32 %v3351_v29, %v3635_v6  ;;  %v1070_v5 = vmul.f32 %v4658_v7, %v3593_v43  ;;  %v760_v15 = vmul.f32 %v4662_v3, %v4634_v50  ;;  %v4664_v29 = vld [vmem:[#allocation22_spill] sm:$0xff] }
 0x277   : > { %v3773_v49 = vadd.f32 %v1598_v14, %v1494_v9  ;;  %v1385_v30 = vadd.f32 %v1381_v41, %v1277_v13  ;;  %v1183_v27 = vadd.f32 %v1179_v18, %v1075_v45  ;;  %v966_v55 = vadd.f32 %v962_v2, %v858_v51  ;;  %v4663_v14 = vld [vmem:[#allocation44_spill] sm:$0xff]  ;;  %v4665_v18 = vld [vmem:[#allocation49_spill] sm:$0xff] }
 0x278   : > { %v1395_v23 = vmul.f32 %v4663_v14, %v3685_v20  ;;  %v1178_v21 = vmul.f32 %v4659_v40, %v3605_v16  ;;  %v868_v52 = vmul.f32 %v4664_v29, %v4636_v62  ;;  %v976_v7 = vmul.f32 %v3253_v33, %v4638_v60 }
 0x279   : > { %4661 = vst [vmem:[#allocation62_spill] sm:$0xff] %v3773_v49  ;;  %1717 = vrot.lane.b32.xlu1 %v3773_v49, %s2732_s15  ;;  %v1493_v25 = vadd.f32 %v1489_v28, %v1385_v30  ;;  %v1291_v4 = vadd.f32 %v1287_v37, %v1183_v27  ;;  %v1074_v9 = vadd.f32 %v1070_v5, %v966_v55  ;;  %v2563_v28 = vld [vmem:[#allocation7 + $0x1b] ss:$0 sm:$0xff]  ;;  %v2564_v27 = vld [vmem:[#allocation7 + $0x1c] ss:$0 sm:$0xff] }
 0x27a   : > { %v1286_v41 = vmul.f32 %v4660_v8, %v3607_v39  ;;  %v1503_v2 = vmul.f32 %v4665_v18, %v3691_v31  ;;  %v1611_v13 = vmul.f32 %v3368_v34, %v3709_v0  ;;  %v1394_v40 = vmul.f32 %v4663_v14, %v3631_v19  ;;  %v4666_v8 = vld [vmem:[#allocation50_spill] sm:$0xff] }
 0x27b   : > { %v872_v45 = vadd.f32 %v868_v52, %v760_v15  ;;  %v3801_v51 = vadd.f32 %v1597_v57, %v1493_v25  ;;  %v1399_v3 = vadd.f32 %v1395_v23, %v1291_v4  ;;  %v1182_v29 = vadd.f32 %v1178_v21, %v1074_v9  ;;  %v4667_v52 = vld [vmem:[#allocation51_spill] sm:$0xff] }
 0x27c   : > { %v759_v37 = vmul.f32 %v2563_v28, %v4649_v44  ;;  %v1084_v30 = vmul.f32 %v4666_v8, %v3657_v12  ;;  %v867_v55 = vmul.f32 %v2564_v27, %v4650_v26  ;;  %v975_v49 = vmul.f32 %v3253_v33, %v4624_v35 }
 0x27d   : > { %v980_v5 = vadd.f32 %v976_v7, %v872_v45  ;;  %1715 = vrot.lane.b32.xlu0 %v3801_v51, %s2732_s15  ;;  %v1507_v57 = vadd.f32 %v1503_v2, %v1399_v3  ;;  %v1290_v15 = vadd.f32 %v1286_v41, %v1182_v29  ;;  %v1502_v14 = vmul.f32 %v4665_v18, %v3633_v54  ;;  %v2565_v2 = vld [vmem:[#allocation7 + $0x24] ss:$0 sm:$0xff] }
 0x27e   : > { %v1610_v23 = vmul.f32 %v3368_v34, %v3635_v6  ;;  %v1192_v7 = vmul.f32 %v4667_v52, %v3663_v11  ;;  %v1300_v25 = vmul.f32 %v3387_v1, %v3665_v59  ;;  %v871_v4 = vadd.f32 %v867_v55, %v759_v37  ;;  %v2566_v34 = vld [vmem:[#allocation7 + $0x25] ss:$0 sm:$0xff] }
 0x27f   : > { %v1088_v21 = vadd.f32 %v1084_v30, %v980_v5  ;;  %v3819_v33 = vadd.f32 %v1611_v13, %v1507_v57  ;;  %v1398_v9 = vadd.f32 %v1394_v40, %v1290_v15  ;;  %v1083_v41 = vmul.f32 %v4666_v8, %v3593_v43  ;;  %v4669_v40 = vld [vmem:[#allocation54_spill] sm:$0xff]  ;;  %v4670_v5 = vld [vmem:[#allocation55_spill] sm:$0xff] }
 0x280   : > { %v773_v18 = vmul.f32 %v2565_v2, %v4634_v50  ;;  %v979_v3 = vadd.f32 %v975_v49, %v871_v4  ;;  %v881_v29 = vmul.f32 %v2566_v34, %v4636_v62  ;;  %v989_v28 = vmul.f32 %v4603_v42, %v4638_v60 }
 0x281   : > { %4668 = vst [vmem:[#allocation43_spill] sm:$0xff] %v3819_v33  ;;  %v1196_v45 = vadd.f32 %v1192_v7, %v1088_v21  ;;  %1747 = vrot.lane.b32.xlu1 %v3819_v33, %s2732_s15  ;;  %v1506_v13 = vadd.f32 %v1502_v14, %v1398_v9  ;;  %v1408_v37 = vmul.f32 %v4669_v40, %v3685_v20 }
 0x282   : > { %v1516_v8 = vmul.f32 %v4670_v5, %v3691_v31  ;;  %v1191_v30 = vmul.f32 %v4667_v52, %v3605_v16  ;;  %v1087_v27 = vadd.f32 %v1083_v41, %v979_v3  ;;  %v1299_v55 = vmul.f32 %v3387_v1, %v3607_v39  ;;  %v4673_v41 = vld [vmem:[#allocation75_spill] sm:$0xff] }
 0x283   : > { %v1304_v49 = vadd.f32 %v1300_v25, %v1196_v45  ;;  %v885_v57 = vadd.f32 %v881_v29, %v773_v18  ;;  %v3837_v15 = vadd.f32 %v1610_v23, %v1506_v13  ;;  %v1624_v14 = vmul.f32 %v3453_v63, %v3709_v0  ;;  %v4672_v23 = vld [vmem:[#allocation67_spill] sm:$0xff] }
 0x284   : > { %v1097_v21 = vmul.f32 %v3295_v53, %v3657_v12  ;;  %v772_v7 = vmul.f32 %v2565_v2, %v4649_v44  ;;  %v1195_v9 = vadd.f32 %v1191_v30, %v1087_v27  ;;  %v880_v52 = vmul.f32 %v2566_v34, %v4650_v26  ;;  %v2567_v13 = vld [vmem:[#allocation7 + $0x2d] ss:$0 sm:$0xff]  ;;  %v2568_v27 = vld [vmem:[#allocation7 + $0x2e] ss:$0 sm:$0xff] }
 0x285   : > { %4671 = vst [vmem:[#allocation31_spill] sm:$0xff] %v3837_v15  ;;  %v1412_v4 = vadd.f32 %v1408_v37, %v1304_v49  ;;  %v993_v33 = vadd.f32 %v989_v28, %v885_v57  ;;  %1745 = vrot.lane.b32.xlu0 %v3837_v15, %s2732_s15  ;;  %v1407_v1 = vmul.f32 %v4669_v40, %v3631_v19 }
 0x286   : > { %v1205_v25 = vmul.f32 %v4672_v23, %v3663_v11  ;;  %v1313_v18 = vmul.f32 %v4673_v41, %v3665_v59  ;;  %v988_v44 = vmul.f32 %v4603_v42, %v4624_v35  ;;  %v1303_v45 = vadd.f32 %v1299_v55, %v1195_v9  ;;  %v4676_v55 = vld [vmem:[#allocation69_spill] sm:$0xff]  ;;  %v4678_v9 = vld [vmem:[#allocation83_spill] sm:$0xff] }
 0x287   : > { %v1520_v2 = vadd.f32 %v1516_v8, %v1412_v4  ;;  %v1101_v3 = vadd.f32 %v1097_v21, %v993_v33  ;;  %v884_v29 = vadd.f32 %v880_v52, %v772_v7  ;;  %v1515_v26 = vmul.f32 %v4670_v5, %v3633_v54  ;;  %v4675_v33 = vld [vmem:[#allocation68_spill] sm:$0xff] }
 0x288   : > { %v1623_v34 = vmul.f32 %v3453_v63, %v3635_v6  ;;  %v1096_v28 = vmul.f32 %v3295_v53, %v3593_v43  ;;  %v786_v40 = vmul.f32 %v2567_v13, %v4634_v50  ;;  %v1411_v30 = vadd.f32 %v1407_v1, %v1303_v45  ;;  %v4677_v7 = vld [vmem:[#allocation72_spill] sm:$0xff] }
 0x289   : > { %v3862_v37 = vadd.f32 %v1624_v14, %v1520_v2  ;;  %v1209_v42 = vadd.f32 %v1205_v25, %v1101_v3  ;;  %v992_v8 = vadd.f32 %v988_v44, %v884_v29  ;;  %v1421_v49 = vmul.f32 %v4675_v33, %v3685_v20  ;;  %v3883_v2 = vld [vmem:[#allocation2 + $0x10] sm:$0xff]  ;;  %v3888_v29 = vld [vmem:[#allocation2 + $0x38] sm:$0xff] }
 0x28a   : > { %v1204_v5 = vmul.f32 %v4672_v23, %v3605_v16  ;;  %v894_v63 = vmul.f32 %v2568_v27, %v4636_v62  ;;  %v1002_v53 = vmul.f32 %v4676_v55, %v4638_v60  ;;  %v1519_v50 = vadd.f32 %v1515_v26, %v1411_v30 }
 0x28b   : > { %4674 = vst [vmem:[#allocation45_spill] sm:$0xff] %v3862_v37  ;;  %1777 = vrot.lane.b32.xlu1 %v3862_v37, %s2732_s15  ;;  %v1317_v57 = vadd.f32 %v1313_v18, %v1209_v42  ;;  %v1100_v14 = vadd.f32 %v1096_v28, %v992_v8  ;;  %v1312_v21 = vmul.f32 %v4673_v41, %v3607_v39  ;;  %v4680_v41 = vld [vmem:[#allocation73_spill] sm:$0xff]  ;;  %v4681_v8 = vld [vmem:[#allocation74_spill] sm:$0xff] }
 0x28c   : > { %v1529_v4 = vmul.f32 %v4677_v7, %v3691_v31  ;;  %v1637_v52 = vmul.f32 %v4678_v9, %v3709_v0  ;;  %v1420_v62 = vmul.f32 %v4675_v33, %v3631_v19  ;;  %v898_v1 = vadd.f32 %v894_v63, %v786_v40 }
 0x28d   : > { %v3881_v23 = vadd.f32 %v1623_v34, %v1519_v50  ;;  %v1425_v25 = vadd.f32 %v1421_v49, %v1317_v57  ;;  %v1208_v44 = vadd.f32 %v1204_v5, %v1100_v14  ;;  %v785_v18 = vmul.f32 %v3883_v2, %v2567_v13  ;;  %v4682_v49 = vld [vmem:[#allocation80_spill] sm:$0xff]  ;;  %v2572_v57 = vld [vmem:[#allocation2 + $0x18] sm:$0xff] }
 0x28e   : > { %v1006_v45 = vadd.f32 %v1002_v53, %v898_v1  ;;  %v1110_v3 = vmul.f32 %v4680_v41, %v3657_v12  ;;  %v893_v26 = vmul.f32 %v3888_v29, %v2568_v27  ;;  %v1001_v28 = vmul.f32 %v4676_v55, %v4624_v35  ;;  %v2571_v50 = vld [vmem:[#allocation7 + $0x36] ss:$0 sm:$0xff] }
 0x28f   : > { %4679 = vst [vmem:[#allocation46_spill] sm:$0xff] %v3881_v23  ;;  %1775 = vrot.lane.b32.xlu0 %v3881_v23, %s2732_s15  ;;  %v1533_v34 = vadd.f32 %v1529_v4, %v1425_v25  ;;  %v1316_v40 = vadd.f32 %v1312_v21, %v1208_v44  ;;  %v1528_v30 = vmul.f32 %v4677_v7, %v3633_v54  ;;  %v2573_v4 = vld [vmem:[#allocation7 + $0x37] ss:$0 sm:$0xff]  ;;  %v4684_v25 = vld [vmem:[#allocation81_spill] sm:$0xff] }
 0x290   : > { %v1636_v13 = vmul.f32 %v4678_v9, %v3635_v6  ;;  %v1114_v42 = vadd.f32 %v1110_v3, %v1006_v45  ;;  %v1218_v33 = vmul.f32 %v4681_v8, %v3663_v11  ;;  %v1326_v5 = vmul.f32 %v4682_v49, %v3665_v59  ;;  %v2574_v9 = vld [vmem:[#allocation2 + $0x40] sm:$0xff]  ;;  %v4686_v45 = vld [vmem:[#allocation78_spill] sm:$0xff] }
 0x291   : > { %v897_v27 = vadd.f32 %v893_v26, %v785_v18  ;;  %v3903_v63 = vadd.f32 %v1637_v52, %v1533_v34  ;;  %v1424_v55 = vadd.f32 %v1420_v62, %v1316_v40  ;;  %v1109_v53 = vmul.f32 %v4680_v41, %v3593_v43  ;;  %v4685_v62 = vld [vmem:[#allocation76_spill] sm:$0xff] }
 0x292   : > { %v799_v14 = vmul.f32 %v2572_v57, %v2571_v50  ;;  %v1222_v21 = vadd.f32 %v1218_v33, %v1114_v42  ;;  %v907_v1 = vmul.f32 %v2574_v9, %v2573_v4  ;;  %v1015_v44 = vmul.f32 %v4684_v25, %v4638_v60  ;;  %v4687_v33 = vld [vmem:[#allocation87_spill] sm:$0xff] }
 0x293   : > { %4683 = vst [vmem:[#allocation64_spill] sm:$0xff] %v3903_v63  ;;  %v1005_v7 = vadd.f32 %v1001_v28, %v897_v27  ;;  %1807 = vrot.lane.b32.xlu1 %v3903_v63, %s2732_s15  ;;  %v1532_v52 = vadd.f32 %v1528_v30, %v1424_v55  ;;  %v1434_v18 = vmul.f32 %v4685_v62, %v3685_v20  ;;  %v4688_v27 = vld [vmem:[#allocation88_spill] sm:$0xff] }
 0x294   : > { %v1542_v41 = vmul.f32 %v4686_v45, %v3691_v31  ;;  %v1217_v3 = vmul.f32 %v4681_v8, %v3605_v16  ;;  %v1330_v26 = vadd.f32 %v1326_v5, %v1222_v21  ;;  %v1325_v34 = vmul.f32 %v4682_v49, %v3607_v39  ;;  %v4689_v49 = vld [vmem:[#allocation56_spill] sm:$0xff] }
 0x295   : > { %v1113_v28 = vadd.f32 %v1109_v53, %v1005_v7  ;;  %v911_v40 = vadd.f32 %v907_v1, %v799_v14  ;;  %v3919_v42 = vadd.f32 %v1636_v13, %v1532_v52  ;;  %v1650_v30 = vmul.f32 %v4687_v33, %v3709_v0  ;;  %v4690_v53 = vld [vmem:[#allocation90_spill] sm:$0xff] }
 0x296   : > { %v1123_v55 = vmul.f32 %v4688_v27, %v3657_v12  ;;  %v798_v63 = vmul.f32 %v2571_v50, %v3883_v2  ;;  %v1438_v23 = vadd.f32 %v1434_v18, %v1330_v26  ;;  %v906_v8 = vmul.f32 %v2573_v4, %v3888_v29  ;;  %v2575_v18 = vld [vmem:[#allocation7 + $0x3f] ss:$0 sm:$0xff] }
 0x297   : > { %v1221_v37 = vadd.f32 %v1217_v3, %v1113_v28  ;;  %v1019_v15 = vadd.f32 %v1015_v44, %v911_v40  ;;  %1805 = vrot.lane.b32.xlu0 %v3919_v42, %s2732_s15  ;;  %v1433_v13 = vmul.f32 %v4685_v62, %v3631_v19  ;;  %v1231_v5 = vmul.f32 %v4689_v49, %v3663_v11 }
 0x298   : > { %v1339_v14 = vmul.f32 %v4690_v53, %v3665_v59  ;;  %v1014_v50 = vmul.f32 %v4684_v25, %v4624_v35  ;;  %v1546_v21 = vadd.f32 %v1542_v41, %v1438_v23  ;;  %v910_v44 = vadd.f32 %v906_v8, %v798_v63  ;;  %v2576_v23 = vld [vmem:[#allocation7 + $0x40] ss:$0 sm:$0xff] }
 0x299   : > { %v1329_v7 = vadd.f32 %v1325_v34, %v1221_v37  ;;  %v1127_v1 = vadd.f32 %v1123_v55, %v1019_v15  ;;  %v1541_v4 = vmul.f32 %v4686_v45, %v3633_v54  ;;  %v1649_v52 = vmul.f32 %v4687_v33, %v3635_v6 }
 0x29a   : > { %v1122_v62 = vmul.f32 %v4688_v27, %v3593_v43  ;;  %v812_v3 = vmul.f32 %v2575_v18, %v2572_v57  ;;  %v3943_v26 = vadd.f32 %v1650_v30, %v1546_v21  ;;  %v1018_v25 = vadd.f32 %v1014_v50, %v910_v44 }
 0x29b   : > { %v1437_v28 = vadd.f32 %v1433_v13, %v1329_v7  ;;  %v1235_v40 = vadd.f32 %v1231_v5, %v1127_v1  ;;  %v1447_v15 = vmul.f32 %v3508_v56, %v3685_v20  ;;  %v1230_v37 = vmul.f32 %v4689_v49, %v3605_v16 }
 0x29c   : > { %v920_v63 = vmul.f32 %v2576_v23, %v2574_v9  ;;  %v1028_v45 = vmul.f32 %v3512_v22, %v4638_v60  ;;  %1837 = vrot.lane.b32.xlu1 %v3943_v26, %s2732_s15  ;;  %v1126_v34 = vadd.f32 %v1122_v62, %v1018_v25  ;;  %v1338_v33 = vmul.f32 %v4690_v53, %v3607_v39 }
 0x29d   : > { %v1545_v57 = vadd.f32 %v1541_v4, %v1437_v28  ;;  %v1343_v41 = vadd.f32 %v1339_v14, %v1235_v40  ;;  %v1555_v30 = vmul.f32 %v3522_v48, %v3691_v31  ;;  %v811_v13 = vmul.f32 %v2575_v18, %v3883_v2 }
 0x29e   : > { %v924_v27 = vadd.f32 %v920_v63, %v812_v3  ;;  %v1234_v9 = vadd.f32 %v1230_v37, %v1126_v34  ;;  %v1136_v49 = vmul.f32 %v3543_v36, %v3657_v12  ;;  %v919_v5 = vmul.f32 %v2576_v23, %v3888_v29  ;;  %v4692_v63 = vld [vmem:[#allocation82_spill] sm:$0xff]  ;;  %v4694_v34 = vld [vmem:[#allocation84_spill] sm:$0xff] }
 0x29f   : > { %v3957_v55 = vadd.f32 %v1649_v52, %v1545_v57  ;;  %v1451_v8 = vadd.f32 %v1447_v15, %v1343_v41  ;;  %v1027_v14 = vmul.f32 %v3512_v22, %v4624_v35  ;;  %v1663_v50 = vmul.f32 %v3524_v58, %v3709_v0 }
 0x2a0   : > { %v1032_v60 = vadd.f32 %v1028_v45, %v924_v27  ;;  %v1342_v21 = vadd.f32 %v1338_v33, %v1234_v9  ;;  %v1446_v2 = vmul.f32 %v3508_v56, %v3631_v19  ;;  %v1244_v12 = vmul.f32 %v3551_v38, %v3663_v11 }
 0x2a1   : > { %1835 = vrot.lane.b32.xlu0 %v3957_v55, %s2732_s15  ;;  %v1559_v53 = vadd.f32 %v1555_v30, %v1451_v8  ;;  %v1352_v29 = vmul.f32 %v3557_v46, %v3665_v59  ;;  %v923_v1 = vadd.f32 %v919_v5, %v811_v13  ;;  %v1554_v44 = vmul.f32 %v3522_v48, %v3633_v54  ;;  %v4695_v8 = vld [vmem:[#allocation85_spill] sm:$0xff]  ;;  %v4696_v13 = vld [vmem:[#allocation63_spill] sm:$0xff]  ;;  %v4697_v5 = vld [vmem:[#allocation86_spill] sm:$0xff] }
 0x2a2   : > { %v1140_v7 = vadd.f32 %v1136_v49, %v1032_v60  ;;  %v1450_v35 = vadd.f32 %v1446_v2, %v1342_v21  ;;  %v1135_v62 = vmul.f32 %v3543_v36, %v3593_v43  ;;  %v1662_v11 = vmul.f32 %v3524_v58, %v3635_v6  ;;  %v4698_v21 = vld [vmem:[#allocation25_spill] sm:$0xff] }
 0x2a3   : > { %v3975_v22 = vadd.f32 %v1663_v50, %v1559_v53  ;;  %v1031_v52 = vadd.f32 %v1027_v14, %v923_v1  ;;  %v1460_v59 = vmul.f32 %v3574_v10, %v3685_v20  ;;  %v1243_v48 = vmul.f32 %v3551_v38, %v3605_v16 }
 0x2a4   : > { %v1248_v4 = vadd.f32 %v1244_v12, %v1140_v7  ;;  %v1558_v56 = vadd.f32 %v1554_v44, %v1450_v35  ;;  %v1351_v28 = vmul.f32 %v3557_v46, %v3607_v39  ;;  %v1568_v43 = vmul.f32 %v3587_v61, %v3691_v31  ;;  %v4699_v7 = vld [vmem:[#allocation89_spill] sm:$0xff] }
 0x2a5   : > { %1867 = vrot.lane.b32.xlu1 %v3975_v22, %s2732_s15  ;;  %v1139_v3 = vadd.f32 %v1135_v62, %v1031_v52  ;;  %v1676_v20 = vmul.f32 %v3589_v32, %v3709_v0  ;;  %v1459_v38 = vmul.f32 %v3574_v10, %v3631_v19  ;;  %v1567_v39 = vmul.f32 %v3587_v61, %v3633_v54  ;;  %v4691_v10 = vld [vmem:[#allocation77_spill] sm:$0xff]  ;;  %v4702_v62 = vld [vmem:[#allocation39_spill] sm:$0xff] }
 0x2a6   : > { %v1356_v18 = vadd.f32 %v1352_v29, %v1248_v4  ;;  %v3991_v40 = vadd.f32 %v1662_v11, %v1558_v56  ;;  %v1675_v37 = vmul.f32 %v3589_v32, %v3635_v6  ;;  %v4693_v6 = vld [vmem:[#allocation79_spill] sm:$0xff]  ;;  %v4700_v35 = vld [vmem:[#allocation57_spill] sm:$0xff]  ;;  %v4701_v4 = vld [vmem:[#allocation40_spill] sm:$0xff] }
 0x2a7   : > { %v1247_v25 = vadd.f32 %v1243_v48, %v1139_v3  ;;  %v4704_v48 = vld [vmem:[#allocation61_spill] sm:$0xff] }
 0x2a8   : > { %v1464_v36 = vadd.f32 %v1460_v59, %v1356_v18  ;;  %1865 = vrot.lane.b32.xlu0 %v3991_v40, %s2732_s15  ;;  %v4703_v18 = vld [vmem:[#allocation42_spill] sm:$0xff] }
 0x2a9   : > { %v1355_v15 = vadd.f32 %v1351_v28, %v1247_v25 }
 0x2aa   : > { %v1572_v58 = vadd.f32 %v1568_v43, %v1464_v36 }
 0x2ab   : > { %v1463_v46 = vadd.f32 %v1459_v38, %v1355_v15 }
 0x2ac   : > { %v4001_v16 = vadd.f32 %v1676_v20, %v1572_v58 }
 0x2ad   : > { %v1571_v31 = vadd.f32 %v1567_v39, %v1463_v46  ;;  %v4705_v46 = vld [vmem:[#allocation41_spill] sm:$0xff] }
 0x2ae   : > { %1897 = vrot.lane.b32.xlu1 %v4001_v16, %s2732_s15 }
 0x2af   : > { %v4009_v23 = vadd.f32 %v1675_v37, %v1571_v31  ;;  %v4706_v31 = vld [vmem:[#allocation62_spill] sm:$0xff] }
 0x2b1   : > { %1895 = vrot.lane.b32.xlu0 %v4009_v23, %s2732_s15  ;;  %s4325_s15 = scalar_lea.hbm %s4379_s5, %s2278_s9 }
 0x2b4   : > { %v1682_v0 = vpop.permute.xlu0 %1681 }
 0x2b5   : > { %v4014_v19 = vadd.f32 %v1682_v0, %v4691_v10  ;;  %v4707_v10 = vld [vmem:[#allocation43_spill] sm:$0xff] }
 0x2b7   : > { %1693 = vrot.lane.b32.xlu0 %v4014_v19, %s2733_s16  ;;  %v1714_v61 = vpop.permute.xlu1 %1713 }
 0x2b8   : > { %v1684_v54 = vpop.permute.xlu0 %1683  ;;  %v4024_v41 = vadd.f32 %v1714_v61, %v4693_v6 }
 0x2b9   : > { %v4019_v45 = vadd.f32 %v1684_v54, %v4692_v63  ;;  %v4708_v63 = vld [vmem:[#allocation31_spill] sm:$0xff] }
 0x2bb   : > { %v1744_v57 = vpop.permute.xlu1 %1743  ;;  %1695 = vrot.lane.b32.xlu1 %v4019_v45, %s2733_s16 }
 0x2bc   : > { %v4034_v9 = vadd.f32 %v1744_v57, %v4695_v8 }
 0x2bd   : > { %v1712_v32 = vpop.permute.xlu0 %1711 }
 0x2be   : > { %v4027_v33 = vadd.f32 %v1712_v32, %v4694_v34 }
 0x2bf   : > { %v1774_v30 = vpop.permute.xlu1 %1773  ;;  %1725 = vrot.lane.b32.xlu1 %v4024_v41, %s2733_s16 }
 0x2c0   : > { %1723 = vrot.lane.b32.xlu0 %v4027_v33, %s2733_s16  ;;  %v4044_v14 = vadd.f32 %v1774_v30, %v4697_v5  ;;  %v4710_v30 = vld [vmem:[#allocation46_spill] sm:$0xff] }
 0x2c1   : > { %v1742_v27 = vpop.permute.xlu0 %1741 }
 0x2c2   : > { %v4037_v60 = vadd.f32 %v1742_v27, %v4696_v13  ;;  %v4711_v13 = vld [vmem:[#allocation64_spill] sm:$0xff] }
 0x2c3   : > { %v1804_v49 = vpop.permute.xlu1 %1803  ;;  %1755 = vrot.lane.b32.xlu1 %v4034_v9, %s2733_s16 }
 0x2c4   : > { %1753 = vrot.lane.b32.xlu0 %v4037_v60, %s2733_s16  ;;  %v4052_v12 = vadd.f32 %v1804_v49, %v4699_v7 }
 0x2c7   : > { %v1834_v53 = vpop.permute.xlu1 %1833  ;;  %1785 = vrot.lane.b32.xlu1 %v4044_v14, %s2733_s16 }
 0x2c8   : > { %v1772_v50 = vpop.permute.xlu0 %1771  ;;  %v4059_v44 = vadd.f32 %v1834_v53, %v4700_v35 }
 0x2c9   : > { %v4049_v2 = vadd.f32 %v1772_v50, %v4698_v21 }
 0x2cb   : > { %1783 = vrot.lane.b32.xlu0 %v4049_v2, %s2733_s16  ;;  %1815 = vrot.lane.b32.xlu1 %v4052_v12, %s2733_s16 }
 0x2cc   : > { %v1864_v29 = vpop.permute.xlu1 %1863 }
 0x2cd   : > { %v1802_v1 = vpop.permute.xlu0 %1801  ;;  %v4069_v56 = vadd.f32 %v1864_v29, %v4702_v62 }
 0x2ce   : > { %v4062_v52 = vadd.f32 %v1802_v1, %v4701_v4 }
 0x2cf   : > { %1845 = vrot.lane.b32.xlu1 %v4059_v44, %s2733_s16 }
 0x2d0   : > { %1813 = vrot.lane.b32.xlu0 %v4062_v52, %s2733_s16 }
 0x2d1   : > { %v1894_v11 = vpop.permute.xlu1 %1893 }
 0x2d2   : > { %v4077_v28 = vadd.f32 %v1894_v11, %v4704_v48 }
 0x2d3   : > { %1875 = vrot.lane.b32.xlu1 %v4069_v56, %s2733_s16 }
 0x2d5   : > { %v1832_v59 = vpop.permute.xlu0 %1831 }
 0x2d6   : > { %v4074_v3 = vadd.f32 %v1832_v59, %v4703_v18 }
 0x2d7   : > { %1905 = vrot.lane.b32.xlu1 %v4077_v28, %s2733_s16 }
 0x2d8   : > { %1843 = vrot.lane.b32.xlu0 %v4074_v3, %s2733_s16 }
 0x2da   : > { %v1686_v36 = vpop.permute.xlu1 %1685 }
 0x2dd   : > { %v1862_v43 = vpop.permute.xlu0 %1861 }
 0x2de   : > { %v4084_v25 = vadd.f32 %v1862_v43, %v3705_v47  ;;  %v4099_v47 = vadd.f32 %v1686_v36, %v4705_v46  ;;  %v4186_v43 = vstv %s2265_s10 }
 0x2e0   : > { %1873 = vrot.lane.b32.xlu0 %v4084_v25, %s2733_s16 }
 0x2e3   : > { %v1688_v58 = vpop.permute.xlu1 %1687 }
 0x2e4   : > { %v4089_v20 = vadd.f32 %v1688_v58, %v3737_v24 }
 0x2e6   : > { %v1892_v15 = vpop.permute.xlu0 %1891  ;;  %1699 = vrot.lane.b32.xlu1 %v4089_v20, %s2733_s16 }
 0x2e7   : > { %v4092_v38 = vadd.f32 %v1892_v15, %v3749_v17 }
 0x2e9   : > { %1903 = vrot.lane.b32.xlu0 %v4092_v38, %s2733_s16 }
 0x2eb   : > { %v1718_v39 = vpop.permute.xlu1 %1717 }
 0x2ec   : > { %v4102_v37 = vadd.f32 %v1718_v39, %v4706_v31 }
 0x2ed   : > { %1697 = vrot.lane.b32.xlu0 %v4099_v47, %s2733_s16 }
 0x2ee   : > { %1729 = vrot.lane.b32.xlu1 %v4102_v37, %s2733_s16 }
 0x2ef   : > { %v1716_v24 = vpop.permute.xlu0 %1715 }
 0x2f0   : > { %v4109_v17 = vadd.f32 %v1716_v24, %v3801_v51  ;;  %v4709_v51 = vld [vmem:[#allocation45_spill] sm:$0xff] }
 0x2f2   : > { %1727 = vrot.lane.b32.xlu0 %v4109_v17, %s2733_s16 }
 0x2f3   : > { %v1748_v0 = vpop.permute.xlu1 %1747 }
 0x2f4   : > { %v4114_v61 = vadd.f32 %v1748_v0, %v4707_v10  ;;  %v4194_v10 = vstv %s2266_s25 }
 0x2f6   : > { %1759 = vrot.lane.b32.xlu1 %v4114_v61, %s2733_s16 }
 0x2f7   : > { %v1746_v54 = vpop.permute.xlu0 %1745 }
 0x2f8   : > { %v4119_v57 = vadd.f32 %v1746_v54, %v4708_v63 }
 0x2fa   : > { %1757 = vrot.lane.b32.xlu0 %v4119_v57, %s2733_s16 }
 0x2fd   : > { %v1778_v32 = vpop.permute.xlu1 %1777 }
 0x2fe   : > { %v4124_v6 = vadd.f32 %v1778_v32, %v4709_v51 }
 0x300   : > { %1789 = vrot.lane.b32.xlu1 %v4124_v6, %s2733_s16 }
 0x301   : > { %v1776_v34 = vpop.permute.xlu0 %1775 }
 0x302   : > { %v4129_v27 = vadd.f32 %v1776_v34, %v4710_v30 }
 0x304   : > { %1787 = vrot.lane.b32.xlu0 %v4129_v27, %s2733_s16 }
 0x305   : > { %v1808_v8 = vpop.permute.xlu1 %1807 }
 0x306   : > { %v4134_v49 = vadd.f32 %v1808_v8, %v4711_v13 }
 0x308   : > { %1819 = vrot.lane.b32.xlu1 %v4134_v49, %s2733_s16 }
 0x309   : > { %v1806_v5 = vpop.permute.xlu0 %1805 }
 0x30a   : > { %v4139_v53 = vadd.f32 %v1806_v5, %v3919_v42  ;;  %v4204_v5 = vstv %s2267_s12 }
 0x30c   : > { %1817 = vrot.lane.b32.xlu0 %v4139_v53, %s2733_s16 }
 0x30e   : > { %v1838_v50 = vpop.permute.xlu1 %1837 }
 0x30f   : > { %v4144_v21 = vadd.f32 %v1838_v50, %v3943_v26 }
 0x311   : > { %1849 = vrot.lane.b32.xlu1 %v4144_v21, %s2733_s16 }
 0x313   : > { %v1836_v7 = vpop.permute.xlu0 %1835 }
 0x314   : > { %v4149_v29 = vadd.f32 %v1836_v7, %v3957_v55 }
 0x316   : > { %1847 = vrot.lane.b32.xlu0 %v4149_v29, %s2733_s16 }
 0x317   : > { %v1868_v42 = vpop.permute.xlu1 %1867 }
 0x318   : > { %v4154_v1 = vadd.f32 %v1868_v42, %v3975_v22 }
 0x31a   : > { %1879 = vrot.lane.b32.xlu1 %v4154_v1, %s2733_s16  ;;  %v1866_v26 = vpop.permute.xlu0 %1865 }
 0x31b   : > { %v4159_v35 = vadd.f32 %v1866_v26, %v3991_v40  ;;  %v4174_v40 = vstv %s1705_s30  ;;  %s2734_s30 = smov [#allocation10]  }
 0x31c   : > { %s2652_s10 = sshll.u32 %s2734_s30, 4  ;;  %s2653_s10 = int_to_ptr.vmem [resolvable:$false] %s2652_s10 }
 0x31d   : > { %1877 = vrot.lane.b32.xlu0 %v4159_v35, %s2733_s16  ;;  %s2654_s13 = scalar_lea.vmem %s2653_s10, 8192  ;;  %p2655_p8 = scmp.lt.s32.totalorder %s4327_s7, %s2653_s10 }
 0x320   : > { %v1898_v55 = vpop.permute.xlu1 %1897 }
 0x321   : > { %v4164_v4 = vadd.f32 %v1898_v55, %v4001_v16 }
 0x323   : > { %1909 = vrot.lane.b32.xlu1 %v4164_v4, %s2733_s16  ;;  %v1896_v22 = vpop.permute.xlu0 %1895 }
 0x324   : > { %v4169_v62 = vadd.f32 %v1896_v22, %v4009_v23 }
 0x326   : > { %1907 = vrot.lane.b32.xlu0 %v4169_v62, %s2733_s16  ;;  %s2648_s16 = scalar_lea.vmem %s4327_s7, 4096 }
 0x327   : > { %p2649_p3 = scmp.ne.s32.totalorder %s4327_s7, %s2648_s16  ;;  %p2656_p11 = scmp.lt.s32.totalorder %s2654_s13, %s2648_s16 }
 0x329   : > { %v1694_v11 = vpop.permute.xlu0 %1693  ;;  %p2650_p4 = pnand %p2649_p3, %p2805_p5  ;;  %p2657_p13 = por %p2656_p11, %p2655_p8 }
 0x32a   : > { %v1701_v59 = vadd.f32 %v1694_v11, %v4014_v19 }
 0x32b   : > { %p2651_p7 = pneg %p2650_p4 }
 0x32c   : > { %v1707_v16 = vadd.f32 %v4174_v40, %v1701_v59  ;;  %v4209_v59 = vstv %s2268_s17 }
 0x32d   : > { %v1696_v48 = vpop.permute.xlu1 %1695  ;;  %p2658_p1 = pnand %p2657_p13, %p2651_p7 }
 0x32e   : > { %vm1921_vm4 = vcmp.ge.f32.partialorder %v1707_v16, 0.0  ;;  %v1953_v18 = vmul.f32 0.2, %v1707_v16  ;;  %v1702_v23 = vadd.f32 %v1696_v48, %v4019_v45 }
 0x330   : > { %v1985_v36 = vsel %vm1921_vm4, %v1707_v16, %v1953_v18  ;;  %v1708_v19 = vadd.f32 %v4174_v40, %v1702_v23 }
 0x331   : > { %2018 = vst.msk [vmem:[%s4181_s11] sm:$0xff] %vm2017_vm3, %v1985_v36  ;;  %v1726_v58 = vpop.permute.xlu1 %1725 }
 0x332   : > { %v1724_v15 = vpop.permute.xlu0 %1723  ;;  %vm1922_vm5 = vcmp.ge.f32.partialorder %v1708_v19, 0.0  ;;  %v1954_v46 = vmul.f32 0.2, %v1708_v19  ;;  %v1732_v39 = vadd.f32 %v1726_v58, %v4024_v41  ;;  %v4220_v58 = vstv %s2269_s23 }
 0x333   : > { %v1731_v45 = vadd.f32 %v1724_v15, %v4027_v33 }
 0x334   : > { %v1986_v31 = vsel %vm1922_vm5, %v1708_v19, %v1954_v46  ;;  %v1738_v24 = vadd.f32 %v4186_v43, %v1732_v39 }
 0x335   : > { %v1737_v0 = vadd.f32 %v4186_v43, %v1731_v45  ;;  %2019 = vst.msk [vmem:[%s4181_s11 + $0x8] sm:$0xff] %vm2017_vm3, %v1986_v31  ;;  %v1756_v54 = vpop.permute.xlu1 %1755 }
 0x336   : > { %v1754_v63 = vpop.permute.xlu0 %1753  ;;  %vm1926_vm6 = vcmp.ge.f32.partialorder %v1738_v24, 0.0  ;;  %v1958_v32 = vmul.f32 0.2, %v1738_v24  ;;  %v1762_v33 = vadd.f32 %v1756_v54, %v4034_v9  ;;  %v4230_v54 = vstv %s2270_s26 }
 0x337   : > { %vm1925_vm7 = vcmp.ge.f32.partialorder %v1737_v0, 0.0  ;;  %v1957_v41 = vmul.f32 0.2, %v1737_v0  ;;  %v1761_v51 = vadd.f32 %v1754_v63, %v4037_v60 }
 0x338   : > { %v1990_v34 = vsel %vm1926_vm6, %v1738_v24, %v1958_v32  ;;  %v1768_v8 = vadd.f32 %v4194_v10, %v1762_v33 }
 0x339   : > { %v1989_v30 = vsel %vm1925_vm7, %v1737_v0, %v1957_v41  ;;  %2023 = vst.msk [vmem:[%s4181_s11 + $0x28] sm:$0xff] %vm2017_vm3, %v1990_v34  ;;  %v1767_v13 = vadd.f32 %v4194_v10, %v1761_v51  ;;  %v1786_v50 = vpop.permute.xlu1 %1785 }
 0x33a   : > { %2022 = vst.msk [vmem:[%s4181_s11 + $0x20] sm:$0xff] %vm2017_vm3, %v1989_v30  ;;  %v1792_v9 = vadd.f32 %v1786_v50, %v4044_v14  ;;  %vm1930_vm8 = vcmp.ge.f32.partialorder %v1768_v8, 0.0  ;;  %v1962_v60 = vmul.f32 0.2, %v1768_v8 }
 0x33b   : > { %vm1929_vm9 = vcmp.ge.f32.partialorder %v1767_v13, 0.0  ;;  %v1961_v7 = vmul.f32 0.2, %v1767_v13 }
 0x33c   : > { %v1798_v42 = vadd.f32 %v4204_v5, %v1792_v9  ;;  %v1994_v55 = vsel %vm1930_vm8, %v1768_v8, %v1962_v60  ;;  %v4239_v8 = vstv %s2271_s6 }
 0x33d   : > { %v1784_v26 = vpop.permute.xlu0 %1783  ;;  %v1993_v22 = vsel %vm1929_vm9, %v1767_v13, %v1961_v7  ;;  %v1816_v16 = vpop.permute.xlu1 %1815  ;;  %2027 = vst.msk [vmem:[%s4181_s11 + $0x48] sm:$0xff] %vm2017_vm3, %v1994_v55 }
 0x33e   : > { %v1791_v11 = vadd.f32 %v1784_v26, %v4049_v2  ;;  %2026 = vst.msk [vmem:[%s4181_s11 + $0x40] sm:$0xff] %vm2017_vm3, %v1993_v22  ;;  %vm1934_vm10 = vcmp.ge.f32.partialorder %v1798_v42, 0.0  ;;  %v1966_v14 = vmul.f32 0.2, %v1798_v42  ;;  %v1822_v18 = vadd.f32 %v1816_v16, %v4052_v12 }
 0x340   : > { %v1797_v48 = vadd.f32 %v4204_v5, %v1791_v11  ;;  %v1998_v23 = vsel %vm1934_vm10, %v1798_v42, %v1966_v14  ;;  %v1828_v36 = vadd.f32 %v4209_v59, %v1822_v18 }
 0x341   : > { %2031 = vst.msk [vmem:[%s4181_s11 + $0x68] sm:$0xff] %vm2017_vm3, %v1998_v23  ;;  %v1846_v15 = vpop.permute.xlu1 %1845 }
 0x342   : > { %vm1933_vm11 = vcmp.ge.f32.partialorder %v1797_v48, 0.0  ;;  %v1965_v2 = vmul.f32 0.2, %v1797_v48  ;;  %v1814_v19 = vpop.permute.xlu0 %1813  ;;  %vm1938_vm12 = vcmp.ge.f32.partialorder %v1828_v36, 0.0  ;;  %v1970_v46 = vmul.f32 0.2, %v1828_v36 }
 0x343   : > { %v1821_v12 = vadd.f32 %v1814_v19, %v4062_v52  ;;  %v1852_v39 = vadd.f32 %v1846_v15, %v4059_v44 }
 0x344   : > { %v1997_v45 = vsel %vm1933_vm11, %v1797_v48, %v1965_v2  ;;  %v2002_v31 = vsel %vm1938_vm12, %v1828_v36, %v1970_v46 }
 0x345   : > { %2030 = vst.msk [vmem:[%s4181_s11 + $0x60] sm:$0xff] %vm2017_vm3, %v1997_v45  ;;  %v1827_v24 = vadd.f32 %v4209_v59, %v1821_v12  ;;  %v1858_v0 = vadd.f32 %v4220_v58, %v1852_v39  ;;  %2035 = vst.msk [vmem:[%s4181_s11 + $0x88] sm:$0xff] %vm2017_vm3, %v2002_v31  ;;  %v1876_v63 = vpop.permute.xlu1 %1875 }
 0x346   : > { %v1882_v44 = vadd.f32 %v1876_v63, %v4069_v56 }
 0x347   : > { %vm1937_vm13 = vcmp.ge.f32.partialorder %v1827_v24, 0.0  ;;  %v1969_v32 = vmul.f32 0.2, %v1827_v24  ;;  %vm1942_vm14 = vcmp.ge.f32.partialorder %v1858_v0, 0.0  ;;  %v1974_v52 = vmul.f32 0.2, %v1858_v0 }
 0x348   : > { %v1888_v30 = vadd.f32 %v4230_v54, %v1882_v44 }
 0x349   : > { %v2001_v41 = vsel %vm1937_vm13, %v1827_v24, %v1969_v32  ;;  %v2006_v33 = vsel %vm1942_vm14, %v1858_v0, %v1974_v52  ;;  %v1906_v13 = vpop.permute.xlu1 %1905 }
 0x34a   : > { %v1844_v51 = vpop.permute.xlu0 %1843  ;;  %2034 = vst.msk [vmem:[%s4181_s11 + $0x80] sm:$0xff] %vm2017_vm3, %v2001_v41  ;;  %2039 = vst.msk [vmem:[%s4181_s11 + $0xa8] sm:$0xff] %vm2017_vm3, %v2006_v33  ;;  %v1912_v50 = vadd.f32 %v1906_v13, %v4077_v28  ;;  %vm1946_vm15 = vcmp.ge.f32.partialorder %v1888_v30, 0.0  ;;  %v1978_v9 = vmul.f32 0.2, %v1888_v30 }
 0x34b   : > { %v1851_v34 = vadd.f32 %v1844_v51, %v4074_v3 }
 0x34c   : > { %v1918_v60 = vadd.f32 %v4239_v8, %v1912_v50  ;;  %v2010_v42 = vsel %vm1946_vm15, %v1888_v30, %v1978_v9 }
 0x34d   : > { %v1857_v56 = vadd.f32 %v4220_v58, %v1851_v34  ;;  %2043 = vst.msk [vmem:[%s4181_s11 + $0xc8] sm:$0xff] %vm2017_vm3, %v2010_v42 }
 0x34e   : > { %vm1950_vm1 = vcmp.ge.f32.partialorder %v1918_v60, 0.0  ;;  %v1982_v3 = vmul.f32 0.2, %v1918_v60 }
 0x34f   : > { %vm1941_vm0 = vcmp.ge.f32.partialorder %v1857_v56, 0.0  ;;  %v1973_v7 = vmul.f32 0.2, %v1857_v56 }
 0x350   : > { %v2014_v28 = vsel %vm1950_vm1, %v1918_v60, %v1982_v3 }
 0x351   : > { %v2005_v26 = vsel %vm1941_vm0, %v1857_v56, %v1973_v7  ;;  %2047 = vst.msk [vmem:[%s4181_s11 + $0xe8] sm:$0xff] %vm2017_vm3, %v2014_v28 }
 0x352   : > { %2038 = vst.msk [vmem:[%s4181_s11 + $0xa0] sm:$0xff] %vm2017_vm3, %v2005_v26  ;;  %v1874_v55 = vpop.permute.xlu0 %1873 }
 0x353   : > { %v1881_v22 = vadd.f32 %v1874_v55, %v4084_v25 }
 0x355   : > { %v1887_v11 = vadd.f32 %v4230_v54, %v1881_v22 }
 0x357   : > { %vm1945_vm2 = vcmp.ge.f32.partialorder %v1887_v11, 0.0  ;;  %v1977_v16 = vmul.f32 0.2, %v1887_v11 }
 0x358   : > { %v1700_v14 = vpop.permute.xlu1 %1699 }
 0x359   : > { %v2009_v18 = vsel %vm1945_vm2, %v1887_v11, %v1977_v16  ;;  %v1704_v48 = vadd.f32 %v1700_v14, %v4089_v20 }
 0x35a   : > { %2042 = vst.msk [vmem:[%s4181_s11 + $0xc0] sm:$0xff] %vm2017_vm3, %v2009_v18 }
 0x35b   : > { %v1904_v23 = vpop.permute.xlu0 %1903  ;;  %v1710_v2 = vadd.f32 %v4174_v40, %v1704_v48 }
 0x35c   : > { %v1911_v36 = vadd.f32 %v1904_v23, %v4092_v38 }
 0x35d   : > { %vm1924_vm4 = vcmp.ge.f32.partialorder %v1710_v2, 0.0  ;;  %v1956_v19 = vmul.f32 0.2, %v1710_v2 }
 0x35e   : > { %v1917_v25 = vadd.f32 %v4239_v8, %v1911_v36 }
 0x35f   : > { %v1698_v15 = vpop.permute.xlu0 %1697  ;;  %v1988_v12 = vsel %vm1924_vm4, %v1710_v2, %v1956_v19 }
 0x360   : > { %vm1949_vm5 = vcmp.ge.f32.partialorder %v1917_v25, 0.0  ;;  %v1981_v46 = vmul.f32 0.2, %v1917_v25  ;;  %v1703_v39 = vadd.f32 %v1698_v15, %v4099_v47  ;;  %v1730_v20 = vpop.permute.xlu1 %1729  ;;  %2021 = vst.msk [vmem:[%s4181_s11 + $0x18] sm:$0xff] %vm2017_vm3, %v1988_v12 }
 0x361   : > { %v1734_v45 = vadd.f32 %v1730_v20, %v4102_v37 }
 0x362   : > { %v2013_v38 = vsel %vm1949_vm5, %v1917_v25, %v1981_v46  ;;  %v1709_v31 = vadd.f32 %v4174_v40, %v1703_v39 }
 0x363   : > { %2046 = vst.msk [vmem:[%s4181_s11 + $0xe0] sm:$0xff] %vm2017_vm3, %v2013_v38  ;;  %v1740_v24 = vadd.f32 %v4186_v43, %v1734_v45 }
 0x364   : > { %vm1923_vm6 = vcmp.ge.f32.partialorder %v1709_v31, 0.0  ;;  %v1955_v0 = vmul.f32 0.2, %v1709_v31  ;;  %v1728_v32 = vpop.permute.xlu0 %1727 }
 0x365   : > { %vm1928_vm7 = vcmp.ge.f32.partialorder %v1740_v24, 0.0  ;;  %v1960_v63 = vmul.f32 0.2, %v1740_v24  ;;  %v1733_v52 = vadd.f32 %v1728_v32, %v4109_v17 }
 0x366   : > { %v1987_v47 = vsel %vm1923_vm6, %v1709_v31, %v1955_v0 }
 0x367   : > { %2020 = vst.msk [vmem:[%s4181_s11 + $0x10] sm:$0xff] %vm2017_vm3, %v1987_v47  ;;  %v1992_v44 = vsel %vm1928_vm7, %v1740_v24, %v1960_v63  ;;  %v1739_v37 = vadd.f32 %v4186_v43, %v1733_v52 }
 0x368   : > { %2025 = vst.msk [vmem:[%s4181_s11 + $0x38] sm:$0xff] %vm2017_vm3, %v1992_v44  ;;  %v1760_v40 = vpop.permute.xlu1 %1759 }
 0x369   : > { %vm1927_vm8 = vcmp.ge.f32.partialorder %v1739_v37, 0.0  ;;  %v1959_v41 = vmul.f32 0.2, %v1739_v37  ;;  %v1764_v33 = vadd.f32 %v1760_v40, %v4114_v61 }
 0x36b   : > { %v1991_v51 = vsel %vm1927_vm8, %v1739_v37, %v1959_v41  ;;  %v1770_v34 = vadd.f32 %v4194_v10, %v1764_v33 }
 0x36c   : > { %2024 = vst.msk [vmem:[%s4181_s11 + $0x30] sm:$0xff] %vm2017_vm3, %v1991_v51  ;;  %v1758_v17 = vpop.permute.xlu0 %1757 }
 0x36d   : > { %vm1932_vm9 = vcmp.ge.f32.partialorder %v1770_v34, 0.0  ;;  %v1964_v30 = vmul.f32 0.2, %v1770_v34  ;;  %v1763_v13 = vadd.f32 %v1758_v17, %v4119_v57 }
 0x36f   : > { %v1996_v50 = vsel %vm1932_vm9, %v1770_v34, %v1964_v30  ;;  %v1769_v43 = vadd.f32 %v4194_v10, %v1763_v13 }
 0x370   : > { %2029 = vst.msk [vmem:[%s4181_s11 + $0x58] sm:$0xff] %vm2017_vm3, %v1996_v50 }
 0x371   : > { %vm1931_vm10 = vcmp.ge.f32.partialorder %v1769_v43, 0.0  ;;  %v1963_v56 = vmul.f32 0.2, %v1769_v43 }
 0x372   : > { %v1790_v61 = vpop.permute.xlu1 %1789 }
 0x373   : > { %v1794_v9 = vadd.f32 %v1790_v61, %v4124_v6  ;;  %v1995_v60 = vsel %vm1931_vm10, %v1769_v43, %v1963_v56 }
 0x374   : > { %2028 = vst.msk [vmem:[%s4181_s11 + $0x50] sm:$0xff] %vm2017_vm3, %v1995_v60 }
 0x375   : > { %v1800_v7 = vadd.f32 %v4204_v5, %v1794_v9 }
 0x376   : > { %v1788_v42 = vpop.permute.xlu0 %1787 }
 0x377   : > { %vm1936_vm11 = vcmp.ge.f32.partialorder %v1800_v7, 0.0  ;;  %v1968_v57 = vmul.f32 0.2, %v1800_v7  ;;  %v1793_v3 = vadd.f32 %v1788_v42, %v4129_v27 }
 0x379   : > { %v2000_v26 = vsel %vm1936_vm11, %v1800_v7, %v1968_v57  ;;  %v1799_v10 = vadd.f32 %v4204_v5, %v1793_v3 }
 0x37a   : > { %2033 = vst.msk [vmem:[%s4181_s11 + $0x78] sm:$0xff] %vm2017_vm3, %v2000_v26  ;;  %v1820_v55 = vpop.permute.xlu1 %1819 }
 0x37b   : > { %vm1935_vm12 = vcmp.ge.f32.partialorder %v1799_v10, 0.0  ;;  %v1967_v6 = vmul.f32 0.2, %v1799_v10  ;;  %v1824_v28 = vadd.f32 %v1820_v55, %v4134_v49 }
 0x37d   : > { %v1999_v22 = vsel %vm1935_vm12, %v1799_v10, %v1967_v6  ;;  %v1830_v11 = vadd.f32 %v4209_v59, %v1824_v28 }
 0x37e   : > { %2032 = vst.msk [vmem:[%s4181_s11 + $0x70] sm:$0xff] %vm2017_vm3, %v1999_v22  ;;  %v1818_v16 = vpop.permute.xlu0 %1817 }
 0x37f   : > { %vm1940_vm13 = vcmp.ge.f32.partialorder %v1830_v11, 0.0  ;;  %v1972_v27 = vmul.f32 0.2, %v1830_v11  ;;  %v1823_v14 = vadd.f32 %v1818_v16, %v4139_v53 }
 0x381   : > { %v2004_v18 = vsel %vm1940_vm13, %v1830_v11, %v1972_v27  ;;  %v1829_v5 = vadd.f32 %v4209_v59, %v1823_v14 }
 0x382   : > { %2037 = vst.msk [vmem:[%s4181_s11 + $0x98] sm:$0xff] %vm2017_vm3, %v2004_v18 }
 0x383   : > { %vm1939_vm14 = vcmp.ge.f32.partialorder %v1829_v5, 0.0  ;;  %v1971_v48 = vmul.f32 0.2, %v1829_v5  ;;  %v1850_v49 = vpop.permute.xlu1 %1849 }
 0x384   : > { %v1854_v23 = vadd.f32 %v1850_v49, %v4144_v21 }
 0x385   : > { %v2003_v36 = vsel %vm1939_vm14, %v1829_v5, %v1971_v48 }
 0x386   : > { %2036 = vst.msk [vmem:[%s4181_s11 + $0x90] sm:$0xff] %vm2017_vm3, %v2003_v36  ;;  %v1860_v2 = vadd.f32 %v4220_v58, %v1854_v23 }
 0x388   : > { %v1848_v25 = vpop.permute.xlu0 %1847  ;;  %vm1944_vm15 = vcmp.ge.f32.partialorder %v1860_v2, 0.0  ;;  %v1976_v53 = vmul.f32 0.2, %v1860_v2 }
 0x389   : > { %v1853_v19 = vadd.f32 %v1848_v25, %v4149_v29 }
 0x38a   : > { %v2008_v15 = vsel %vm1944_vm15, %v1860_v2, %v1976_v53 }
 0x38b   : > { %v1859_v59 = vadd.f32 %v4220_v58, %v1853_v19  ;;  %2041 = vst.msk [vmem:[%s4181_s11 + $0xb8] sm:$0xff] %vm2017_vm3, %v2008_v15 }
 0x38c   : > { %v1880_v46 = vpop.permute.xlu1 %1879 }
 0x38d   : > { %vm1943_vm0 = vcmp.ge.f32.partialorder %v1859_v59, 0.0  ;;  %v1975_v21 = vmul.f32 0.2, %v1859_v59  ;;  %v1884_v12 = vadd.f32 %v1880_v46, %v4154_v1 }
 0x38f   : > { %v2007_v39 = vsel %vm1943_vm0, %v1859_v59, %v1975_v21  ;;  %v1890_v20 = vadd.f32 %v4230_v54, %v1884_v12  ;;  %v1878_v45 = vpop.permute.xlu0 %1877 }
 0x390   : > { %2040 = vst.msk [vmem:[%s4181_s11 + $0xb0] sm:$0xff] %vm2017_vm3, %v2007_v39  ;;  %v1883_v38 = vadd.f32 %v1878_v45, %v4159_v35 }
 0x391   : > { %vm1948_vm1 = vcmp.ge.f32.partialorder %v1890_v20, 0.0  ;;  %v1980_v29 = vmul.f32 0.2, %v1890_v20 }
 0x392   : > { %v1889_v31 = vadd.f32 %v4230_v54, %v1883_v38 }
 0x393   : > { %v2012_v58 = vsel %vm1948_vm1, %v1890_v20, %v1980_v29 }
 0x394   : > { %2045 = vst.msk [vmem:[%s4181_s11 + $0xd8] sm:$0xff] %vm2017_vm3, %v2012_v58  ;;  %vm1947_vm2 = vcmp.ge.f32.partialorder %v1889_v31, 0.0  ;;  %v1979_v1 = vmul.f32 0.2, %v1889_v31 }
 0x395   : > { %v1910_v24 = vpop.permute.xlu1 %1909 }
 0x396   : > { %v1914_v0 = vadd.f32 %v1910_v24, %v4164_v4  ;;  %v2011_v63 = vsel %vm1947_vm2, %v1889_v31, %v1979_v1 }
 0x397   : > { %2044 = vst.msk [vmem:[%s4181_s11 + $0xd0] sm:$0xff] %vm2017_vm3, %v2011_v63 }
 0x398   : > { %v1920_v32 = vadd.f32 %v4239_v8, %v1914_v0  ;;  %v1908_v35 = vpop.permute.xlu0 %1907 }
 0x399   : > { %v1913_v54 = vadd.f32 %v1908_v35, %v4169_v62 }
 0x39a   : > { %vm1952_vm4 = vcmp.ge.f32.partialorder %v1920_v32, 0.0  ;;  %v1984_v47 = vmul.f32 0.2, %v1920_v32 }
 0x39b   : > { %v1919_v44 = vadd.f32 %v4239_v8, %v1913_v54 }
 0x39c   : > { %v2016_v52 = vsel %vm1952_vm4, %v1920_v32, %v1984_v47 }
 0x39d   : > { %2049 = vst.msk [vmem:[%s4181_s11 + $0xf8] sm:$0xff] %vm2017_vm3, %v2016_v52  ;;  %vm1951_vm5 = vcmp.ge.f32.partialorder %v1919_v44, 0.0  ;;  %v1983_v4 = vmul.f32 0.2, %v1919_v44 }
 0x39f   : > { %v2015_v62 = vsel %vm1951_vm5, %v1919_v44, %v1983_v4 }
 0x3a0   : > { %2048 = vst.msk [vmem:[%s4181_s11 + $0xf0] sm:$0xff] %vm2017_vm3, %v2015_v62 }
 0x3a1   : > { %2661 = shalt.err (!%p2658_p1)
}
 0x3a2   : > { %s2662_s8 = scalar_lea.hbm %s4325_s15, 4096  ;;  %s2666_s12 = scalar_lea.hbm %s4379_s5, 8192 }
 0x3a3   : > { %p2663_p0 = scmp.ne.s32.totalorder %s4325_s15, %s2662_s8  ;;  %p2667_p2 = scmp.lt.u32.totalorder %s4325_s15, %s4379_s5 }
 0x3a4   : > { %p2668_p12 = scmp.lt.u32.totalorder %s2666_s12, %s2662_s8  ;;  %p2670_p3 = scmp.lt.u32.totalorder %s2662_s8, %s4325_s15 }
 0x3a5   : > { %p2664_p6 = pnand %p2663_p0, %p2805_p5 }
 0x3a6   : > { %p2669_p10 = por %p2668_p12, %p2667_p2 }
 0x3a7   : > { %p2665_p9 = pneg %p2664_p6 }
 0x3a8   : > { %p2671_p4 = por %p2670_p3, %p2669_p10 }
 0x3aa   : > { %p2672_p7 = pnand %p2671_p4, %p2665_p9 }
 0x3ac   : > { %2675 = shalt.err (!%p2672_p7)
}
 0x3ad   : > { %s2735_s26 = smov 128   ;;  %s2736_s6 = smov 8  }
 0x3ae   : > { %2496 = dma.vmem_to_hbm [thread:$0]  (%p2805_p5), %s4327_s7, 4096, %s4325_s15, %s4333_s22, %s2735_s26, %s2735_s26, %s2736_s6  }
 0x3af PF: > { %p2518_p8 = scmp.ge.s32.totalorder %s2722_s21, 2  ;;  %s2079_s9 = sand.u32 1, %s2710_s18  }
 0x3b0   : > { %p4712_p11 = scmp.ne.s32.totalorder %s4514_s29, 0  ;;  %s2080_s4 = scalar_lea.sflag [#allocation5], %s2079_s9 }
 0x3b2   : > { %p2509_p13 = pnand %p2518_p8, %p4712_p11 }
 0x3b4   : > { %2705 = dma.done.wait (!%p2509_p13), %s2080_s4, 4096  }
 0x3b5   : > { %2707 = vsyncadd (!%p2509_p13), %s2080_s4, 4294963200  ;;  %p18_p1 = scmp.ge.s32.totalorder %s2792_s24, 4   ;;  %s4713_s18 = smov %s2714_s19 }
 0x3b6   : > { %s4714_s19 = smov %s2718_s20  ;;  %s4715_s20 = smov %s2803_s27 }
 0x3b7   : > { %s4716_s21 = smov %s2792_s24  ;;  %20 = sbr.rel (!%p18_p1) target bundleno = 8 (0x8), region = 93 }
 0x3be   :  { %2085 = vsyncpa [#allocation4], 1 }
 0x3bf   :  { %2087 = vsyncpa [#allocation4 + $0x1], 1 }
 0x3c0   :  { %2088 = vsyncpa [#allocation8], 1 }
 0x3c1   :  { %2089 = vsyncpa [#allocation5], 1 }
 0x3c2   :  { %2091 = vsyncpa [#allocation5 + $0x1], 1 }
 0x3c3   :  { %2092 = vsyncpa [#allocation6], 1 }
 0x3c4   :  { %2094 = vsyncpa [#allocation6 + $0x1], 1 }

</bundles_post_ra>
